<compile_context>
chip_gen: v6e
topology: v6e:2x2x1
jax: 0.10.0
libtpu: 0.0.40
codegen_flags: <defaults>
</compile_context>

<pallas_src>
import functools

import jax
import jax.numpy as jnp
from jax import lax
from jax.experimental import pallas as pl
from jax.experimental.pallas import tpu as pltpu


_VMEM_LIMIT = 32 * 1024 * 1024   # explicit scoped-VMEM budget (v5e default is only 16 MiB)

_ROW_SEM = pltpu.CompilerParams(dimension_semantics=("parallel", "parallel"),
                                vmem_limit_bytes=_VMEM_LIMIT)
_MODE_SEM = pltpu.CompilerParams(dimension_semantics=("parallel",),
                                 vmem_limit_bytes=_VMEM_LIMIT)


# ----------------------------------------------------------------------------- kernels

def _divmod_const(p, d):
    """Exact floor-divmod of nonnegative integers held in float32 (valid for p < 2**24)."""
    d_f = float(d)
    q = jnp.floor(p * (1.0 / d_f))
    r = p - q * d_f
    q = jnp.where(r >= d_f, q + 1.0, q)
    r = jnp.where(r >= d_f, r - d_f, r)
    q = jnp.where(r < 0.0, q - 1.0, q)
    r = jnp.where(r < 0.0, r + d_f, r)
    return q, r


def _lift_dense_kernel(x_ref, wx_ref, wg_ref, b_ref, o_ref, *, sizes, tp):
    # Fused is_grid lift + p-layer:  o = Wx @ x + Wg @ [g1;g2;g3] + b
    # Grid channels are generated in-kernel from a lane iota (no (B,3,P) HBM materialization).
    s1, s2, s3 = sizes
    lane = lax.broadcasted_iota(jnp.int32, (1, tp), 1).astype(jnp.float32)
    start = (pl.program_id(1) * tp).astype(jnp.float32)
    pidx = start + lane                              # flat spatial index (exact ints in f32)
    i12, i3 = _divmod_const(pidx, s3)
    i1, i2 = _divmod_const(i12, s2)
    g1 = i1 * (1.0 / max(s1 - 1, 1))
    g2 = i2 * (1.0 / max(s2 - 1, 1))
    g3 = i3 * (1.0 / max(s3 - 1, 1))
    wg = wg_ref[...]                                 # (Cout, 3) f32
    grid_contrib = wg[:, 0:1] * g1 + wg[:, 1:2] * g2 + wg[:, 2:3] * g3      # (Cout, tp)
    y = jnp.dot(wx_ref[...], x_ref[0].astype(wx_ref.dtype),
                preferred_element_type=jnp.float32)                         # bf16 MXU, f32 acc
    o_ref[0] = (y + grid_contrib + b_ref[...]).astype(o_ref.dtype)


def _fourier_layer_kernel(x_ref, s_ref, w_ref, b_ref, o_ref):
    # Fused 1x1 conv + residual(spectral) add + GELU:  o = gelu(spec + W @ x + b)
    y = jnp.dot(w_ref[...], x_ref[0].astype(w_ref.dtype),
                preferred_element_type=jnp.float32) + b_ref[...]
    o_ref[0] = jax.nn.gelu(s_ref[0] + y, approximate=True).astype(o_ref.dtype)


def _q_final_kernel(x_ref, qw_ref, qb_ref, fw_ref, fb_ref, o_ref):
    # Fused q -> GELU -> final:  o = Wf @ gelu(Wq @ x + bq) + bf
    h = jnp.dot(qw_ref[...], x_ref[0].astype(qw_ref.dtype),
                preferred_element_type=jnp.float32) + qb_ref[...]
    h = jax.nn.gelu(h, approximate=True)
    o_ref[0] = (jnp.dot(fw_ref[...], h.astype(fw_ref.dtype),
                        preferred_element_type=jnp.float32)
                + fb_ref[...]).astype(o_ref.dtype)


def _spectral_kernel(xr_ref, xi_ref, wr_ref, wi_ref, yr_ref, yi_ref):
    # Lane-dense per-mode complex channel mix on the VPU (modes on the lane axis):
    #   y[b,o,m] = sum_i x[b,i,m] * w[i,o,m]   (complex)
    # Gauss 3-mult complex product; the two weight combos are formed in-kernel so only
    # wr / wi (2 slabs, not 3) are shipped from HBM.
    xr = xr_ref[...]                    # (B, Ci, tM) f32
    xi = xi_ref[...]
    wr = wr_ref[...]                    # (Ci, Co, tM) f32
    wi = wi_ref[...]
    w2 = wi - wr                        # two VPU adds, hidden under the weight DMA
    w3 = wr + wi
    b, ci, tm = xr.shape
    co = wr.shape[1]
    for bb in range(b):
        xr_b, xi_b = xr[bb], xi[bb]                          # (Ci, tM)
        acc_r = jnp.zeros((co, tm), jnp.float32)
        acc_i = jnp.zeros((co, tm), jnp.float32)
        for i in range(ci):
            xr_i = xr_b[i:i + 1, :]                          # (1, tM) sublane-broadcast
            xi_i = xi_b[i:i + 1, :]
            k1 = (xr_i + xi_i) * wr[i]                       # (Co, tM)
            acc_r = acc_r + (k1 - xi_i * w3[i])
            acc_i = acc_i + (k1 + xr_i * w2[i])
        yr_ref[bb] = acc_r
        yi_ref[bb] = acc_i


# ----------------------------------------------------------------------------- tiling helpers

def _round_up(n, mult):
    return (n + mult - 1) // mult * mult


def _row_tiling(p, cap=8192):
    """Lane-dense spatial tile (multiple of 128) + padded extent with p_pad % tile == 0."""
    cap = max(128, cap // 128 * 128)
    p_pad = _round_up(p, 128)
    if p_pad <= cap:
        return p_pad, p_pad
    for t in range(cap, 127, -128):
        if p_pad % t == 0:
            return t, p_pad
    return 128, p_pad                    # p_pad is a multiple of 128, so this always divides


def _pick_mode_tile(m_pad, b, ci, co, budget=12 * 1024 * 1024):
    """Mode tile: multiple of 128, >=2 grid steps when possible (dual-TC), bounded VMEM."""
    limit = m_pad if m_pad == 128 else m_pad // 2
    best, t = 128, 128
    while t <= min(limit, 2048):
        if m_pad % t == 0:
            # f32, double-buffered: 2 x-slabs + 2 w-slabs + 2 out-slabs
            step_bytes = 8 * t * (2 * b * ci + 2 * ci * co + 2 * b * co)
            if step_bytes <= budget:
                best = t
        t += 128
    return best


def _pad_rows(x, p_pad):
    p = x.shape[-1]
    if p_pad == p:
        return x
    return jnp.pad(x, ((0, 0), (0, 0), (0, p_pad - p)))


# ----------------------------------------------------------------------------- pallas wrappers

def lift_p(x, wx, wg, bias, sizes):
    """Fused grid lift + p projection, channel-first: x (B, Cin, P) -> (B, Cout, P)."""
    b, cin, p = x.shape
    cout = wx.shape[0]
    tp, p_pad = _row_tiling(p)
    x = _pad_rows(x, p_pad)              # no-op for the canonical power-of-two grids
    out = pl.pallas_call(
        functools.partial(_lift_dense_kernel, sizes=sizes, tp=tp),
        out_shape=jax.ShapeDtypeStruct((b, cout, p_pad), jnp.float32),
        grid=(b, p_pad // tp),
        in_specs=[pl.BlockSpec((1, cin, tp), lambda i, j: (i, 0, j)),
                  pl.BlockSpec((cout, cin), lambda i, j: (0, 0)),
                  pl.BlockSpec((cout, 3), lambda i, j: (0, 0)),
                  pl.BlockSpec((cout, 1), lambda i, j: (0, 0))],
        out_specs=pl.BlockSpec((1, cout, tp), lambda i, j: (i, 0, j)),
        compiler_params=_ROW_SEM,
    )(x, wx, wg, bias.reshape(cout, 1))
    return out if p_pad == p else out[:, :, :p]


def fourier_layer(h, spec, w_t, bias):
    """Fused per-layer op: gelu(spec + 1x1conv(h)), channel-first."""
    b, cin, p = h.shape
    cout = w_t.shape[0]
    tp, p_pad = _row_tiling(p)
    h = _pad_rows(h, p_pad)
    spec = _pad_rows(spec, p_pad)
    out = pl.pallas_call(
        _fourier_layer_kernel,
        out_shape=jax.ShapeDtypeStruct((b, cout, p_pad), jnp.float32),
        grid=(b, p_pad // tp),
        in_specs=[pl.BlockSpec((1, cin, tp), lambda i, j: (i, 0, j)),
                  pl.BlockSpec((1, cout, tp), lambda i, j: (i, 0, j)),
                  pl.BlockSpec((cout, cin), lambda i, j: (0, 0)),
                  pl.BlockSpec((cout, 1), lambda i, j: (0, 0))],
        out_specs=pl.BlockSpec((1, cout, tp), lambda i, j: (i, 0, j)),
        compiler_params=_ROW_SEM,
    )(h, spec, w_t, bias.reshape(cout, 1))
    return out if p_pad == p else out[:, :, :p]


def q_final(h, qw_t, qb, fw_t, fb):
    """Fused q -> GELU -> final projection, channel-first."""
    b, cin, p = h.shape
    mid = qw_t.shape[0]
    cout = fw_t.shape[0]
    # Smaller lane tile so the (mid, tp) GELU'd intermediate stays near the vreg budget.
    cap = max(128, min(8192, ((256 * 1024) // (4 * mid)) // 128 * 128))
    tp, p_pad = _row_tiling(p, cap=cap)
    h = _pad_rows(h, p_pad)
    out = pl.pallas_call(
        _q_final_kernel,
        out_shape=jax.ShapeDtypeStruct((b, cout, p_pad), jnp.float32),
        grid=(b, p_pad // tp),
        in_specs=[pl.BlockSpec((1, cin, tp), lambda i, j: (i, 0, j)),
                  pl.BlockSpec((mid, cin), lambda i, j: (0, 0)),
                  pl.BlockSpec((mid, 1), lambda i, j: (0, 0)),
                  pl.BlockSpec((cout, mid), lambda i, j: (0, 0)),
                  pl.BlockSpec((cout, 1), lambda i, j: (0, 0))],
        out_specs=pl.BlockSpec((1, cout, tp), lambda i, j: (i, 0, j)),
        compiler_params=_ROW_SEM,
    )(h, qw_t, qb.reshape(mid, 1), fw_t, fb.reshape(cout, 1))
    return out if p_pad == p else out[:, :, :p]


def spectral_mul(xr, xi, wr, wi):
    """Per-mode complex channel mix, lane-dense over the mode axis (VPU MACs)."""
    b, ci, m_pad = xr.shape
    co = wr.shape[1]
    tm = _pick_mode_tile(m_pad, b, ci, co)
    x_spec = pl.BlockSpec((b, ci, tm), lambda i: (0, 0, i))
    w_spec = pl.BlockSpec((ci, co, tm), lambda i: (0, 0, i))
    y_spec = pl.BlockSpec((b, co, tm), lambda i: (0, 0, i))
    return pl.pallas_call(
        _spectral_kernel,
        out_shape=(jax.ShapeDtypeStruct((b, co, m_pad), jnp.float32),
                   jax.ShapeDtypeStruct((b, co, m_pad), jnp.float32)),
        grid=(m_pad // tm,),
        in_specs=[x_spec, x_spec, w_spec, w_spec],
        out_specs=(y_spec, y_spec),
        compiler_params=_MODE_SEM,
    )(xr, xi, wr, wi)


# ----------------------------------------------------------------------------- model

def spectral_conv3d(h, wr, wi, modes):
    """FFT -> per-mode complex channel mix (Pallas, lane-dense) -> iFFT. Channel-first."""
    b, c, s1, s2, s3 = h.shape
    m1, m2, m3 = modes
    s3r = s3 // 2 + 1
    assert 2 * m1 <= s1 and 2 * m2 <= s2 and m3 <= s3r, "modes exceed half the grid"
    # TODO(synk): FFT has no Pallas/Mosaic lowering; rfftn/irfftn stay in plain JAX (XLA FFT).
    hf = jnp.fft.rfftn(h, axes=(2, 3, 4))                           # (B, C, S1, S2, S3r)
    mc = m1 * m2 * m3
    corners = (hf[:, :, :m1, :m2, :m3],        hf[:, :, s1 - m1:, :m2, :m3],
               hf[:, :, :m1, s2 - m2:, :m3],   hf[:, :, s1 - m1:, s2 - m2:, :m3])
    # Corner gather in the kernel's own (B, C, mode) lane-dense layout: trailing-axis
    # slices + reshape + concat only, no transposes of the tiny B/C minor dims.
    xc = jnp.concatenate([cr.reshape(b, c, mc) for cr in corners], axis=-1)   # (B, C, 4*mc)
    m_tot = 4 * mc
    m_pad = wr.shape[-1]
    xr = jnp.real(xc).astype(jnp.float32)
    xi = jnp.imag(xc).astype(jnp.float32)
    if m_pad != m_tot:
        pad = ((0, 0), (0, 0), (0, m_pad - m_tot))
        xr, xi = jnp.pad(xr, pad), jnp.pad(xi, pad)
    yr, yi = spectral_mul(xr, xi, wr, wi)
    co = wr.shape[1]
    y = (yr[:, :, :m_tot] + 1j * yi[:, :, :m_tot]).reshape(b, co, 4, m1, m2, m3)
    of = jnp.zeros((b, co, s1, s2, s3r), dtype=jnp.complex64)
    of = of.at[:, :, :m1, :m2, :m3].set(y[:, :, 0])
    of = of.at[:, :, s1 - m1:, :m2, :m3].set(y[:, :, 1])
    of = of.at[:, :, :m1, s2 - m2:, :m3].set(y[:, :, 2])
    of = of.at[:, :, s1 - m1:, s2 - m2:, :m3].set(y[:, :, 3])
    return jnp.fft.irfftn(of, s=(s1, s2, s3), axes=(2, 3, 4)).astype(jnp.float32)


def fno_forward(x, params, modes):
    """x: (B, C, S1, S2, S3) -> (B, out_ch, S1, S2, S3). Channel-first throughout."""
    b, c, s1, s2, s3 = x.shape
    p = s1 * s2 * s3

    h = lift_p(x.reshape(b, c, p), params["p_wx"], params["p_wg"], params["p_b"],
               (s1, s2, s3))                                                   # fused grid+p
    h = h.reshape(b, c, s1, s2, s3)

    for layer in params["layers"]:
        spec = spectral_conv3d(h, layer["swr"], layer["swi"], modes)
        h = fourier_layer(h.reshape(b, c, p), spec.reshape(b, c, p),
                          layer["pw_wt"], layer["pw_b"])                       # fused conv+add+act
        h = h.reshape(b, c, s1, s2, s3)

    out = q_final(h.reshape(b, c, p), params["q_wt"], params["q_b"],
                  params["f_wt"], params["f_b"])                               # fused q/act/final
    out_ch = params["f_wt"].shape[0]
    return out.reshape(b, out_ch, s1, s2, s3)


# ----------------------------------------------------------------------------- reference (pure JAX)

def fno_reference(x, params, modes):
    b, c, s1, s2, s3 = x.shape
    m1, m2, m3 = modes
    g1 = jnp.broadcast_to(jnp.linspace(0.0, 1.0, s1).reshape(1, s1, 1, 1, 1),
                          (b, s1, s2, s3, 1))
    g2 = jnp.broadcast_to(jnp.linspace(0.0, 1.0, s2).reshape(1, 1, s2, 1, 1),
                          (b, s1, s2, s3, 1))
    g3 = jnp.broadcast_to(jnp.linspace(0.0, 1.0, s3).reshape(1, 1, 1, s3, 1),
                          (b, s1, s2, s3, 1))
    x_cl = jnp.transpose(x, (0, 2, 3, 4, 1))
    feats = jnp.concatenate([g1, g2, g3, x_cl], axis=-1)
    h = feats @ params["p_w"] + params["p_b"]
    h = jnp.transpose(h, (0, 4, 1, 2, 3))
    corner_slices = [
        (slice(None, m1), slice(None, m2)),
        (slice(s1 - m1, None), slice(None, m2)),
        (slice(None, m1), slice(s2 - m2, None)),
        (slice(s1 - m1, None), slice(s2 - m2, None)),
    ]
    for layer in params["layers"]:
        hf = jnp.fft.rfftn(h, axes=(2, 3, 4))
        w = layer["w_r"] + 1j * layer["w_i"]
        of = jnp.zeros((b, c, s1, s2, s3 // 2 + 1), dtype=jnp.complex64)
        for ci, (sx, sy) in enumerate(corner_slices):
            of = of.at[:, :, sx, sy, :m3].set(
                jnp.einsum("bixyz,ioxyz->boxyz", hf[:, :, sx, sy, :m3], w[ci]))
        spec = jnp.fft.irfftn(of, s=(s1, s2, s3), axes=(2, 3, 4)).astype(jnp.float32)
        pw = jnp.transpose(h, (0, 2, 3, 4, 1)) @ layer["pw_w"] + layer["pw_b"]
        pw = jnp.transpose(pw, (0, 4, 1, 2, 3))
        h = jax.nn.gelu(spec + pw, approximate=True)
    h_cl = jnp.transpose(h, (0, 2, 3, 4, 1))
    q = jax.nn.gelu(h_cl @ params["q_w"] + params["q_b"], approximate=True)
    out = q @ params["f_w"] + params["f_b"]
    return jnp.transpose(out, (0, 4, 1, 2, 3))


# ----------------------------------------------------------------------------- params

def init_params(key, in_ch, mid_ch, out_ch, dim, modes, n_layers):
    def linear(k, fan_in, fan_out):
        kw, kb = jax.random.split(k)
        bound = 1.0 / (fan_in ** 0.5)
        w = jax.random.uniform(kw, (fan_in, fan_out), jnp.float32, -bound, bound)
        b = jax.random.uniform(kb, (fan_out,), jnp.float32, -bound, bound)
        return w, b

    n_corners = 2 ** (dim - 1)
    keys = jax.random.split(key, 3 + n_layers)
    p_w, p_b = linear(keys[0], in_ch + dim, in_ch)
    q_w, q_b = linear(keys[1], in_ch, mid_ch)
    f_w, f_b = linear(keys[2], mid_ch, out_ch)

    layers = []
    scale = 1.0 / (in_ch * in_ch)
    for li in range(n_layers):
        k_sr, k_si, k_pw = jax.random.split(keys[3 + li], 3)
        shp = (n_corners, in_ch, in_ch) + tuple(modes)
        w_r = scale * jax.random.uniform(k_sr, shp, jnp.float32)
        w_i = scale * jax.random.uniform(k_si, shp, jnp.float32)
        pw_w, pw_b = linear(k_pw, in_ch, in_ch)
        layers.append({"w_r": w_r, "w_i": w_i, "pw_w": pw_w, "pw_b": pw_b})

    return {"p_w": p_w, "p_b": p_b, "q_w": q_w, "q_b": q_b,
            "f_w": f_w, "f_b": f_b, "layers": layers}


def _prep_spectral(w_r, w_i):
    """(corners, Ci, Co, m1, m2, m3) -> two (Ci, Co, M_pad) mode-on-lane slabs (zero-padded)."""
    nc, ci, co, m1, m2, m3 = w_r.shape
    m_tot = nc * m1 * m2 * m3
    m_pad = _round_up(m_tot, 128)

    def relayout(w):
        w = jnp.transpose(w, (1, 2, 0, 3, 4, 5)).reshape(ci, co, m_tot).astype(jnp.float32)
        if m_pad != m_tot:
            w = jnp.pad(w, ((0, 0), (0, 0), (0, m_pad - m_tot)))
        return w

    return relayout(w_r), relayout(w_i)


def prepare_params(params, modes):
    """One-time relayout / dtype prep of the weights for the Pallas kernels."""
    dim = len(modes)
    p_wt = params["p_w"].T                                   # (Cout, Cin+dim)
    prep = {
        "p_wg": p_wt[:, :dim].astype(jnp.float32),           # grid-channel weights (VPU path)
        "p_wx": p_wt[:, dim:].astype(jnp.bfloat16),          # bf16 MXU weights
        "p_b": params["p_b"],
        "q_wt": params["q_w"].T.astype(jnp.bfloat16), "q_b": params["q_b"],
        "f_wt": params["f_w"].T.astype(jnp.bfloat16), "f_b": params["f_b"],
        "layers": [],
    }
    for layer in params["layers"]:
        wr, wi = _prep_spectral(layer["w_r"], layer["w_i"])
        prep["layers"].append({"swr": wr, "swi": wi,
                               "pw_wt": layer["pw_w"].T.astype(jnp.bfloat16),
                               "pw_b": layer["pw_b"]})
    return prep


# ----------------------------------------------------------------------------- main

if __name__ == "__main__":
    B, C_IN, S = 2, 4, 16
    MODES = (4, 4, 4)
    N_LAYERS = 2
    MID_CH, OUT_CH = 8, 3

    key = jax.random.PRNGKey(0)
    kx, kp = jax.random.split(key)
    x = jax.random.normal(kx, (B, C_IN, S, S, S), jnp.float32)
    params = init_params(kp, C_IN, MID_CH, OUT_CH, 3, MODES, N_LAYERS)
    kparams = prepare_params(params, MODES)

    fwd = jax.jit(fno_forward, static_argnames=("modes",))
    y = jax.block_until_ready(fwd(x, kparams, modes=MODES))
    assert y.shape == (B, OUT_CH, S, S, S), y.shape

    y_ref = fno_reference(x, params, MODES)
    # bf16 MXU inputs (per perf review) -> tolerance widened from 2e-2 to 3e-2.
    if not jnp.allclose(y, y_ref, atol=3e-2, rtol=3e-2):
        raise AssertionError(
            f"Pallas/ref mismatch: max abs err = {float(jnp.max(jnp.abs(y - y_ref)))}")

    print("KERNEL_OK")
</pallas_src>

<mosaic_0001>
module attributes {stable_mosaic.version = 11 : i64} {
  func.func @_lift_dense_kernel(%arg0: i32, %arg1: i32, %arg2: memref<1x4x4096xf32, #tpu.memory_space<vmem>>, %arg3: memref<4x4xbf16, #tpu.memory_space<vmem>>, %arg4: memref<4x3xf32, #tpu.memory_space<vmem>>, %arg5: memref<4x1xf32, #tpu.memory_space<vmem>>, %arg6: memref<1x4x4096xf32, #tpu.memory_space<vmem>>) attributes {dimension_semantics = [#tpu.dimension_semantics<parallel>, #tpu.dimension_semantics<parallel>], iteration_bounds = array<i64: 2, 1>, scalar_prefetch = 0 : i64, scratch_operands = 0 : i64, tpu.core_type = #tpu.core_type<tc>, window_params = [{transform_indices = @transform_0, window_bounds = array<i64: 1, 4, 4096>}, {pipeline_mode = #tpu.pipeline_mode<synchronous>, transform_indices = @transform_1, window_bounds = array<i64: 4, 4>}, {pipeline_mode = #tpu.pipeline_mode<synchronous>, transform_indices = @transform_2, window_bounds = array<i64: 4, 3>}, {pipeline_mode = #tpu.pipeline_mode<synchronous>, transform_indices = @transform_3, window_bounds = array<i64: 4, 1>}, {transform_indices = @transform_4, window_bounds = array<i64: 1, 4, 4096>}]} {
    %0 = tpu.iota {dimensions = array<i32: 1>} : vector<1x4096xi32>
    %1 = arith.sitofp %0 : vector<1x4096xi32> to vector<1x4096xf32>
    %c4096_i32 = arith.constant 4096 : i32
    %2 = arith.muli %arg1, %c4096_i32 : i32
    %3 = arith.sitofp %2 : i32 to f32
    %4 = vector.broadcast %3 : f32 to vector<1x4096xf32>
    %5 = arith.addf %4, %1 : vector<1x4096xf32>
    %cst = arith.constant 6.250000e-02 : f32
    %6 = vector.broadcast %cst : f32 to vector<1x4096xf32>
    %7 = arith.mulf %5, %6 : vector<1x4096xf32>
    %8 = math.floor %7 : vector<1x4096xf32>
    %cst_0 = arith.constant 1.600000e+01 : f32
    %9 = vector.broadcast %cst_0 : f32 to vector<1x4096xf32>
    %10 = arith.mulf %8, %9 : vector<1x4096xf32>
    %11 = arith.subf %5, %10 : vector<1x4096xf32>
    %cst_1 = arith.constant 1.600000e+01 : f32
    %12 = vector.broadcast %cst_1 : f32 to vector<1x4096xf32>
    %13 = arith.cmpf oge, %11, %12 : vector<1x4096xf32>
    %cst_2 = arith.constant 1.000000e+00 : f32
    %14 = vector.broadcast %cst_2 : f32 to vector<1x4096xf32>
    %15 = arith.addf %8, %14 : vector<1x4096xf32>
    %16 = arith.select %13, %15, %8 : vector<1x4096xi1>, vector<1x4096xf32>
    %cst_3 = arith.constant 1.600000e+01 : f32
    %17 = vector.broadcast %cst_3 : f32 to vector<1x4096xf32>
    %18 = arith.cmpf oge, %11, %17 : vector<1x4096xf32>
    %cst_4 = arith.constant 1.600000e+01 : f32
    %19 = vector.broadcast %cst_4 : f32 to vector<1x4096xf32>
    %20 = arith.subf %11, %19 : vector<1x4096xf32>
    %21 = arith.select %18, %20, %11 : vector<1x4096xi1>, vector<1x4096xf32>
    %cst_5 = arith.constant 0.000000e+00 : f32
    %22 = vector.broadcast %cst_5 : f32 to vector<1x4096xf32>
    %23 = arith.cmpf olt, %21, %22 : vector<1x4096xf32>
    %cst_6 = arith.constant 1.000000e+00 : f32
    %24 = vector.broadcast %cst_6 : f32 to vector<1x4096xf32>
    %25 = arith.subf %16, %24 : vector<1x4096xf32>
    %26 = arith.select %23, %25, %16 : vector<1x4096xi1>, vector<1x4096xf32>
    %cst_7 = arith.constant 0.000000e+00 : f32
    %27 = vector.broadcast %cst_7 : f32 to vector<1x4096xf32>
    %28 = arith.cmpf olt, %21, %27 : vector<1x4096xf32>
    %cst_8 = arith.constant 1.600000e+01 : f32
    %29 = vector.broadcast %cst_8 : f32 to vector<1x4096xf32>
    %30 = arith.addf %21, %29 : vector<1x4096xf32>
    %31 = arith.select %28, %30, %21 : vector<1x4096xi1>, vector<1x4096xf32>
    %cst_9 = arith.constant 6.250000e-02 : f32
    %32 = vector.broadcast %cst_9 : f32 to vector<1x4096xf32>
    %33 = arith.mulf %26, %32 : vector<1x4096xf32>
    %34 = math.floor %33 : vector<1x4096xf32>
    %cst_10 = arith.constant 1.600000e+01 : f32
    %35 = vector.broadcast %cst_10 : f32 to vector<1x4096xf32>
    %36 = arith.mulf %34, %35 : vector<1x4096xf32>
    %37 = arith.subf %26, %36 : vector<1x4096xf32>
    %cst_11 = arith.constant 1.600000e+01 : f32
    %38 = vector.broadcast %cst_11 : f32 to vector<1x4096xf32>
    %39 = arith.cmpf oge, %37, %38 : vector<1x4096xf32>
    %cst_12 = arith.constant 1.000000e+00 : f32
    %40 = vector.broadcast %cst_12 : f32 to vector<1x4096xf32>
    %41 = arith.addf %34, %40 : vector<1x4096xf32>
    %42 = arith.select %39, %41, %34 : vector<1x4096xi1>, vector<1x4096xf32>
    %cst_13 = arith.constant 1.600000e+01 : f32
    %43 = vector.broadcast %cst_13 : f32 to vector<1x4096xf32>
    %44 = arith.cmpf oge, %37, %43 : vector<1x4096xf32>
    %cst_14 = arith.constant 1.600000e+01 : f32
    %45 = vector.broadcast %cst_14 : f32 to vector<1x4096xf32>
    %46 = arith.subf %37, %45 : vector<1x4096xf32>
    %47 = arith.select %44, %46, %37 : vector<1x4096xi1>, vector<1x4096xf32>
    %cst_15 = arith.constant 0.000000e+00 : f32
    %48 = vector.broadcast %cst_15 : f32 to vector<1x4096xf32>
    %49 = arith.cmpf olt, %47, %48 : vector<1x4096xf32>
    %cst_16 = arith.constant 1.000000e+00 : f32
    %50 = vector.broadcast %cst_16 : f32 to vector<1x4096xf32>
    %51 = arith.subf %42, %50 : vector<1x4096xf32>
    %52 = arith.select %49, %51, %42 : vector<1x4096xi1>, vector<1x4096xf32>
    %cst_17 = arith.constant 0.000000e+00 : f32
    %53 = vector.broadcast %cst_17 : f32 to vector<1x4096xf32>
    %54 = arith.cmpf olt, %47, %53 : vector<1x4096xf32>
    %cst_18 = arith.constant 1.600000e+01 : f32
    %55 = vector.broadcast %cst_18 : f32 to vector<1x4096xf32>
    %56 = arith.addf %47, %55 : vector<1x4096xf32>
    %57 = arith.select %54, %56, %47 : vector<1x4096xi1>, vector<1x4096xf32>
    %cst_19 = arith.constant 0.0666666701 : f32
    %58 = vector.broadcast %cst_19 : f32 to vector<1x4096xf32>
    %59 = arith.mulf %52, %58 : vector<1x4096xf32>
    %cst_20 = arith.constant 0.0666666701 : f32
    %60 = vector.broadcast %cst_20 : f32 to vector<1x4096xf32>
    %61 = arith.mulf %57, %60 : vector<1x4096xf32>
    %cst_21 = arith.constant 0.0666666701 : f32
    %62 = vector.broadcast %cst_21 : f32 to vector<1x4096xf32>
    %63 = arith.mulf %31, %62 : vector<1x4096xf32>
    %c0 = arith.constant 0 : index
    %c0_22 = arith.constant 0 : index
    %64 = vector.load %arg4[%c0, %c0_22] : memref<4x3xf32, #tpu.memory_space<vmem>>, vector<4x3xf32>
    %65 = vector.extract_strided_slice %64 {offsets = [0, 0], sizes = [4, 1], strides = [1, 1]} : vector<4x3xf32> to vector<4x1xf32>
    %66 = vector.broadcast %65 : vector<4x1xf32> to vector<4x4096xf32>
    %67 = vector.broadcast %59 : vector<1x4096xf32> to vector<4x4096xf32>
    %68 = arith.mulf %66, %67 : vector<4x4096xf32>
    %69 = vector.extract_strided_slice %64 {offsets = [0, 1], sizes = [4, 1], strides = [1, 1]} : vector<4x3xf32> to vector<4x1xf32>
    %70 = vector.broadcast %69 : vector<4x1xf32> to vector<4x4096xf32>
    %71 = vector.broadcast %61 : vector<1x4096xf32> to vector<4x4096xf32>
    %72 = arith.mulf %70, %71 : vector<4x4096xf32>
    %73 = arith.addf %68, %72 : vector<4x4096xf32>
    %74 = vector.extract_strided_slice %64 {offsets = [0, 2], sizes = [4, 1], strides = [1, 1]} : vector<4x3xf32> to vector<4x1xf32>
    %75 = vector.broadcast %74 : vector<4x1xf32> to vector<4x4096xf32>
    %76 = vector.broadcast %63 : vector<1x4096xf32> to vector<4x4096xf32>
    %77 = arith.mulf %75, %76 : vector<4x4096xf32>
    %78 = arith.addf %73, %77 : vector<4x4096xf32>
    %c0_23 = arith.constant 0 : index
    %c0_24 = arith.constant 0 : index
    %79 = vector.load %arg3[%c0_23, %c0_24] : memref<4x4xbf16, #tpu.memory_space<vmem>>, vector<4x4xbf16>
    %c0_25 = arith.constant 0 : index
    %c0_26 = arith.constant 0 : index
    %c0_27 = arith.constant 0 : index
    %80 = vector.load %arg2[%c0_25, %c0_26, %c0_27] : memref<1x4x4096xf32, #tpu.memory_space<vmem>>, vector<1x4x4096xf32>
    %81 = vector.shape_cast %80 : vector<1x4x4096xf32> to vector<4x4096xf32>
    %82 = arith.truncf %81 : vector<4x4096xf32> to vector<4x4096xbf16>
    %cst_28 = arith.constant dense<0.000000e+00> : vector<4x4096xf32>
    %83 = tpu.matmul %79, %82, %cst_28 {dimension_numbers = #tpu.dot_dimension_numbers<[1], [0], [0], [1], [0, 0, 1, 1], [], []>} : vector<4x4xbf16>, vector<4x4096xbf16>, vector<4x4096xf32> -> vector<4x4096xf32>
    %84 = arith.addf %83, %78 : vector<4x4096xf32>
    %c0_29 = arith.constant 0 : index
    %c0_30 = arith.constant 0 : index
    %85 = vector.load %arg5[%c0_29, %c0_30] : memref<4x1xf32, #tpu.memory_space<vmem>>, vector<4x1xf32>
    %86 = vector.broadcast %85 : vector<4x1xf32> to vector<4x4096xf32>
    %87 = arith.addf %84, %86 : vector<4x4096xf32>
    %c0_31 = arith.constant 0 : index
    %c0_32 = arith.constant 0 : index
    %c0_33 = arith.constant 0 : index
    %88 = vector.load %arg6[%c0_31, %c0_32, %c0_33] : memref<1x4x4096xf32, #tpu.memory_space<vmem>>, vector<1x4x4096xf32>
    %89 = vector.shape_cast %88 : vector<1x4x4096xf32> to vector<4x4096xf32>
    %90 = vector.shape_cast %87 : vector<4x4096xf32> to vector<1x4x4096xf32>
    tpu.vector_store %arg6[%c0_31, %c0_32, %c0_33], %90 {strides = array<i32>} : memref<1x4x4096xf32, #tpu.memory_space<vmem>>, vector<1x4x4096xf32>,
    return
  }
  func.func @transform_0(%arg0: i32, %arg1: i32) -> (i32, i32, i32) {
    %c0_i32 = arith.constant 0 : i32
    %c0_i32_0 = arith.constant 0 : i32
    return %arg0, %c0_i32, %arg1 : i32, i32, i32
  }
  func.func @transform_1(%arg0: i32, %arg1: i32) -> (i32, i32) {
    %c0_i32 = arith.constant 0 : i32
    %c0_i32_0 = arith.constant 0 : i32
    %c0_i32_1 = arith.constant 0 : i32
    return %c0_i32, %c0_i32_0 : i32, i32
  }
  func.func @transform_2(%arg0: i32, %arg1: i32) -> (i32, i32) {
    %c0_i32 = arith.constant 0 : i32
    %c0_i32_0 = arith.constant 0 : i32
    %c0_i32_1 = arith.constant 0 : i32
    return %c0_i32, %c0_i32_0 : i32, i32
  }
  func.func @transform_3(%arg0: i32, %arg1: i32) -> (i32, i32) {
    %c0_i32 = arith.constant 0 : i32
    %c0_i32_0 = arith.constant 0 : i32
    %c0_i32_1 = arith.constant 0 : i32
    return %c0_i32, %c0_i32_0 : i32, i32
  }
  func.func @transform_4(%arg0: i32, %arg1: i32) -> (i32, i32, i32) {
    %c0_i32 = arith.constant 0 : i32
    %c0_i32_0 = arith.constant 0 : i32
    return %arg0, %c0_i32, %arg1 : i32, i32, i32
  }
}

module attributes {stable_mosaic.version = 11 : i64} {
  func.func @_spectral_kernel(%arg0: i32, %arg1: memref<2x4x128xf32, #tpu.memory_space<vmem>>, %arg2: memref<2x4x128xf32, #tpu.memory_space<vmem>>, %arg3: memref<4x4x128xf32, #tpu.memory_space<vmem>>, %arg4: memref<4x4x128xf32, #tpu.memory_space<vmem>>, %arg5: memref<2x4x128xf32, #tpu.memory_space<vmem>>, %arg6: memref<2x4x128xf32, #tpu.memory_space<vmem>>) attributes {dimension_semantics = [#tpu.dimension_semantics<parallel>], iteration_bounds = array<i64: 2>, scalar_prefetch = 0 : i64, scratch_operands = 0 : i64, tpu.core_type = #tpu.core_type<tc>, window_params = [{transform_indices = @transform_0, window_bounds = array<i64: 2, 4, 128>}, {transform_indices = @transform_1, window_bounds = array<i64: 2, 4, 128>}, {transform_indices = @transform_2, window_bounds = array<i64: 4, 4, 128>}, {transform_indices = @transform_3, window_bounds = array<i64: 4, 4, 128>}, {transform_indices = @transform_4, window_bounds = array<i64: 2, 4, 128>}, {transform_indices = @transform_5, window_bounds = array<i64: 2, 4, 128>}]} {
    %c0 = arith.constant 0 : index
    %c0_0 = arith.constant 0 : index
    %c0_1 = arith.constant 0 : index
    %0 = vector.load %arg1[%c0, %c0_0, %c0_1] : memref<2x4x128xf32, #tpu.memory_space<vmem>>, vector<2x4x128xf32>
    %c0_2 = arith.constant 0 : index
    %c0_3 = arith.constant 0 : index
    %c0_4 = arith.constant 0 : index
    %1 = vector.load %arg2[%c0_2, %c0_3, %c0_4] : memref<2x4x128xf32, #tpu.memory_space<vmem>>, vector<2x4x128xf32>
    %c0_5 = arith.constant 0 : index
    %c0_6 = arith.constant 0 : index
    %c0_7 = arith.constant 0 : index
    %2 = vector.load %arg3[%c0_5, %c0_6, %c0_7] : memref<4x4x128xf32, #tpu.memory_space<vmem>>, vector<4x4x128xf32>
    %c0_8 = arith.constant 0 : index
    %c0_9 = arith.constant 0 : index
    %c0_10 = arith.constant 0 : index
    %3 = vector.load %arg4[%c0_8, %c0_9, %c0_10] : memref<4x4x128xf32, #tpu.memory_space<vmem>>, vector<4x4x128xf32>
    %4 = arith.subf %3, %2 : vector<4x4x128xf32>
    %5 = arith.addf %2, %3 : vector<4x4x128xf32>
    %6 = vector.extract_strided_slice %0 {offsets = [0, 0, 0], sizes = [1, 4, 128], strides = [1, 1, 1]} : vector<2x4x128xf32> to vector<1x4x128xf32>
    %7 = vector.shape_cast %6 : vector<1x4x128xf32> to vector<4x128xf32>
    %8 = vector.extract_strided_slice %1 {offsets = [0, 0, 0], sizes = [1, 4, 128], strides = [1, 1, 1]} : vector<2x4x128xf32> to vector<1x4x128xf32>
    %9 = vector.shape_cast %8 : vector<1x4x128xf32> to vector<4x128xf32>
    %cst = arith.constant 0.000000e+00 : f32
    %10 = vector.broadcast %cst : f32 to vector<4x128xf32>
    %cst_11 = arith.constant 0.000000e+00 : f32
    %11 = vector.broadcast %cst_11 : f32 to vector<4x128xf32>
    %12 = vector.extract_strided_slice %7 {offsets = [0, 0], sizes = [1, 128], strides = [1, 1]} : vector<4x128xf32> to vector<1x128xf32>
    %13 = vector.extract_strided_slice %9 {offsets = [0, 0], sizes = [1, 128], strides = [1, 1]} : vector<4x128xf32> to vector<1x128xf32>
    %14 = arith.addf %12, %13 : vector<1x128xf32>
    %15 = vector.extract_strided_slice %2 {offsets = [0, 0, 0], sizes = [1, 4, 128], strides = [1, 1, 1]} : vector<4x4x128xf32> to vector<1x4x128xf32>
    %16 = vector.shape_cast %15 : vector<1x4x128xf32> to vector<4x128xf32>
    %17 = vector.broadcast %14 : vector<1x128xf32> to vector<4x128xf32>
    %18 = arith.mulf %17, %16 : vector<4x128xf32>
    %19 = vector.extract_strided_slice %5 {offsets = [0, 0, 0], sizes = [1, 4, 128], strides = [1, 1, 1]} : vector<4x4x128xf32> to vector<1x4x128xf32>
    %20 = vector.shape_cast %19 : vector<1x4x128xf32> to vector<4x128xf32>
    %21 = vector.broadcast %13 : vector<1x128xf32> to vector<4x128xf32>
    %22 = arith.mulf %21, %20 : vector<4x128xf32>
    %23 = arith.subf %18, %22 : vector<4x128xf32>
    %24 = arith.addf %10, %23 : vector<4x128xf32>
    %25 = vector.extract_strided_slice %4 {offsets = [0, 0, 0], sizes = [1, 4, 128], strides = [1, 1, 1]} : vector<4x4x128xf32> to vector<1x4x128xf32>
    %26 = vector.shape_cast %25 : vector<1x4x128xf32> to vector<4x128xf32>
    %27 = vector.broadcast %12 : vector<1x128xf32> to vector<4x128xf32>
    %28 = arith.mulf %27, %26 : vector<4x128xf32>
    %29 = arith.addf %18, %28 : vector<4x128xf32>
    %30 = arith.addf %11, %29 : vector<4x128xf32>
    %31 = vector.extract_strided_slice %7 {offsets = [1, 0], sizes = [1, 128], strides = [1, 1]} : vector<4x128xf32> to vector<1x128xf32>
    %32 = vector.extract_strided_slice %9 {offsets = [1, 0], sizes = [1, 128], strides = [1, 1]} : vector<4x128xf32> to vector<1x128xf32>
    %33 = arith.addf %31, %32 : vector<1x128xf32>
    %34 = vector.extract_strided_slice %2 {offsets = [1, 0, 0], sizes = [1, 4, 128], strides = [1, 1, 1]} : vector<4x4x128xf32> to vector<1x4x128xf32>
    %35 = vector.shape_cast %34 : vector<1x4x128xf32> to vector<4x128xf32>
    %36 = vector.broadcast %33 : vector<1x128xf32> to vector<4x128xf32>
    %37 = arith.mulf %36, %35 : vector<4x128xf32>
    %38 = vector.extract_strided_slice %5 {offsets = [1, 0, 0], sizes = [1, 4, 128], strides = [1, 1, 1]} : vector<4x4x128xf32> to vector<1x4x128xf32>
    %39 = vector.shape_cast %38 : vector<1x4x128xf32> to vector<4x128xf32>
    %40 = vector.broadcast %32 : vector<1x128xf32> to vector<4x128xf32>
    %41 = arith.mulf %40, %39 : vector<4x128xf32>
    %42 = arith.subf %37, %41 : vector<4x128xf32>
    %43 = arith.addf %24, %42 : vector<4x128xf32>
    %44 = vector.extract_strided_slice %4 {offsets = [1, 0, 0], sizes = [1, 4, 128], strides = [1, 1, 1]} : vector<4x4x128xf32> to vector<1x4x128xf32>
    %45 = vector.shape_cast %44 : vector<1x4x128xf32> to vector<4x128xf32>
    %46 = vector.broadcast %31 : vector<1x128xf32> to vector<4x128xf32>
    %47 = arith.mulf %46, %45 : vector<4x128xf32>
    %48 = arith.addf %37, %47 : vector<4x128xf32>
    %49 = arith.addf %30, %48 : vector<4x128xf32>
    %50 = vector.extract_strided_slice %7 {offsets = [2, 0], sizes = [1, 128], strides = [1, 1]} : vector<4x128xf32> to vector<1x128xf32>
    %51 = vector.extract_strided_slice %9 {offsets = [2, 0], sizes = [1, 128], strides = [1, 1]} : vector<4x128xf32> to vector<1x128xf32>
    %52 = arith.addf %50, %51 : vector<1x128xf32>
    %53 = vector.extract_strided_slice %2 {offsets = [2, 0, 0], sizes = [1, 4, 128], strides = [1, 1, 1]} : vector<4x4x128xf32> to vector<1x4x128xf32>
    %54 = vector.shape_cast %53 : vector<1x4x128xf32> to vector<4x128xf32>
    %55 = vector.broadcast %52 : vector<1x128xf32> to vector<4x128xf32>
    %56 = arith.mulf %55, %54 : vector<4x128xf32>
    %57 = vector.extract_strided_slice %5 {offsets = [2, 0, 0], sizes = [1, 4, 128], strides = [1, 1, 1]} : vector<4x4x128xf32> to vector<1x4x128xf32>
    %58 = vector.shape_cast %57 : vector<1x4x128xf32> to vector<4x128xf32>
    %59 = vector.broadcast %51 : vector<1x128xf32> to vector<4x128xf32>
    %60 = arith.mulf %59, %58 : vector<4x128xf32>
    %61 = arith.subf %56, %60 : vector<4x128xf32>
    %62 = arith.addf %43, %61 : vector<4x128xf32>
    %63 = vector.extract_strided_slice %4 {offsets = [2, 0, 0], sizes = [1, 4, 128], strides = [1, 1, 1]} : vector<4x4x128xf32> to vector<1x4x128xf32>
    %64 = vector.shape_cast %63 : vector<1x4x128xf32> to vector<4x128xf32>
    %65 = vector.broadcast %50 : vector<1x128xf32> to vector<4x128xf32>
    %66 = arith.mulf %65, %64 : vector<4x128xf32>
    %67 = arith.addf %56, %66 : vector<4x128xf32>
    %68 = arith.addf %49, %67 : vector<4x128xf32>
    %69 = vector.extract_strided_slice %7 {offsets = [3, 0], sizes = [1, 128], strides = [1, 1]} : vector<4x128xf32> to vector<1x128xf32>
    %70 = vector.extract_strided_slice %9 {offsets = [3, 0], sizes = [1, 128], strides = [1, 1]} : vector<4x128xf32> to vector<1x128xf32>
    %71 = arith.addf %69, %70 : vector<1x128xf32>
    %72 = vector.extract_strided_slice %2 {offsets = [3, 0, 0], sizes = [1, 4, 128], strides = [1, 1, 1]} : vector<4x4x128xf32> to vector<1x4x128xf32>
    %73 = vector.shape_cast %72 : vector<1x4x128xf32> to vector<4x128xf32>
    %74 = vector.broadcast %71 : vector<1x128xf32> to vector<4x128xf32>
    %75 = arith.mulf %74, %73 : vector<4x128xf32>
    %76 = vector.extract_strided_slice %5 {offsets = [3, 0, 0], sizes = [1, 4, 128], strides = [1, 1, 1]} : vector<4x4x128xf32> to vector<1x4x128xf32>
    %77 = vector.shape_cast %76 : vector<1x4x128xf32> to vector<4x128xf32>
    %78 = vector.broadcast %70 : vector<1x128xf32> to vector<4x128xf32>
    %79 = arith.mulf %78, %77 : vector<4x128xf32>
    %80 = arith.subf %75, %79 : vector<4x128xf32>
    %81 = arith.addf %62, %80 : vector<4x128xf32>
    %82 = vector.extract_strided_slice %4 {offsets = [3, 0, 0], sizes = [1, 4, 128], strides = [1, 1, 1]} : vector<4x4x128xf32> to vector<1x4x128xf32>
    %83 = vector.shape_cast %82 : vector<1x4x128xf32> to vector<4x128xf32>
    %84 = vector.broadcast %69 : vector<1x128xf32> to vector<4x128xf32>
    %85 = arith.mulf %84, %83 : vector<4x128xf32>
    %86 = arith.addf %75, %85 : vector<4x128xf32>
    %87 = arith.addf %68, %86 : vector<4x128xf32>
    %c0_12 = arith.constant 0 : index
    %c0_13 = arith.constant 0 : index
    %c0_14 = arith.constant 0 : index
    %88 = vector.load %arg5[%c0_12, %c0_13, %c0_14] : memref<2x4x128xf32, #tpu.memory_space<vmem>>, vector<1x4x128xf32>
    %89 = vector.shape_cast %88 : vector<1x4x128xf32> to vector<4x128xf32>
    %90 = vector.shape_cast %81 : vector<4x128xf32> to vector<1x4x128xf32>
    tpu.vector_store %arg5[%c0_12, %c0_13, %c0_14], %90 {strides = array<i32>} : memref<2x4x128xf32, #tpu.memory_space<vmem>>, vector<1x4x128xf32>,
    %c0_15 = arith.constant 0 : index
    %c0_16 = arith.constant 0 : index
    %c0_17 = arith.constant 0 : index
    %91 = vector.load %arg6[%c0_15, %c0_16, %c0_17] : memref<2x4x128xf32, #tpu.memory_space<vmem>>, vector<1x4x128xf32>
    %92 = vector.shape_cast %91 : vector<1x4x128xf32> to vector<4x128xf32>
    %93 = vector.shape_cast %87 : vector<4x128xf32> to vector<1x4x128xf32>
    tpu.vector_store %arg6[%c0_15, %c0_16, %c0_17], %93 {strides = array<i32>} : memref<2x4x128xf32, #tpu.memory_space<vmem>>, vector<1x4x128xf32>,
    %94 = vector.extract_strided_slice %0 {offsets = [1, 0, 0], sizes = [1, 4, 128], strides = [1, 1, 1]} : vector<2x4x128xf32> to vector<1x4x128xf32>
    %95 = vector.shape_cast %94 : vector<1x4x128xf32> to vector<4x128xf32>
    %96 = vector.extract_strided_slice %1 {offsets = [1, 0, 0], sizes = [1, 4, 128], strides = [1, 1, 1]} : vector<2x4x128xf32> to vector<1x4x128xf32>
    %97 = vector.shape_cast %96 : vector<1x4x128xf32> to vector<4x128xf32>
    %cst_18 = arith.constant 0.000000e+00 : f32
    %98 = vector.broadcast %cst_18 : f32 to vector<4x128xf32>
    %cst_19 = arith.constant 0.000000e+00 : f32
    %99 = vector.broadcast %cst_19 : f32 to vector<4x128xf32>
    %100 = vector.extract_strided_slice %95 {offsets = [0, 0], sizes = [1, 128], strides = [1, 1]} : vector<4x128xf32> to vector<1x128xf32>
    %101 = vector.extract_strided_slice %97 {offsets = [0, 0], sizes = [1, 128], strides = [1, 1]} : vector<4x128xf32> to vector<1x128xf32>
    %102 = arith.addf %100, %101 : vector<1x128xf32>
    %103 = vector.extract_strided_slice %2 {offsets = [0, 0, 0], sizes = [1, 4, 128], strides = [1, 1, 1]} : vector<4x4x128xf32> to vector<1x4x128xf32>
    %104 = vector.shape_cast %103 : vector<1x4x128xf32> to vector<4x128xf32>
    %105 = vector.broadcast %102 : vector<1x128xf32> to vector<4x128xf32>
    %106 = arith.mulf %105, %104 : vector<4x128xf32>
    %107 = vector.extract_strided_slice %5 {offsets = [0, 0, 0], sizes = [1, 4, 128], strides = [1, 1, 1]} : vector<4x4x128xf32> to vector<1x4x128xf32>
    %108 = vector.shape_cast %107 : vector<1x4x128xf32> to vector<4x128xf32>
    %109 = vector.broadcast %101 : vector<1x128xf32> to vector<4x128xf32>
    %110 = arith.mulf %109, %108 : vector<4x128xf32>
    %111 = arith.subf %106, %110 : vector<4x128xf32>
    %112 = arith.addf %98, %111 : vector<4x128xf32>
    %113 = vector.extract_strided_slice %4 {offsets = [0, 0, 0], sizes = [1, 4, 128], strides = [1, 1, 1]} : vector<4x4x128xf32> to vector<1x4x128xf32>
    %114 = vector.shape_cast %113 : vector<1x4x128xf32> to vector<4x128xf32>
    %115 = vector.broadcast %100 : vector<1x128xf32> to vector<4x128xf32>
    %116 = arith.mulf %115, %114 : vector<4x128xf32>
    %117 = arith.addf %106, %116 : vector<4x128xf32>
    %118 = arith.addf %99, %117 : vector<4x128xf32>
    %119 = vector.extract_strided_slice %95 {offsets = [1, 0], sizes = [1, 128], strides = [1, 1]} : vector<4x128xf32> to vector<1x128xf32>
    %120 = vector.extract_strided_slice %97 {offsets = [1, 0], sizes = [1, 128], strides = [1, 1]} : vector<4x128xf32> to vector<1x128xf32>
    %121 = arith.addf %119, %120 : vector<1x128xf32>
    %122 = vector.extract_strided_slice %2 {offsets = [1, 0, 0], sizes = [1, 4, 128], strides = [1, 1, 1]} : vector<4x4x128xf32> to vector<1x4x128xf32>
    %123 = vector.shape_cast %122 : vector<1x4x128xf32> to vector<4x128xf32>
    %124 = vector.broadcast %121 : vector<1x128xf32> to vector<4x128xf32>
    %125 = arith.mulf %124, %123 : vector<4x128xf32>
    %126 = vector.extract_strided_slice %5 {offsets = [1, 0, 0], sizes = [1, 4, 128], strides = [1, 1, 1]} : vector<4x4x128xf32> to vector<1x4x128xf32>
    %127 = vector.shape_cast %126 : vector<1x4x128xf32> to vector<4x128xf32>
    %128 = vector.broadcast %120 : vector<1x128xf32> to vector<4x128xf32>
    %129 = arith.mulf %128, %127 : vector<4x128xf32>
    %130 = arith.subf %125, %129 : vector<4x128xf32>
    %131 = arith.addf %112, %130 : vector<4x128xf32>
    %132 = vector.extract_strided_slice %4 {offsets = [1, 0, 0], sizes = [1, 4, 128], strides = [1, 1, 1]} : vector<4x4x128xf32> to vector<1x4x128xf32>
    %133 = vector.shape_cast %132 : vector<1x4x128xf32> to vector<4x128xf32>
    %134 = vector.broadcast %119 : vector<1x128xf32> to vector<4x128xf32>
    %135 = arith.mulf %134, %133 : vector<4x128xf32>
    %136 = arith.addf %125, %135 : vector<4x128xf32>
    %137 = arith.addf %118, %136 : vector<4x128xf32>
    %138 = vector.extract_strided_slice %95 {offsets = [2, 0], sizes = [1, 128], strides = [1, 1]} : vector<4x128xf32> to vector<1x128xf32>
    %139 = vector.extract_strided_slice %97 {offsets = [2, 0], sizes = [1, 128], strides = [1, 1]} : vector<4x128xf32> to vector<1x128xf32>
    %140 = arith.addf %138, %139 : vector<1x128xf32>
    %141 = vector.extract_strided_slice %2 {offsets = [2, 0, 0], sizes = [1, 4, 128], strides = [1, 1, 1]} : vector<4x4x128xf32> to vector<1x4x128xf32>
    %142 = vector.shape_cast %141 : vector<1x4x128xf32> to vector<4x128xf32>
    %143 = vector.broadcast %140 : vector<1x128xf32> to vector<4x128xf32>
    %144 = arith.mulf %143, %142 : vector<4x128xf32>
    %145 = vector.extract_strided_slice %5 {offsets = [2, 0, 0], sizes = [1, 4, 128], strides = [1, 1, 1]} : vector<4x4x128xf32> to vector<1x4x128xf32>
    %146 = vector.shape_cast %145 : vector<1x4x128xf32> to vector<4x128xf32>
    %147 = vector.broadcast %139 : vector<1x128xf32> to vector<4x128xf32>
    %148 = arith.mulf %147, %146 : vector<4x128xf32>
    %149 = arith.subf %144, %148 : vector<4x128xf32>
    %150 = arith.addf %131, %149 : vector<4x128xf32>
    %151 = vector.extract_strided_slice %4 {offsets = [2, 0, 0], sizes = [1, 4, 128], strides = [1, 1, 1]} : vector<4x4x128xf32> to vector<1x4x128xf32>
    %152 = vector.shape_cast %151 : vector<1x4x128xf32> to vector<4x128xf32>
    %153 = vector.broadcast %138 : vector<1x128xf32> to vector<4x128xf32>
    %154 = arith.mulf %153, %152 : vector<4x128xf32>
    %155 = arith.addf %144, %154 : vector<4x128xf32>
    %156 = arith.addf %137, %155 : vector<4x128xf32>
    %157 = vector.extract_strided_slice %95 {offsets = [3, 0], sizes = [1, 128], strides = [1, 1]} : vector<4x128xf32> to vector<1x128xf32>
    %158 = vector.extract_strided_slice %97 {offsets = [3, 0], sizes = [1, 128], strides = [1, 1]} : vector<4x128xf32> to vector<1x128xf32>
    %159 = arith.addf %157, %158 : vector<1x128xf32>
    %160 = vector.extract_strided_slice %2 {offsets = [3, 0, 0], sizes = [1, 4, 128], strides = [1, 1, 1]} : vector<4x4x128xf32> to vector<1x4x128xf32>
    %161 = vector.shape_cast %160 : vector<1x4x128xf32> to vector<4x128xf32>
    %162 = vector.broadcast %159 : vector<1x128xf32> to vector<4x128xf32>
    %163 = arith.mulf %162, %161 : vector<4x128xf32>
    %164 = vector.extract_strided_slice %5 {offsets = [3, 0, 0], sizes = [1, 4, 128], strides = [1, 1, 1]} : vector<4x4x128xf32> to vector<1x4x128xf32>
    %165 = vector.shape_cast %164 : vector<1x4x128xf32> to vector<4x128xf32>
    %166 = vector.broadcast %158 : vector<1x128xf32> to vector<4x128xf32>
    %167 = arith.mulf %166, %165 : vector<4x128xf32>
    %168 = arith.subf %163, %167 : vector<4x128xf32>
    %169 = arith.addf %150, %168 : vector<4x128xf32>
    %170 = vector.extract_strided_slice %4 {offsets = [3, 0, 0], sizes = [1, 4, 128], strides = [1, 1, 1]} : vector<4x4x128xf32> to vector<1x4x128xf32>
    %171 = vector.shape_cast %170 : vector<1x4x128xf32> to vector<4x128xf32>
    %172 = vector.broadcast %157 : vector<1x128xf32> to vector<4x128xf32>
    %173 = arith.mulf %172, %171 : vector<4x128xf32>
    %174 = arith.addf %163, %173 : vector<4x128xf32>
    %175 = arith.addf %156, %174 : vector<4x128xf32>
    %c1 = arith.constant 1 : index
    %c0_20 = arith.constant 0 : index
    %c0_21 = arith.constant 0 : index
    %176 = vector.load %arg5[%c1, %c0_20, %c0_21] : memref<2x4x128xf32, #tpu.memory_space<vmem>>, vector<1x4x128xf32>
    %177 = vector.shape_cast %176 : vector<1x4x128xf32> to vector<4x128xf32>
    %178 = vector.shape_cast %169 : vector<4x128xf32> to vector<1x4x128xf32>
    tpu.vector_store %arg5[%c1, %c0_20, %c0_21], %178 {strides = array<i32>} : memref<2x4x128xf32, #tpu.memory_space<vmem>>, vector<1x4x128xf32>,
    %c1_22 = arith.constant 1 : index
    %c0_23 = arith.constant 0 : index
    %c0_24 = arith.constant 0 : index
    %179 = vector.load %arg6[%c1_22, %c0_23, %c0_24] : memref<2x4x128xf32, #tpu.memory_space<vmem>>, vector<1x4x128xf32>
    %180 = vector.shape_cast %179 : vector<1x4x128xf32> to vector<4x128xf32>
    %181 = vector.shape_cast %175 : vector<4x128xf32> to vector<1x4x128xf32>
    tpu.vector_store %arg6[%c1_22, %c0_23, %c0_24], %181 {strides = array<i32>} : memref<2x4x128xf32, #tpu.memory_space<vmem>>, vector<1x4x128xf32>,
    return
  }
  func.func @transform_0(%arg0: i32) -> (i32, i32, i32) {
    %c0_i32 = arith.constant 0 : i32
    %c0_i32_0 = arith.constant 0 : i32
    %c0_i32_1 = arith.constant 0 : i32
    return %c0_i32, %c0_i32_0, %arg0 : i32, i32, i32
  }
  func.func @transform_1(%arg0: i32) -> (i32, i32, i32) {
    %c0_i32 = arith.constant 0 : i32
    %c0_i32_0 = arith.constant 0 : i32
    %c0_i32_1 = arith.constant 0 : i32
    return %c0_i32, %c0_i32_0, %arg0 : i32, i32, i32
  }
  func.func @transform_2(%arg0: i32) -> (i32, i32, i32) {
    %c0_i32 = arith.constant 0 : i32
    %c0_i32_0 = arith.constant 0 : i32
    %c0_i32_1 = arith.constant 0 : i32
    return %c0_i32, %c0_i32_0, %arg0 : i32, i32, i32
  }
  func.func @transform_3(%arg0: i32) -> (i32, i32, i32) {
    %c0_i32 = arith.constant 0 : i32
    %c0_i32_0 = arith.constant 0 : i32
    %c0_i32_1 = arith.constant 0 : i32
    return %c0_i32, %c0_i32_0, %arg0 : i32, i32, i32
  }
  func.func @transform_4(%arg0: i32) -> (i32, i32, i32) {
    %c0_i32 = arith.constant 0 : i32
    %c0_i32_0 = arith.constant 0 : i32
    %c0_i32_1 = arith.constant 0 : i32
    return %c0_i32, %c0_i32_0, %arg0 : i32, i32, i32
  }
  func.func @transform_5(%arg0: i32) -> (i32, i32, i32) {
    %c0_i32 = arith.constant 0 : i32
    %c0_i32_0 = arith.constant 0 : i32
    %c0_i32_1 = arith.constant 0 : i32
    return %c0_i32, %c0_i32_0, %arg0 : i32, i32, i32
  }
}

module attributes {stable_mosaic.version = 11 : i64} {
  func.func @_fourier_layer_kernel(%arg0: i32, %arg1: i32, %arg2: memref<1x4x4096xf32, #tpu.memory_space<vmem>>, %arg3: memref<1x4x4096xf32, #tpu.memory_space<vmem>>, %arg4: memref<4x4xbf16, #tpu.memory_space<vmem>>, %arg5: memref<4x1xf32, #tpu.memory_space<vmem>>, %arg6: memref<1x4x4096xf32, #tpu.memory_space<vmem>>) attributes {dimension_semantics = [#tpu.dimension_semantics<parallel>, #tpu.dimension_semantics<parallel>], iteration_bounds = array<i64: 2, 1>, scalar_prefetch = 0 : i64, scratch_operands = 0 : i64, tpu.core_type = #tpu.core_type<tc>, window_params = [{transform_indices = @transform_0, window_bounds = array<i64: 1, 4, 4096>}, {transform_indices = @transform_1, window_bounds = array<i64: 1, 4, 4096>}, {pipeline_mode = #tpu.pipeline_mode<synchronous>, transform_indices = @transform_2, window_bounds = array<i64: 4, 4>}, {pipeline_mode = #tpu.pipeline_mode<synchronous>, transform_indices = @transform_3, window_bounds = array<i64: 4, 1>}, {transform_indices = @transform_4, window_bounds = array<i64: 1, 4, 4096>}]} {
    %c0 = arith.constant 0 : index
    %c0_0 = arith.constant 0 : index
    %0 = vector.load %arg4[%c0, %c0_0] : memref<4x4xbf16, #tpu.memory_space<vmem>>, vector<4x4xbf16>
    %c0_1 = arith.constant 0 : index
    %c0_2 = arith.constant 0 : index
    %c0_3 = arith.constant 0 : index
    %1 = vector.load %arg2[%c0_1, %c0_2, %c0_3] : memref<1x4x4096xf32, #tpu.memory_space<vmem>>, vector<1x4x4096xf32>
    %2 = vector.shape_cast %1 : vector<1x4x4096xf32> to vector<4x4096xf32>
    %3 = arith.truncf %2 : vector<4x4096xf32> to vector<4x4096xbf16>
    %cst = arith.constant dense<0.000000e+00> : vector<4x4096xf32>
    %4 = tpu.matmul %0, %3, %cst {dimension_numbers = #tpu.dot_dimension_numbers<[1], [0], [0], [1], [0, 0, 1, 1], [], []>} : vector<4x4xbf16>, vector<4x4096xbf16>, vector<4x4096xf32> -> vector<4x4096xf32>
    %c0_4 = arith.constant 0 : index
    %c0_5 = arith.constant 0 : index
    %5 = vector.load %arg5[%c0_4, %c0_5] : memref<4x1xf32, #tpu.memory_space<vmem>>, vector<4x1xf32>
    %6 = vector.broadcast %5 : vector<4x1xf32> to vector<4x4096xf32>
    %7 = arith.addf %4, %6 : vector<4x4096xf32>
    %c0_6 = arith.constant 0 : index
    %c0_7 = arith.constant 0 : index
    %c0_8 = arith.constant 0 : index
    %8 = vector.load %arg3[%c0_6, %c0_7, %c0_8] : memref<1x4x4096xf32, #tpu.memory_space<vmem>>, vector<1x4x4096xf32>
    %9 = vector.shape_cast %8 : vector<1x4x4096xf32> to vector<4x4096xf32>
    %10 = arith.addf %9, %7 : vector<4x4096xf32>
    %11 = arith.mulf %10, %10 : vector<4x4096xf32>
    %12 = arith.mulf %10, %11 : vector<4x4096xf32>
    %cst_9 = arith.constant 4.471500e-02 : f32
    %13 = vector.broadcast %cst_9 : f32 to vector<4x4096xf32>
    %14 = arith.mulf %13, %12 : vector<4x4096xf32>
    %15 = arith.addf %10, %14 : vector<4x4096xf32>
    %cst_10 = arith.constant 0.797884583 : f32
    %16 = vector.broadcast %cst_10 : f32 to vector<4x4096xf32>
    %17 = arith.mulf %16, %15 : vector<4x4096xf32>
    %18 = math.tanh %17 : vector<4x4096xf32>
    %cst_11 = arith.constant 1.000000e+00 : f32
    %19 = vector.broadcast %cst_11 : f32 to vector<4x4096xf32>
    %20 = arith.addf %19, %18 : vector<4x4096xf32>
    %cst_12 = arith.constant 5.000000e-01 : f32
    %21 = vector.broadcast %cst_12 : f32 to vector<4x4096xf32>
    %22 = arith.mulf %21, %20 : vector<4x4096xf32>
    %23 = arith.mulf %10, %22 : vector<4x4096xf32>
    %c0_13 = arith.constant 0 : index
    %c0_14 = arith.constant 0 : index
    %c0_15 = arith.constant 0 : index
    %24 = vector.load %arg6[%c0_13, %c0_14, %c0_15] : memref<1x4x4096xf32, #tpu.memory_space<vmem>>, vector<1x4x4096xf32>
    %25 = vector.shape_cast %24 : vector<1x4x4096xf32> to vector<4x4096xf32>
    %26 = vector.shape_cast %23 : vector<4x4096xf32> to vector<1x4x4096xf32>
    tpu.vector_store %arg6[%c0_13, %c0_14, %c0_15], %26 {strides = array<i32>} : memref<1x4x4096xf32, #tpu.memory_space<vmem>>, vector<1x4x4096xf32>,
    return
  }
  func.func @transform_0(%arg0: i32, %arg1: i32) -> (i32, i32, i32) {
    %c0_i32 = arith.constant 0 : i32
    %c0_i32_0 = arith.constant 0 : i32
    return %arg0, %c0_i32, %arg1 : i32, i32, i32
  }
  func.func @transform_1(%arg0: i32, %arg1: i32) -> (i32, i32, i32) {
    %c0_i32 = arith.constant 0 : i32
    %c0_i32_0 = arith.constant 0 : i32
    return %arg0, %c0_i32, %arg1 : i32, i32, i32
  }
  func.func @transform_2(%arg0: i32, %arg1: i32) -> (i32, i32) {
    %c0_i32 = arith.constant 0 : i32
    %c0_i32_0 = arith.constant 0 : i32
    %c0_i32_1 = arith.constant 0 : i32
    return %c0_i32, %c0_i32_0 : i32, i32
  }
  func.func @transform_3(%arg0: i32, %arg1: i32) -> (i32, i32) {
    %c0_i32 = arith.constant 0 : i32
    %c0_i32_0 = arith.constant 0 : i32
    %c0_i32_1 = arith.constant 0 : i32
    return %c0_i32, %c0_i32_0 : i32, i32
  }
  func.func @transform_4(%arg0: i32, %arg1: i32) -> (i32, i32, i32) {
    %c0_i32 = arith.constant 0 : i32
    %c0_i32_0 = arith.constant 0 : i32
    return %arg0, %c0_i32, %arg1 : i32, i32, i32
  }
}

module attributes {stable_mosaic.version = 11 : i64} {
  func.func @_q_final_kernel(%arg0: i32, %arg1: i32, %arg2: memref<1x4x4096xf32, #tpu.memory_space<vmem>>, %arg3: memref<8x4xbf16, #tpu.memory_space<vmem>>, %arg4: memref<8x1xf32, #tpu.memory_space<vmem>>, %arg5: memref<3x8xbf16, #tpu.memory_space<vmem>>, %arg6: memref<3x1xf32, #tpu.memory_space<vmem>>, %arg7: memref<1x3x4096xf32, #tpu.memory_space<vmem>>) attributes {dimension_semantics = [#tpu.dimension_semantics<parallel>, #tpu.dimension_semantics<parallel>], iteration_bounds = array<i64: 2, 1>, scalar_prefetch = 0 : i64, scratch_operands = 0 : i64, tpu.core_type = #tpu.core_type<tc>, window_params = [{transform_indices = @transform_0, window_bounds = array<i64: 1, 4, 4096>}, {pipeline_mode = #tpu.pipeline_mode<synchronous>, transform_indices = @transform_1, window_bounds = array<i64: 8, 4>}, {pipeline_mode = #tpu.pipeline_mode<synchronous>, transform_indices = @transform_2, window_bounds = array<i64: 8, 1>}, {pipeline_mode = #tpu.pipeline_mode<synchronous>, transform_indices = @transform_3, window_bounds = array<i64: 3, 8>}, {pipeline_mode = #tpu.pipeline_mode<synchronous>, transform_indices = @transform_4, window_bounds = array<i64: 3, 1>}, {transform_indices = @transform_5, window_bounds = array<i64: 1, 3, 4096>}]} {
    %c0 = arith.constant 0 : index
    %c0_0 = arith.constant 0 : index
    %0 = vector.load %arg3[%c0, %c0_0] : memref<8x4xbf16, #tpu.memory_space<vmem>>, vector<8x4xbf16>
    %c0_1 = arith.constant 0 : index
    %c0_2 = arith.constant 0 : index
    %c0_3 = arith.constant 0 : index
    %1 = vector.load %arg2[%c0_1, %c0_2, %c0_3] : memref<1x4x4096xf32, #tpu.memory_space<vmem>>, vector<1x4x4096xf32>
    %2 = vector.shape_cast %1 : vector<1x4x4096xf32> to vector<4x4096xf32>
    %3 = arith.truncf %2 : vector<4x4096xf32> to vector<4x4096xbf16>
    %cst = arith.constant dense<0.000000e+00> : vector<8x4096xf32>
    %4 = tpu.matmul %0, %3, %cst {dimension_numbers = #tpu.dot_dimension_numbers<[1], [0], [0], [1], [0, 0, 1, 1], [], []>} : vector<8x4xbf16>, vector<4x4096xbf16>, vector<8x4096xf32> -> vector<8x4096xf32>
    %c0_4 = arith.constant 0 : index
    %c0_5 = arith.constant 0 : index
    %5 = vector.load %arg4[%c0_4, %c0_5] : memref<8x1xf32, #tpu.memory_space<vmem>>, vector<8x1xf32>
    %6 = vector.broadcast %5 : vector<8x1xf32> to vector<8x4096xf32>
    %7 = arith.addf %4, %6 : vector<8x4096xf32>
    %8 = arith.mulf %7, %7 : vector<8x4096xf32>
    %9 = arith.mulf %7, %8 : vector<8x4096xf32>
    %cst_6 = arith.constant 4.471500e-02 : f32
    %10 = vector.broadcast %cst_6 : f32 to vector<8x4096xf32>
    %11 = arith.mulf %10, %9 : vector<8x4096xf32>
    %12 = arith.addf %7, %11 : vector<8x4096xf32>
    %cst_7 = arith.constant 0.797884583 : f32
    %13 = vector.broadcast %cst_7 : f32 to vector<8x4096xf32>
    %14 = arith.mulf %13, %12 : vector<8x4096xf32>
    %15 = math.tanh %14 : vector<8x4096xf32>
    %cst_8 = arith.constant 1.000000e+00 : f32
    %16 = vector.broadcast %cst_8 : f32 to vector<8x4096xf32>
    %17 = arith.addf %16, %15 : vector<8x4096xf32>
    %cst_9 = arith.constant 5.000000e-01 : f32
    %18 = vector.broadcast %cst_9 : f32 to vector<8x4096xf32>
    %19 = arith.mulf %18, %17 : vector<8x4096xf32>
    %20 = arith.mulf %7, %19 : vector<8x4096xf32>
    %c0_10 = arith.constant 0 : index
    %c0_11 = arith.constant 0 : index
    %21 = vector.load %arg5[%c0_10, %c0_11] : memref<3x8xbf16, #tpu.memory_space<vmem>>, vector<3x8xbf16>
    %22 = arith.truncf %20 : vector<8x4096xf32> to vector<8x4096xbf16>
    %cst_12 = arith.constant dense<0.000000e+00> : vector<3x4096xf32>
    %23 = tpu.matmul %21, %22, %cst_12 {dimension_numbers = #tpu.dot_dimension_numbers<[1], [0], [0], [1], [0, 0, 1, 1], [], []>} : vector<3x8xbf16>, vector<8x4096xbf16>, vector<3x4096xf32> -> vector<3x4096xf32>
    %c0_13 = arith.constant 0 : index
    %c0_14 = arith.constant 0 : index
    %24 = vector.load %arg6[%c0_13, %c0_14] : memref<3x1xf32, #tpu.memory_space<vmem>>, vector<3x1xf32>
    %25 = vector.broadcast %24 : vector<3x1xf32> to vector<3x4096xf32>
    %26 = arith.addf %23, %25 : vector<3x4096xf32>
    %c0_15 = arith.constant 0 : index
    %c0_16 = arith.constant 0 : index
    %c0_17 = arith.constant 0 : index
    %27 = vector.load %arg7[%c0_15, %c0_16, %c0_17] : memref<1x3x4096xf32, #tpu.memory_space<vmem>>, vector<1x3x4096xf32>
    %28 = vector.shape_cast %27 : vector<1x3x4096xf32> to vector<3x4096xf32>
    %29 = vector.shape_cast %26 : vector<3x4096xf32> to vector<1x3x4096xf32>
    tpu.vector_store %arg7[%c0_15, %c0_16, %c0_17], %29 {strides = array<i32>} : memref<1x3x4096xf32, #tpu.memory_space<vmem>>, vector<1x3x4096xf32>,
    return
  }
  func.func @transform_0(%arg0: i32, %arg1: i32) -> (i32, i32, i32) {
    %c0_i32 = arith.constant 0 : i32
    %c0_i32_0 = arith.constant 0 : i32
    return %arg0, %c0_i32, %arg1 : i32, i32, i32
  }
  func.func @transform_1(%arg0: i32, %arg1: i32) -> (i32, i32) {
    %c0_i32 = arith.constant 0 : i32
    %c0_i32_0 = arith.constant 0 : i32
    %c0_i32_1 = arith.constant 0 : i32
    return %c0_i32, %c0_i32_0 : i32, i32
  }
  func.func @transform_2(%arg0: i32, %arg1: i32) -> (i32, i32) {
    %c0_i32 = arith.constant 0 : i32
    %c0_i32_0 = arith.constant 0 : i32
    %c0_i32_1 = arith.constant 0 : i32
    return %c0_i32, %c0_i32_0 : i32, i32
  }
  func.func @transform_3(%arg0: i32, %arg1: i32) -> (i32, i32) {
    %c0_i32 = arith.constant 0 : i32
    %c0_i32_0 = arith.constant 0 : i32
    %c0_i32_1 = arith.constant 0 : i32
    return %c0_i32, %c0_i32_0 : i32, i32
  }
  func.func @transform_4(%arg0: i32, %arg1: i32) -> (i32, i32) {
    %c0_i32 = arith.constant 0 : i32
    %c0_i32_0 = arith.constant 0 : i32
    %c0_i32_1 = arith.constant 0 : i32
    return %c0_i32, %c0_i32_0 : i32, i32
  }
  func.func @transform_5(%arg0: i32, %arg1: i32) -> (i32, i32, i32) {
    %c0_i32 = arith.constant 0 : i32
    %c0_i32_0 = arith.constant 0 : i32
    return %arg0, %c0_i32, %arg1 : i32, i32, i32
  }
}

</mosaic_0001>

<bundles_post_ra>
// kernel: fno_forward.6
= control target key start
LH: loop header
LB: loop body
LE: loop exit
PB: predicated region body
PF: predicated region fallthrough
CT: control target
= control target key end

     0   :  { %s2836_s15 = smov 0   ;;  %s2838_s16 = smov 0   ;;  %s3669_s0 = inlined_call_operand.vmem [shape: f32[2,4,4096], index: 0, kind: input, shape index: {}]   ;;  %s3670_s1 = inlined_call_operand.vmem [shape: bf16[4,4], index: 1, kind: input, shape index: {}]   ;;  %s3671_s2 = inlined_call_operand.vmem [shape: f32[4,3], index: 2, kind: input, shape index: {}]   ;;  %s3672_s3 = inlined_call_operand.vmem [shape: f32[4,1], index: 3, kind: input, shape index: {}]   ;;  %s3673_s4 = inlined_call_operand.vmem [shape: f32[2,4,4096], index: 4, kind: output, shape index: {}]  }
   0x1   :  { %s2840_s17 = smov 0  }
   0x2 LB: > { %s26_s18 = sadd.s32 1, %s2802_s16  ;;  %p2567_p0 = scmp.ge.s32.totalorder %s2806_s17, 1  ;;  %s2806_s17 = sphi %s2840_s17, %s14_s17   ;;  %s2802_s16 = sphi %s2838_s16, %s3675_s16   ;;  %s2798_s15 = sphi %s2836_s15, %s3674_s15  }
   0x3   : > { %p28_p1 = scmp.ge.s32.totalorder %s26_s18, 2  ;;  %p183_p2 = scmp.lt.s32.totalorder %s2806_s17, 3 }
   0x5   : > { %s3677_s18 = smov (%p28_p1, %s26_s18), 0  ;;  %p184_p3 = pnand %p2567_p0, %p183_p2 }
   0x6   : > { %p218_p4 = scmp.lt.s32.totalorder (!%p184_p3), %s2798_s15, 1 }
   0x7   : > { %187 = sbr.rel (%p184_p3) target bundleno = 388 (0x184), region = 36 }
   0xc   : > { %v2808_v0 = vmov 0   ;;  %v1330_v1 = vld [vmem:[%s3671_s2] sm:$0xf]  ;;  %s3679_s15 = smov (!%p218_p4, %s2798_s15), 1  ;;  %v2809_v2 = vmov 2   ;;  %vm1605_vm0 = vcmask 1041408   ;;  %v238_v30 = vlaneseq }
   0xd   : > { %1734 = vmatprep.mubr.bf16.mxu0 %v2808_v0  ;;  %1775 = vmatprep.mubr.bf16.mxu1 %v2808_v0  ;;  %s2734_s21 = sshll.u32 %s3679_s15, 7  ;;  %v2810_v11 = vmov 1   ;;  %v2358_v12 = vld [vmem:[%s3672_s3] sm:$0xf]  ;;  %vm1601_vm1 = vcmask 31744  }
   0xe   : > { %2763 = vset.pattern.permute.xlu0 %v2808_v0  ;;  %2765 = vset.pattern.permute.xlu1 %v2809_v2  ;;  %s2868_s24 = scalar_lea.vmem %s3669_s0, %s2734_s21  ;;  %v2887_v27 = vld [vmem:[%s3670_s1] sm:$0x3]  ;;  %v2902_v37 = vand.u32 127, %v238_v30  ;;  %s3391_s5 = scalar_lea.vmem %s3673_s4, %s2734_s21 }
   0xf   : > { %1333 = vperm.xlu0 %2763, %v1330_v1   ;;  %1437 = vperm.xlu1 %2765, %v1330_v1   ;;  %v1505_v3 = vld [vmem:[%s2868_s24] sm:$0xff]  ;;  %v1506_v4 = vld [vmem:[%s2868_s24 + $0x8] sm:$0xff]  ;;  %v1507_v5 = vld [vmem:[%s2868_s24 + $0x10] sm:$0xff] }
  0x10   : > { %v1537_v6 = vcombine.high %v1505_v3, %v1505_v3  ;;  %v1538_v7 = vcombine.high %v1506_v4, %v1506_v4  ;;  %v1569_v8 = vpack.c.bf16 %v1505_v3, %v1505_v3  ;;  %v1571_v9 = vpack.c.bf16 %v1506_v4, %v1506_v4  ;;  %v1508_v10 = vld [vmem:[%s2868_s24 + $0x18] sm:$0xff]  ;;  %v1509_v17 = vld [vmem:[%s2868_s24 + $0x20] sm:$0xff]  ;;  %v1510_v18 = vld [vmem:[%s2868_s24 + $0x28] sm:$0xff] }
  0x11   : > { %v1539_v13 = vcombine.high %v1507_v5, %v1507_v5  ;;  %v1540_v14 = vcombine.high %v1508_v10, %v1508_v10  ;;  %v1573_v15 = vpack.c.bf16 %v1507_v5, %v1507_v5  ;;  %v1575_v16 = vpack.c.bf16 %v1508_v10, %v1508_v10  ;;  %v1511_v33 = vld [vmem:[%s2868_s24 + $0x30] sm:$0xff]  ;;  %v1512_v34 = vld [vmem:[%s2868_s24 + $0x38] sm:$0xff]  ;;  %v1513_v45 = vld [vmem:[%s2868_s24 + $0x40] sm:$0xff] }
  0x12   : > { %v1570_v19 = vpack.c.bf16 %v1537_v6, %v1537_v6  ;;  %v1572_v20 = vpack.c.bf16 %v1538_v7, %v1538_v7  ;;  %v1607_v21 = vsel %vm1605_vm0, %v1569_v8, 0  ;;  %v1613_v22 = vsel %vm1605_vm0, %v1571_v9, 0  ;;  %v1514_v46 = vld [vmem:[%s2868_s24 + $0x48] sm:$0xff]  ;;  %v1515_v60 = vld [vmem:[%s2868_s24 + $0x50] sm:$0xff]  ;;  %v1516_v61 = vld [vmem:[%s2868_s24 + $0x58] sm:$0xff] }
  0x13   : > { %2764 = vset.pattern.permute.xlu0 %v2810_v11  ;;  %2766 = vset.pattern.permute.xlu1 %v2808_v0  ;;  %v1574_v23 = vpack.c.bf16 %v1539_v13, %v1539_v13  ;;  %v1576_v24 = vpack.c.bf16 %v1540_v14, %v1540_v14  ;;  %v1541_v25 = vcombine.high %v1509_v17, %v1509_v17  ;;  %v1619_v28 = vsel %vm1605_vm0, %v1573_v15, 0  ;;  %v1517_v7 = vld [vmem:[%s2868_s24 + $0x60] sm:$0xff]  ;;  %v1518_v9 = vld [vmem:[%s2868_s24 + $0x68] sm:$0xff] }
  0x14   : > { %1369 = vperm.xlu0 %2764, %v1330_v1   ;;  %2361 = vperm.xlu1 %2766, %v2358_v12   ;;  %v1542_v26 = vcombine.high %v1510_v18, %v1510_v18  ;;  %v1625_v29 = vsel %vm1605_vm0, %v1575_v16, 0  ;;  %v1577_v35 = vpack.c.bf16 %v1509_v17, %v1509_v17  ;;  %v1579_v36 = vpack.c.bf16 %v1510_v18, %v1510_v18  ;;  %v1519_v17 = vld [vmem:[%s2868_s24 + $0x70] sm:$0xff] }
  0x15   : > { %2700 = vmatprep.subr.msk.bf16.mxu0 %vm1605_vm0, %v1570_v19  ;;  %2702 = vmatprep.subr.msk.bf16.mxu1 %vm1605_vm0, %v1572_v20  ;;  %v1578_v31 = vpack.c.bf16 %v1541_v25, %v1541_v25  ;;  %v1543_v38 = vcombine.high %v1511_v33, %v1511_v33  ;;  %v1544_v39 = vcombine.high %v1512_v34, %v1512_v34  ;;  %v271_v40 = vcvt.s32.f32 %v2902_v37 }
  0x16   : > { %1717 = vmatpush1.bf16.msra.mxu0 %v1607_v21  ;;  %1758 = vmatpush1.bf16.msra.mxu1 %v1613_v22  ;;  %v1580_v32 = vpack.c.bf16 %v1542_v26, %v1542_v26  ;;  %v1631_v41 = vsel %vm1605_vm0, %v1577_v35, 0  ;;  %v1637_v42 = vsel %vm1605_vm0, %v1579_v36, 0  ;;  %v1581_v48 = vpack.c.bf16 %v1511_v33, %v1511_v33  ;;  %v1520_v21 = vld [vmem:[%s2868_s24 + $0x78] sm:$0xff] }
  0x17   : > { %2704 = vmatprep.subr.msk.bf16.mxu0 %vm1605_vm0, %v1574_v23  ;;  %2706 = vmatprep.subr.msk.bf16.mxu1 %vm1605_vm0, %v1576_v24  ;;  %v1582_v43 = vpack.c.bf16 %v1543_v38, %v1543_v38  ;;  %v1584_v44 = vpack.c.bf16 %v1544_v39, %v1544_v39  ;;  %v338_v47 = vmul.f32 0.0625, %v271_v40  ;;  %v1583_v49 = vpack.c.bf16 %v1512_v34, %v1512_v34 }
  0x18   : > { %2767 = vset.pattern.permute.xlu0 %v2808_v0  ;;  %v1545_v51 = vcombine.high %v1513_v45, %v1513_v45  ;;  %v1546_v52 = vcombine.high %v1514_v46, %v1514_v46  ;;  %v1643_v55 = vsel %vm1605_vm0, %v1581_v48, 0  ;;  %v1585_v63 = vpack.c.bf16 %v1513_v45, %v1513_v45 }
  0x19   : > { %2701 = vmatmul.mubr.msk.bf16.vlgmr.msra.gmra.mxu0 %vm1601_vm1, %v2887_v27  ;;  %2703 = vmatmul.mubr.msk.bf16.vlgmr.msra.gmra.mxu1 %vm1601_vm1, %v2887_v27  ;;  %v370_v50 = vfloor.f32 %v338_v47  ;;  %v1649_v56 = vsel %vm1605_vm0, %v1583_v49, 0  ;;  %v1587_v2 = vpack.c.bf16 %v1514_v46, %v1514_v46  ;;  %v1547_v3 = vcombine.high %v1515_v60, %v1515_v60 }
  0x1a   : > { %1799 = vmatpush1.bf16.msra.mxu0 %v1619_v28  ;;  %1840 = vmatpush1.bf16.msra.mxu1 %v1625_v29  ;;  %v1586_v58 = vpack.c.bf16 %v1545_v51, %v1545_v51  ;;  %v1588_v59 = vpack.c.bf16 %v1546_v52, %v1546_v52  ;;  %v1548_v6 = vcombine.high %v1516_v61, %v1516_v61  ;;  %v1655_v13 = vsel %vm1605_vm0, %v1585_v63, 0 }
  0x1b   : > { %1816 = vmatprep.mubr.bf16.mxu0 %v2808_v0  ;;  %1857 = vmatprep.mubr.bf16.mxu1 %v2808_v0  ;;  %v402_v53 = vmul.f32 16.0, %v370_v50  ;;  %v498_v54 = vadd.f32 1.0, %v370_v50  ;;  %v1589_v8 = vpack.c.bf16 %v1515_v60, %v1515_v60  ;;  %v1591_v11 = vpack.c.bf16 %v1516_v61, %v1516_v61 }
  0x1c   : > { %2708 = vmatprep.subr.msk.bf16.mxu0 %vm1605_vm0, %v1578_v31  ;;  %2710 = vmatprep.subr.msk.bf16.mxu1 %vm1605_vm0, %v1580_v32  ;;  %v1661_v14 = vsel %vm1605_vm0, %v1587_v2, 0  ;;  %v1590_v15 = vpack.c.bf16 %v1547_v3, %v1547_v3  ;;  %v2936_v16 = vcombine.high %v1517_v7, %v1517_v7  ;;  %v1592_v18 = vpack.c.bf16 %v1548_v6, %v1548_v6 }
  0x1d   : > { %v434_v57 = vsub.f32 %v271_v40, %v402_v53  ;;  %v1550_v19 = vcombine.high %v1518_v9, %v1518_v9  ;;  %v1593_v20 = vpack.c.bf16 %v1517_v7, %v1517_v7  ;;  %v1667_v23 = vsel %vm1605_vm0, %v1589_v8, 0 }
  0x1e   : > { %v1673_v24 = vsel %vm1605_vm0, %v1591_v11, 0  ;;  %v1595_v25 = vpack.c.bf16 %v1518_v9, %v1518_v9  ;;  %v2946_v26 = vcombine.high %v1519_v17, %v1519_v17  ;;  %v1594_v29 = vpack.c.bf16 %v2936_v16, %v2936_v16 }
  0x1f   : > { %vm466_vm2 = vcmp.ge.f32.partialorder %v434_v57, 16.0  ;;  %v2572_v62 = vadd.f32 -16.0, %v434_v57  ;;  %v2952_v30 = vcombine.high %v1520_v21, %v1520_v21  ;;  %v241_v32 = vadd.s32 256, %v2902_v37 }
  0x20   : > { %v530_v1 = vsel %vm466_vm2, %v498_v54, %v370_v50  ;;  %v1596_v33 = vpack.c.bf16 %v1550_v19, %v1550_v19  ;;  %v2958_v34 = vsel %vm1605_vm0, %v1593_v20, 0  ;;  %v1597_v38 = vpack.c.bf16 %v1519_v17, %v1519_v17 }
  0x21   : > { %2705 = vmatmul.mubr.msk.bf16.vlgmr.msra.gmra.mxu0 %vm1601_vm1, %v2887_v27  ;;  %2707 = vmatmul.mubr.msk.bf16.vlgmr.msra.gmra.mxu1 %vm1601_vm1, %v2887_v27  ;;  %v594_v4 = vsel %vm466_vm2, %v2572_v62, %v434_v57  ;;  %v2604_v5 = vadd.f32 -1.0, %v530_v1  ;;  %v273_v39 = vcvt.s32.f32 %v241_v32  ;;  %v240_v40 = vadd.s32 128, %v2902_v37 }
  0x22   : > { %1881 = vmatpush1.bf16.msra.mxu0 %v1631_v41  ;;  %1922 = vmatpush1.bf16.msra.mxu1 %v1637_v42  ;;  %vm626_vm3 = vcmp.lt.f32.partialorder %v594_v4, 0.0  ;;  %v722_v35 = vadd.f32 16.0, %v594_v4  ;;  %v242_v41 = vadd.s32 384, %v2902_v37  ;;  %v1685_v42 = vsel %vm1605_vm0, %v1595_v25, 0 }
  0x23   : > { %1898 = vmatprep.mubr.bf16.mxu0 %v2808_v0  ;;  %1939 = vmatprep.mubr.bf16.mxu1 %v2808_v0  ;;  %v690_v10 = vsel %vm626_vm3, %v2604_v5, %v530_v1  ;;  %v340_v46 = vmul.f32 0.0625, %v273_v39  ;;  %v272_v47 = vcvt.s32.f32 %v240_v40  ;;  %v1598_v49 = vpack.c.bf16 %v2946_v26, %v2946_v26 }
  0x24   : > { %2712 = vmatprep.subr.msk.bf16.mxu0 %vm1605_vm0, %v1582_v43  ;;  %2714 = vmatprep.subr.msk.bf16.mxu1 %vm1605_vm0, %v1584_v44  ;;  %v786_v12 = vmul.f32 0.0625, %v690_v10  ;;  %v1599_v43 = vpack.c.bf16 %v1520_v21, %v1520_v21  ;;  %v274_v48 = vcvt.s32.f32 %v242_v41  ;;  %v754_v50 = vsel %vm626_vm3, %v722_v35, %v594_v4 }
  0x25   : > { %v372_v54 = vfloor.f32 %v340_v46  ;;  %v2973_v57 = vsel %vm1605_vm0, %v1597_v38, 0  ;;  %v2981_v61 = vmul.f32 0.06666667, %v754_v50  ;;  %v2987_v3 = vadd.s32 512, %v2902_v37 }
  0x26   : > { %v818_v22 = vfloor.f32 %v786_v12  ;;  %v2990_v4 = vadd.s32 768, %v2902_v37  ;;  %v2993_v7 = vadd.s32 640, %v2902_v37  ;;  %v2996_v8 = vadd.s32 896, %v2902_v37 }
  0x27   : > { %v404_v62 = vmul.f32 16.0, %v372_v54  ;;  %v500_v9 = vadd.f32 1.0, %v372_v54  ;;  %v275_v11 = vcvt.s32.f32 %v2987_v3 }
  0x28   : > { %v850_v28 = vmul.f32 16.0, %v818_v22  ;;  %v946_v31 = vadd.f32 1.0, %v818_v22  ;;  %v277_v12 = vcvt.s32.f32 %v2990_v4 }
  0x29   : > { %2709 = vmatmul.mubr.msk.bf16.vlgmr.msra.gmra.mxu0 %vm1601_vm1, %v2887_v27  ;;  %2711 = vmatmul.mubr.msk.bf16.vlgmr.msra.gmra.mxu1 %vm1601_vm1, %v2887_v27  ;;  %v436_v5 = vsub.f32 %v273_v39, %v404_v62  ;;  %v342_v35 = vmul.f32 0.0625, %v275_v11 }
  0x2a   : > { %1963 = vmatpush1.bf16.msra.mxu0 %v1643_v55  ;;  %2004 = vmatpush1.bf16.msra.mxu1 %v1649_v56  ;;  %v882_v36 = vsub.f32 %v690_v10, %v850_v28  ;;  %v339_v55 = vmul.f32 0.0625, %v272_v47  ;;  %v1600_v56 = vpack.c.bf16 %v2952_v30, %v2952_v30  ;;  %v344_v26 = vmul.f32 0.0625, %v277_v12 }
  0x2b   : > { %1980 = vmatprep.mubr.bf16.mxu0 %v2808_v0  ;;  %2021 = vmatprep.mubr.bf16.mxu1 %v2808_v0  ;;  %vm468_vm6 = vcmp.ge.f32.partialorder %v436_v5, 16.0 }
  0x2c   : > { %2716 = vmatprep.subr.msk.bf16.mxu0 %vm1605_vm0, %v1586_v58  ;;  %2718 = vmatprep.subr.msk.bf16.mxu1 %vm1605_vm0, %v1588_v59  ;;  %vm914_vm4 = vcmp.ge.f32.partialorder %v882_v36, 16.0  ;;  %v2636_v44 = vadd.f32 -16.0, %v882_v36  ;;  %v2976_v58 = vsel %vm1605_vm0, %v1599_v43, 0  ;;  %v341_v59 = vmul.f32 0.0625, %v274_v48 }
  0x2d   : > { %v978_v45 = vsel %vm914_vm4, %v946_v31, %v818_v22  ;;  %v371_v63 = vfloor.f32 %v339_v55  ;;  %v532_v16 = vsel %vm468_vm6, %v500_v9, %v372_v54  ;;  %v3036_v43 = vfloor.f32 %v342_v35 }
  0x2e   : > { %v1042_v51 = vsel %vm914_vm4, %v2636_v44, %v882_v36  ;;  %v2668_v52 = vadd.f32 -1.0, %v978_v45  ;;  %v373_v2 = vfloor.f32 %v341_v59  ;;  %v2606_v21 = vadd.f32 -1.0, %v532_v16 }
  0x2f   : > { %vm1074_vm5 = vcmp.lt.f32.partialorder %v1042_v51, 0.0  ;;  %v1170_v53 = vadd.f32 16.0, %v1042_v51  ;;  %v403_v6 = vmul.f32 16.0, %v371_v63  ;;  %v499_v17 = vadd.f32 1.0, %v371_v63 }
  0x30   : > { %v1138_v60 = vsel %vm1074_vm5, %v2668_v52, %v978_v45  ;;  %v405_v10 = vmul.f32 16.0, %v373_v2  ;;  %v501_v19 = vadd.f32 1.0, %v373_v2  ;;  %v3038_v44 = vfloor.f32 %v344_v26 }
  0x31   : > { %2713 = vmatmul.mubr.msk.bf16.vlgmr.msra.gmra.mxu0 %vm1601_vm1, %v2887_v27  ;;  %2715 = vmatmul.mubr.msk.bf16.vlgmr.msra.gmra.mxu1 %vm1601_vm1, %v2887_v27  ;;  %v1202_v1 = vsel %vm1074_vm5, %v1170_v53, %v1042_v51  ;;  %v3034_v41 = vmul.f32 0.06666667, %v1138_v60  ;;  %v406_v50 = vmul.f32 16.0, %v3036_v43  ;;  %v278_v52 = vcvt.s32.f32 %v2996_v8 }
  0x32   : > { %2045 = vmatpush1.bf16.msra.mxu0 %v1655_v13  ;;  %2086 = vmatpush1.bf16.msra.mxu1 %v1661_v14  ;;  %v2574_v13 = vadd.f32 -16.0, %v436_v5  ;;  %v435_v14 = vsub.f32 %v272_v47, %v403_v6  ;;  %v3040_v45 = vmul.f32 0.06666667, %v1202_v1  ;;  %v408_v51 = vmul.f32 16.0, %v3038_v44 }
  0x33   : > { %2062 = vmatprep.mubr.bf16.mxu0 %v2808_v0  ;;  %2103 = vmatprep.mubr.bf16.mxu1 %v2808_v0  ;;  %v438_v60 = vsub.f32 %v275_v11, %v406_v50  ;;  %v502_v62 = vadd.f32 1.0, %v3036_v43 }
  0x34   : > { %2720 = vmatprep.subr.msk.bf16.mxu0 %vm1605_vm0, %v1590_v15  ;;  %2722 = vmatprep.subr.msk.bf16.mxu1 %vm1605_vm0, %v1592_v18  ;;  %v276_v15 = vcvt.s32.f32 %v2993_v7  ;;  %v437_v18 = vsub.f32 %v274_v48, %v405_v10  ;;  %v3005_v20 = vsel %vm468_vm6, %v2574_v13, %v436_v5  ;;  %vm467_vm7 = vcmp.ge.f32.partialorder %v435_v14, 16.0 }
  0x35   : > { %v2573_v22 = vadd.f32 -16.0, %v435_v14  ;;  %vm628_vm8 = vcmp.lt.f32.partialorder %v3005_v20, 0.0  ;;  %v724_v7 = vadd.f32 16.0, %v3005_v20  ;;  %vm470_vm2 = vcmp.ge.f32.partialorder %v438_v60, 16.0 }
  0x36   : > { %vm469_vm9 = vcmp.ge.f32.partialorder %v437_v18, 16.0  ;;  %v692_v25 = vsel %vm628_vm8, %v2606_v21, %v532_v16  ;;  %v343_v40 = vmul.f32 0.0625, %v276_v15  ;;  %v2576_v21 = vadd.f32 -16.0, %v438_v60 }
  0x37   : > { %v3013_v28 = vsel %vm467_vm7, %v2573_v22, %v435_v14  ;;  %v533_v30 = vsel %vm469_vm9, %v501_v19, %v373_v2  ;;  %v788_v31 = vmul.f32 0.0625, %v692_v25  ;;  %v440_v2 = vsub.f32 %v277_v12, %v408_v51 }
  0x38   : > { %vm627_vm10 = vcmp.lt.f32.partialorder %v3013_v28, 0.0  ;;  %v3042_v48 = vfloor.f32 %v343_v40  ;;  %v756_v22 = vsel %vm628_vm8, %v724_v7, %v3005_v20 }
  0x39   : > { %2717 = vmatmul.mubr.msk.bf16.vlgmr.msra.gmra.mxu0 %vm1601_vm1, %v2887_v27  ;;  %2719 = vmatmul.mubr.msk.bf16.vlgmr.msra.gmra.mxu1 %vm1601_vm1, %v2887_v27  ;;  %v820_v36 = vfloor.f32 %v788_v31  ;;  %v2578_v51 = vadd.f32 -16.0, %v440_v2 }
  0x3a   : > { %2127 = vmatpush1.bf16.msra.mxu0 %v1667_v23  ;;  %2168 = vmatpush1.bf16.msra.mxu1 %v1673_v24  ;;  %v531_v23 = vsel %vm467_vm7, %v499_v17, %v371_v63  ;;  %v2575_v24 = vadd.f32 -16.0, %v437_v18  ;;  %v407_v55 = vmul.f32 16.0, %v3042_v48 }
  0x3b   : > { %2144 = vmatprep.mubr.bf16.mxu0 %v2808_v0  ;;  %2185 = vmatprep.mubr.bf16.mxu1 %v2808_v0  ;;  %v852_v46 = vmul.f32 16.0, %v820_v36 }
  0x3c   : > { %2724 = vmatprep.subr.msk.bf16.mxu0 %vm1605_vm0, %v1594_v29  ;;  %2726 = vmatprep.subr.msk.bf16.mxu1 %vm1605_vm0, %v1596_v33  ;;  %v2605_v29 = vadd.f32 -1.0, %v531_v23  ;;  %v3021_v32 = vsel %vm469_vm9, %v2575_v24, %v437_v18  ;;  %v2607_v33 = vadd.f32 -1.0, %v533_v30  ;;  %v3067_v6 = vsub.f32 %v276_v15, %v407_v55 }
  0x3d   : > { %vm629_vm11 = vcmp.lt.f32.partialorder %v3021_v32, 0.0  ;;  %v884_v53 = vsub.f32 %v692_v25, %v852_v46  ;;  %v725_v25 = vadd.f32 16.0, %v3021_v32 }
  0x3e   : > { %v693_v39 = vsel %vm629_vm11, %v2607_v33, %v533_v30  ;;  %v3087_v33 = vmul.f32 0.06666667, %v756_v22  ;;  %vm471_vm5 = vcmp.ge.f32.partialorder %v3067_v6, 16.0 }
  0x3f   : > { %v2638_v63 = vadd.f32 -16.0, %v884_v53  ;;  %vm916_vm12 = vcmp.ge.f32.partialorder %v884_v53, 16.0 }
  0x41   : > { %2721 = vmatmul.mubr.msk.bf16.vlgmr.msra.gmra.mxu0 %vm1601_vm1, %v2887_v27  ;;  %2723 = vmatmul.mubr.msk.bf16.vlgmr.msra.gmra.mxu1 %vm1601_vm1, %v2887_v27  ;;  %v1044_v9 = vsel %vm916_vm12, %v2638_v63, %v884_v53 }
  0x42   : > { %2209 = vmatpush1.bf16.msra.mxu0 %v2958_v34  ;;  %2250 = vmatpush1.bf16.msra.mxu1 %v1685_v42  ;;  %v691_v34 = vsel %vm627_vm10, %v2605_v29, %v531_v23  ;;  %v789_v42 = vmul.f32 0.0625, %v693_v39  ;;  %v1172_v14 = vadd.f32 16.0, %v1044_v9  ;;  %vm1076_vm15 = vcmp.lt.f32.partialorder %v1044_v9, 0.0 }
  0x43   : > { %2226 = vmatprep.mubr.bf16.mxu0 %v2808_v0  ;;  %2267 = vmatprep.mubr.bf16.mxu1 %v2808_v0  ;;  %v787_v38 = vmul.f32 0.0625, %v691_v34  ;;  %v723_v23 = vadd.f32 16.0, %v3013_v28 }
  0x44   : > { %2728 = vmatprep.subr.msk.bf16.mxu0 %vm1605_vm0, %v1598_v49  ;;  %2730 = vmatprep.subr.msk.bf16.mxu1 %vm1605_vm0, %v1600_v56  ;;  %v821_v49 = vfloor.f32 %v789_v42  ;;  %v3055_v56 = vadd.s32 1024, %v2902_v37  ;;  %v1204_v17 = vsel %vm1076_vm15, %v1172_v14, %v1044_v9  ;;  %v598_v42 = vsel %vm470_vm2, %v2576_v21, %v438_v60 }
  0x45   : > { %v819_v47 = vfloor.f32 %v787_v38  ;;  %vm630_vm4 = vcmp.lt.f32.partialorder %v598_v42, 0.0 }
  0x46   : > { %v853_v59 = vmul.f32 16.0, %v821_v49  ;;  %v949_v16 = vadd.f32 1.0, %v821_v49 }
  0x47   : > { %v851_v54 = vmul.f32 16.0, %v819_v47  ;;  %v947_v10 = vadd.f32 1.0, %v819_v47 }
  0x48   : > { %v885_v5 = vsub.f32 %v693_v39, %v853_v59  ;;  %v534_v39 = vsel %vm470_vm2, %v502_v62, %v3036_v43 }
  0x49   : > { %2725 = vmatmul.mubr.msk.bf16.vlgmr.msra.gmra.mxu0 %vm1601_vm1, %v2887_v27  ;;  %2727 = vmatmul.mubr.msk.bf16.vlgmr.msra.gmra.mxu1 %vm1601_vm1, %v2887_v27  ;;  %v883_v1 = vsub.f32 %v691_v34, %v851_v54  ;;  %v755_v34 = vsel %vm627_vm10, %v723_v23, %v3013_v28  ;;  %v2608_v46 = vadd.f32 -1.0, %v534_v39  ;;  %v726_v54 = vadd.f32 16.0, %v598_v42 }
  0x4a   : > { %2291 = vmatpush1.bf16.msra.mxu0 %v2973_v57  ;;  %2332 = vmatpush1.bf16.msra.mxu1 %v2976_v58  ;;  %v504_v57 = vadd.f32 1.0, %v3038_v44  ;;  %v948_v58 = vadd.f32 1.0, %v820_v36  ;;  %vm917_vm14 = vcmp.ge.f32.partialorder %v885_v5, 16.0  ;;  %v2639_v20 = vadd.f32 -16.0, %v885_v5 }
  0x4b   : > { %2308 = vmatprep.mubr.bf16.mxu0 %v2808_v0  ;;  %2349 = vmatprep.mubr.bf16.mxu1 %v2808_v0  ;;  %v3070_v0 = vadd.f32 1.0, %v3042_v48  ;;  %v2637_v11 = vadd.f32 -16.0, %v883_v1  ;;  %vm915_vm13 = vcmp.ge.f32.partialorder %v883_v1, 16.0  ;;  %v981_v31 = vsel %vm917_vm14, %v949_v16, %v821_v49 }
  0x4c   : > { %v980_v3 = vsel %vm916_vm12, %v948_v58, %v820_v36  ;;  %v979_v4 = vsel %vm915_vm13, %v947_v10, %v819_v47  ;;  %v757_v36 = vsel %vm629_vm11, %v725_v25, %v3021_v32  ;;  %v2671_v38 = vadd.f32 -1.0, %v981_v31 }
  0x4d   : > { %v2670_v13 = vadd.f32 -1.0, %v980_v3  ;;  %v1043_v12 = vsel %vm915_vm13, %v2637_v11, %v883_v1  ;;  %v2669_v18 = vadd.f32 -1.0, %v979_v4  ;;  %v1045_v40 = vsel %vm917_vm14, %v2639_v20, %v885_v5 }
  0x4e   : > { %vm1075_vm0 = vcmp.lt.f32.partialorder %v1043_v12, 0.0  ;;  %v1171_v19 = vadd.f32 16.0, %v1043_v12  ;;  %vm1077_vm3 = vcmp.lt.f32.partialorder %v1045_v40, 0.0  ;;  %v1173_v28 = vadd.f32 16.0, %v1045_v40 }
  0x4f   : > { %v1140_v15 = vsel %vm1076_vm15, %v2670_v13, %v980_v3  ;;  %v1139_v24 = vsel %vm1075_vm0, %v2669_v18, %v979_v4  ;;  %v3104_v49 = vmul.f32 0.06666667, %v755_v34  ;;  %v1141_v50 = vsel %vm1077_vm3, %v2671_v38, %v981_v31 }
  0x50   : > { %v3082_v29 = vmul.f32 0.06666667, %v1140_v15  ;;  %v1203_v30 = vsel %vm1075_vm0, %v1171_v19, %v1043_v12  ;;  %v3092_v35 = vmul.f32 0.06666667, %v1139_v24  ;;  %v694_v32 = vsel %vm630_vm4, %v2608_v46, %v534_v39 }
  0x51   : > { %2729 = vmatmul.mubr.msk.bf16.vlgmr.msra.gmra.mxu0 %vm1601_vm1, %v2887_v27  ;;  %2731 = vmatmul.mubr.msk.bf16.vlgmr.msra.gmra.mxu1 %vm1601_vm1, %v2887_v27  ;;  %v3084_v27 = vmul.f32 0.06666667, %v1204_v17  ;;  %v3094_v26 = vmul.f32 0.06666667, %v1203_v30  ;;  %vm472_vm1 = vcmp.ge.f32.partialorder %v440_v2, 16.0  ;;  %v1205_v53 = vsel %vm1077_vm3, %v1173_v28, %v1045_v40 }
  0x52   : > { %v536_v47 = vsel %vm472_vm1, %v504_v57, %v3038_v44  ;;  %v790_v43 = vmul.f32 0.0625, %v694_v32  ;;  %v3107_v59 = vmul.f32 0.06666667, %v1141_v50  ;;  %v3109_v60 = vmul.f32 0.06666667, %v757_v36 }
  0x53   : > { %v2610_v55 = vadd.f32 -1.0, %v536_v47  ;;  %v600_v62 = vsel %vm472_vm1, %v2578_v51, %v440_v2  ;;  %v3112_v58 = vmul.f32 0.06666667, %v1205_v53  ;;  %v535_v1 = vsel %vm471_vm5, %v3070_v0, %v3042_v48 }
  0x54   : > { %v822_v44 = vfloor.f32 %v790_v43  ;;  %vm632_vm6 = vcmp.lt.f32.partialorder %v600_v62, 0.0  ;;  %v728_v57 = vadd.f32 16.0, %v600_v62  ;;  %v2577_v5 = vadd.f32 -16.0, %v3067_v6 }
  0x55   : > { %v696_v63 = vsel %vm632_vm6, %v2610_v55, %v536_v47  ;;  %v345_v3 = vmul.f32 0.0625, %v278_v52  ;;  %v758_v9 = vsel %vm630_vm4, %v726_v54, %v598_v42  ;;  %v2609_v4 = vadd.f32 -1.0, %v535_v1 }
  0x56   : > { %v854_v10 = vmul.f32 16.0, %v822_v44  ;;  %v760_v2 = vsel %vm632_vm6, %v728_v57, %v600_v62  ;;  %v792_v11 = vmul.f32 0.0625, %v696_v63  ;;  %v950_v13 = vadd.f32 1.0, %v822_v44 }
  0x57   : > { %v599_v14 = vsel %vm471_vm5, %v2577_v5, %v3067_v6  ;;  %v377_v12 = vfloor.f32 %v345_v3  ;;  %v3121_v48 = vmul.f32 0.06666667, %v758_v9  ;;  %v3123_v0 = vmul.f32 0.06666667, %v760_v2 }
  0x58   : > { %v886_v16 = vsub.f32 %v694_v32, %v854_v10  ;;  %v824_v7 = vfloor.f32 %v792_v11  ;;  %vm631_vm7 = vcmp.lt.f32.partialorder %v599_v14, 0.0  ;;  %v727_v15 = vadd.f32 16.0, %v599_v14 }
  0x59   : > { %v695_v17 = vsel %vm631_vm7, %v2609_v4, %v535_v1  ;;  %v409_v18 = vmul.f32 16.0, %v377_v12  ;;  %v505_v22 = vadd.f32 1.0, %v377_v12  ;;  %v279_v42 = vcvt.s32.f32 %v3055_v56 }
  0x5a   : > { %vm918_vm8 = vcmp.ge.f32.partialorder %v886_v16, 16.0  ;;  %v2640_v19 = vadd.f32 -16.0, %v886_v16  ;;  %v856_v21 = vmul.f32 16.0, %v824_v7  ;;  %v952_v24 = vadd.f32 1.0, %v824_v7 }
  0x5b   : > { %v982_v23 = vsel %vm918_vm8, %v950_v13, %v822_v44  ;;  %v791_v6 = vmul.f32 0.0625, %v695_v17  ;;  %v441_v25 = vsub.f32 %v278_v52, %v409_v18  ;;  %v759_v20 = vsel %vm631_vm7, %v727_v15, %v599_v14 }
  0x5c   : > { %v1046_v30 = vsel %vm918_vm8, %v2640_v19, %v886_v16  ;;  %v2672_v31 = vadd.f32 -1.0, %v982_v23  ;;  %v888_v34 = vsub.f32 %v696_v63, %v856_v21  ;;  %v3131_v51 = vmul.f32 0.06666667, %v759_v20 }
  0x5d   : > { %vm1078_vm9 = vcmp.lt.f32.partialorder %v1046_v30, 0.0  ;;  %v1174_v36 = vadd.f32 16.0, %v1046_v30  ;;  %v823_v38 = vfloor.f32 %v791_v6  ;;  %vm473_vm10 = vcmp.ge.f32.partialorder %v441_v25, 16.0 }
  0x5e   : > { %v1142_v39 = vsel %vm1078_vm9, %v2672_v31, %v982_v23  ;;  %vm920_vm11 = vcmp.ge.f32.partialorder %v888_v34, 16.0  ;;  %v2642_v40 = vadd.f32 -16.0, %v888_v34  ;;  %v537_v8 = vsel %vm473_vm10, %v505_v22, %v377_v12 }
  0x5f   : > { %v1206_v46 = vsel %vm1078_vm9, %v1174_v36, %v1046_v30  ;;  %v984_v28 = vsel %vm920_vm11, %v952_v24, %v824_v7  ;;  %v855_v47 = vmul.f32 16.0, %v823_v38  ;;  %v951_v32 = vadd.f32 1.0, %v823_v38 }
  0x60   : > { %v1048_v52 = vsel %vm920_vm11, %v2642_v40, %v888_v34  ;;  %v2674_v50 = vadd.f32 -1.0, %v984_v28  ;;  %v2579_v43 = vadd.f32 -16.0, %v441_v25  ;;  %v3133_v55 = vmul.f32 0.06666667, %v1142_v39 }
  0x61   : > { %vm1080_vm12 = vcmp.lt.f32.partialorder %v1048_v52, 0.0  ;;  %v1176_v53 = vadd.f32 16.0, %v1048_v52  ;;  %v887_v54 = vsub.f32 %v695_v17, %v855_v47  ;;  %v3135_v62 = vmul.f32 0.06666667, %v1206_v46 }
  0x62   : > { %v2611_v44 = vadd.f32 -1.0, %v537_v8  ;;  %v346_v56 = vmul.f32 0.0625, %v279_v42  ;;  %v1144_v57 = vsel %vm1080_vm12, %v2674_v50, %v984_v28  ;;  %v249_v1 = vadd.s32 1280, %v2902_v37 }
  0x63   : > { %vm919_vm13 = vcmp.ge.f32.partialorder %v887_v54, 16.0  ;;  %v2641_v63 = vadd.f32 -16.0, %v887_v54  ;;  %v1208_v5 = vsel %vm1080_vm12, %v1176_v53, %v1048_v52  ;;  %v601_v9 = vsel %vm473_vm10, %v2579_v43, %v441_v25 }
  0x64   : > { %v983_v3 = vsel %vm919_vm13, %v951_v32, %v823_v38  ;;  %v378_v10 = vfloor.f32 %v346_v56  ;;  %vm633_vm14 = vcmp.lt.f32.partialorder %v601_v9, 0.0  ;;  %v729_v13 = vadd.f32 16.0, %v601_v9 }
  0x65   : > { %v1047_v2 = vsel %vm919_vm13, %v2641_v63, %v887_v54  ;;  %v2673_v11 = vadd.f32 -1.0, %v983_v3  ;;  %v697_v4 = vsel %vm633_vm14, %v2611_v44, %v537_v8  ;;  %v3139_v18 = vmul.f32 0.06666667, %v1144_v57 }
  0x66   : > { %vm1079_vm15 = vcmp.lt.f32.partialorder %v1047_v2, 0.0  ;;  %v1175_v14 = vadd.f32 16.0, %v1047_v2  ;;  %v410_v12 = vmul.f32 16.0, %v378_v10  ;;  %v761_v7 = vsel %vm633_vm14, %v729_v13, %v601_v9 }
  0x67   : > { %v1143_v16 = vsel %vm1079_vm15, %v2673_v11, %v983_v3  ;;  %v793_v15 = vmul.f32 0.0625, %v697_v4  ;;  %v506_v17 = vadd.f32 1.0, %v378_v10  ;;  %v3141_v19 = vmul.f32 0.06666667, %v1208_v5 }
  0x68   : > { %v1207_v21 = vsel %vm1079_vm15, %v1175_v14, %v1047_v2  ;;  %v442_v22 = vsub.f32 %v279_v42, %v410_v12  ;;  %v3143_v23 = vmul.f32 0.06666667, %v1143_v16  ;;  %v281_v6 = vcvt.s32.f32 %v249_v1 }
  0x69   : > { %v825_v24 = vfloor.f32 %v793_v15  ;;  %v248_v25 = vadd.s32 1152, %v2902_v37  ;;  %v3146_v30 = vmul.f32 0.06666667, %v761_v7  ;;  %v3149_v34 = vadd.s32 1408, %v2902_v37 }
  0x6a   : > { %vm474_vm0 = vcmp.ge.f32.partialorder %v442_v22, 16.0  ;;  %v2580_v31 = vadd.f32 -16.0, %v442_v22  ;;  %v348_v39 = vmul.f32 0.0625, %v281_v6  ;;  %v3152_v50 = vmul.f32 0.06666667, %v1207_v21 }
  0x6b   : > { %v857_v20 = vmul.f32 16.0, %v825_v24  ;;  %v953_v36 = vadd.f32 1.0, %v825_v24  ;;  %v538_v38 = vsel %vm474_vm0, %v506_v17, %v378_v10  ;;  %v280_v42 = vcvt.s32.f32 %v248_v25 }
  0x6c   : > { %v602_v40 = vsel %vm474_vm0, %v2580_v31, %v442_v22  ;;  %v2612_v46 = vadd.f32 -1.0, %v538_v38  ;;  %v282_v28 = vcvt.s32.f32 %v3149_v34  ;;  %v380_v52 = vfloor.f32 %v348_v39 }
  0x6d   : > { %v889_v47 = vsub.f32 %v697_v4, %v857_v20  ;;  %vm634_vm2 = vcmp.lt.f32.partialorder %v602_v40, 0.0  ;;  %v730_v8 = vadd.f32 16.0, %v602_v40  ;;  %v347_v53 = vmul.f32 0.0625, %v280_v42 }
  0x6e   : > { %v698_v32 = vsel %vm634_vm2, %v2612_v46, %v538_v38  ;;  %v3155_v54 = vadd.s32 1536, %v2902_v37  ;;  %v349_v56 = vmul.f32 0.0625, %v282_v28  ;;  %v412_v1 = vmul.f32 16.0, %v380_v52 }
  0x6f   : > { %vm921_vm1 = vcmp.ge.f32.partialorder %v889_v47, 16.0  ;;  %v2643_v43 = vadd.f32 -16.0, %v889_v47  ;;  %v794_v44 = vmul.f32 0.0625, %v698_v32  ;;  %v762_v63 = vsel %vm634_vm2, %v730_v8, %v602_v40 }
  0x70   : > { %v985_v57 = vsel %vm921_vm1, %v953_v36, %v825_v24  ;;  %v508_v5 = vadd.f32 1.0, %v380_v52  ;;  %v379_v2 = vfloor.f32 %v347_v53  ;;  %v444_v13 = vsub.f32 %v281_v6, %v412_v1 }
  0x71   : > { %v1049_v3 = vsel %vm921_vm1, %v2643_v43, %v889_v47  ;;  %v2675_v9 = vadd.f32 -1.0, %v985_v57  ;;  %v826_v10 = vfloor.f32 %v794_v44  ;;  %v283_v14 = vcvt.s32.f32 %v3155_v54 }
  0x72   : > { %vm1081_vm3 = vcmp.lt.f32.partialorder %v1049_v3, 0.0  ;;  %v1177_v11 = vadd.f32 16.0, %v1049_v3  ;;  %v3160_v16 = vmul.f32 0.06666667, %v762_v63  ;;  %v411_v7 = vmul.f32 16.0, %v379_v2 }
  0x73   : > { %v1145_v4 = vsel %vm1081_vm3, %v2675_v9, %v985_v57  ;;  %v858_v12 = vmul.f32 16.0, %v826_v10  ;;  %v954_v15 = vadd.f32 1.0, %v826_v10  ;;  %vm476_vm4 = vcmp.ge.f32.partialorder %v444_v13, 16.0 }
  0x74   : > { %v2582_v17 = vadd.f32 -16.0, %v444_v13  ;;  %v3162_v21 = vfloor.f32 %v349_v56  ;;  %v1209_v22 = vsel %vm1081_vm3, %v1177_v11, %v1049_v3  ;;  %v540_v25 = vsel %vm476_vm4, %v508_v5, %v380_v52 }
  0x75   : > { %v890_v24 = vsub.f32 %v698_v32, %v858_v12  ;;  %v443_v31 = vsub.f32 %v280_v42, %v411_v7  ;;  %v1241_v20 = vmul.f32 0.06666667, %v1145_v4  ;;  %v2614_v38 = vadd.f32 -1.0, %v540_v25 }
  0x76   : > { %v604_v36 = vsel %vm476_vm4, %v2582_v17, %v444_v13  ;;  %v507_v6 = vadd.f32 1.0, %v379_v2  ;;  %v413_v56 = vmul.f32 16.0, %v3162_v21  ;;  %v1273_v3 = vmul.f32 0.06666667, %v1209_v22 }
  0x77   : > { %vm922_vm5 = vcmp.ge.f32.partialorder %v890_v24, 16.0  ;;  %v2644_v39 = vadd.f32 -16.0, %v890_v24  ;;  %vm636_vm6 = vcmp.lt.f32.partialorder %v604_v36, 0.0  ;;  %v732_v40 = vadd.f32 16.0, %v604_v36 }
  0x78   : > { %v986_v46 = vsel %vm922_vm5, %v954_v15, %v826_v10  ;;  %v700_v47 = vsel %vm636_vm6, %v2614_v38, %v540_v25  ;;  %vm475_vm7 = vcmp.ge.f32.partialorder %v443_v31, 16.0  ;;  %v2581_v8 = vadd.f32 -16.0, %v443_v31 }
  0x79   : > { %v1050_v53 = vsel %vm922_vm5, %v2644_v39, %v890_v24  ;;  %v2676_v43 = vadd.f32 -1.0, %v986_v46  ;;  %v796_v44 = vmul.f32 0.0625, %v700_v47  ;;  %v764_v42 = vsel %vm636_vm6, %v732_v40, %v604_v36 }
  0x7a   : > { %vm1082_vm8 = vcmp.lt.f32.partialorder %v1050_v53, 0.0  ;;  %v1178_v52 = vadd.f32 16.0, %v1050_v53  ;;  %v539_v32 = vsel %vm475_vm7, %v507_v6, %v379_v2  ;;  %v603_v1 = vsel %vm475_vm7, %v2581_v8, %v443_v31 }
  0x7b   : > { %v1146_v57 = vsel %vm1082_vm8, %v2676_v43, %v986_v46  ;;  %v3165_v63 = vfloor.f32 %v796_v44  ;;  %v2613_v5 = vadd.f32 -1.0, %v539_v32  ;;  %vm635_vm9 = vcmp.lt.f32.partialorder %v603_v1, 0.0 }
  0x7c   : > { %v1210_v9 = vsel %vm1082_vm8, %v1178_v52, %v1050_v53  ;;  %v731_v10 = vadd.f32 16.0, %v603_v1  ;;  %v1242_v11 = vmul.f32 0.06666667, %v1146_v57  ;;  %v3168_v4 = vmul.f32 0.06666667, %v764_v42 }
  0x7d   : > { %v860_v13 = vmul.f32 16.0, %v3165_v63  ;;  %v3170_v12 = vsel %vm635_vm9, %v2613_v5, %v539_v32  ;;  %v1274_v7 = vmul.f32 0.06666667, %v1210_v9  ;;  %v3175_v17 = vsub.f32 %v282_v28, %v413_v56 }
  0x7e   : > { %v763_v15 = vsel %vm635_vm9, %v731_v10, %v603_v1  ;;  %v795_v2 = vmul.f32 0.0625, %v3170_v12  ;;  %v956_v22 = vadd.f32 1.0, %v3165_v63  ;;  %v3181_v31 = vadd.f32 1.0, %v3162_v21 }
  0x7f   : > { %v892_v24 = vsub.f32 %v700_v47, %v860_v13  ;;  %v3178_v25 = vmul.f32 0.06666667, %v763_v15  ;;  %v3190_v39 = vadd.f32 -16.0, %v3175_v17  ;;  %v3194_v34 = vmul.f32 0.0625, %v283_v14 }
  0x80   : > { %v3187_v6 = vfloor.f32 %v795_v2  ;;  %v3197_v28 = vadd.s32 1792, %v2902_v37  ;;  %v3206_v8 = vadd.s32 1664, %v2902_v37  ;;  %vm477_vm10 = vcmp.ge.f32.partialorder %v3175_v17, 16.0 }
  0x81   : > { %vm924_vm11 = vcmp.ge.f32.partialorder %v892_v24, 16.0  ;;  %v2646_v52 = vadd.f32 -16.0, %v892_v24 }
  0x8a   : > { %v3183_v36 = vpop.permute.xlu0 %1333  ;;  %v3185_v38 = vpop.permute.xlu1 %1437 }
  0x8b   : > { %v1336_v40 = vmul.f32 %v3183_v36, %v3034_v41  ;;  %v1440_v46 = vmul.f32 %v3185_v38, %v2981_v61  ;;  %v1338_v47 = vmul.f32 %v3183_v36, %v3082_v29  ;;  %v1442_v53 = vmul.f32 %v3185_v38, %v3087_v33 }
  0x8c   : > { %v1337_v43 = vmul.f32 %v3183_v36, %v3092_v35  ;;  %v1441_v44 = vmul.f32 %v3185_v38, %v3104_v49  ;;  %v1339_v41 = vmul.f32 %v3183_v36, %v3107_v59  ;;  %v1443_v61 = vmul.f32 %v3185_v38, %v3109_v60 }
  0x8d   : > { %v1340_v29 = vmul.f32 %v3183_v36, %v3133_v55  ;;  %v1444_v56 = vmul.f32 %v3185_v38, %v3121_v48  ;;  %v1342_v33 = vmul.f32 %v3183_v36, %v3139_v18  ;;  %v1446_v35 = vmul.f32 %v3185_v38, %v3123_v0 }
  0x8e   : > { %v1341_v49 = vmul.f32 %v3183_v36, %v3143_v23  ;;  %v1445_v59 = vmul.f32 %v3185_v38, %v3131_v51  ;;  %v1343_v60 = vmul.f32 %v3183_v36, %v1241_v20  ;;  %v1447_v48 = vmul.f32 %v3185_v38, %v3146_v30 }
  0x8f   : > { %v3232_v55 = vpop.permute.xlu0 %1369  ;;  %v1344_v18 = vmul.f32 %v3183_v36, %v1242_v11 }
  0x90   : > { %v1372_v0 = vmul.f32 %v3232_v55, %v3040_v45  ;;  %v1374_v23 = vmul.f32 %v3232_v55, %v3084_v27  ;;  %v1373_v51 = vmul.f32 %v3232_v55, %v3094_v26  ;;  %v1375_v20 = vmul.f32 %v3232_v55, %v3112_v58 }
  0x91   : > { %v1376_v42 = vmul.f32 %v3232_v55, %v3135_v62  ;;  %v1378_v30 = vmul.f32 %v3232_v55, %v3141_v19  ;;  %v1377_v32 = vmul.f32 %v3232_v55, %v3152_v50  ;;  %v1379_v45 = vmul.f32 %v3232_v55, %v1273_v3 }
  0x92   : > { %v1404_v57 = vadd.f32 %v1372_v0, %v1336_v40  ;;  %v1406_v1 = vadd.f32 %v1374_v23, %v1338_v47  ;;  %v1405_v27 = vadd.f32 %v1373_v51, %v1337_v43  ;;  %v1407_v5 = vadd.f32 %v1375_v20, %v1339_v41 }
  0x93   : > { %v1408_v9 = vadd.f32 %v1376_v42, %v1340_v29  ;;  %v1410_v26 = vadd.f32 %v1378_v30, %v1342_v33  ;;  %v1409_v10 = vadd.f32 %v1377_v32, %v1341_v49  ;;  %v1411_v11 = vadd.f32 %v1379_v45, %v1343_v60 }
  0x94   : > { %v3252_v58 = vadd.f32 %v1440_v46, %v1404_v57  ;;  %v3254_v13 = vadd.f32 %v1442_v53, %v1406_v1  ;;  %v3256_v62 = vadd.f32 %v1441_v44, %v1405_v27  ;;  %v1448_v19 = vmul.f32 %v3185_v38, %v3160_v16 }
  0x95   : > { %v3260_v50 = vadd.f32 %v1443_v61, %v1407_v5  ;;  %v3262_v3 = vadd.f32 %v1444_v56, %v1408_v9  ;;  %v3264_v15 = vadd.f32 %v1446_v35, %v1410_v26  ;;  %v3266_v2 = vadd.f32 %v1445_v59, %v1409_v10 }
  0x96   : > { %v3268_v40 = vadd.f32 %v1447_v48, %v1411_v11  ;;  %v1380_v46 = vmul.f32 %v3232_v55, %v1274_v7  ;;  %v988_v47 = vsel %vm924_vm11, %v956_v22, %v3165_v63  ;;  %v1052_v53 = vsel %vm924_vm11, %v2646_v52, %v892_v24 }
  0x97   : > { %vm1084_vm12 = vcmp.lt.f32.partialorder %v1052_v53, 0.0  ;;  %v2678_v43 = vadd.f32 -1.0, %v988_v47  ;;  %v1180_v16 = vadd.f32 16.0, %v1052_v53  ;;  %v859_v44 = vmul.f32 16.0, %v3187_v6 }
  0x98   : > { %v1412_v41 = vadd.f32 %v1380_v46, %v1344_v18  ;;  %v1450_v61 = vmul.f32 %v3185_v38, %v3168_v4  ;;  %v955_v29 = vadd.f32 1.0, %v3187_v6  ;;  %v541_v7 = vsel %vm477_vm10, %v3181_v31, %v3162_v21 }
  0x99   : > { %v1148_v56 = vsel %vm1084_vm12, %v2678_v43, %v988_v47  ;;  %v1212_v63 = vsel %vm1084_vm12, %v1180_v16, %v1052_v53  ;;  %v891_v24 = vsub.f32 %v3170_v12, %v859_v44  ;;  %v605_v22 = vsel %vm477_vm10, %v3190_v39, %v3175_v17 }
  0x9a   : > { %v1244_v33 = vmul.f32 0.06666667, %v1148_v56  ;;  %v1276_v35 = vmul.f32 0.06666667, %v1212_v63  ;;  %v3289_v4 = vmul.f32 %v3185_v38, %v3178_v25  ;;  %vm637_vm13 = vcmp.lt.f32.partialorder %v605_v22, 0.0 }
  0x9b   : > { %vm923_vm14 = vcmp.ge.f32.partialorder %v891_v24, 16.0  ;;  %v2645_v49 = vadd.f32 -16.0, %v891_v24  ;;  %v2615_v59 = vadd.f32 -1.0, %v541_v7  ;;  %v733_v21 = vadd.f32 16.0, %v605_v22 }
  0x9c   : > { %v1346_v31 = vmul.f32 %v3183_v36, %v1244_v33  ;;  %v1382_v12 = vmul.f32 %v3232_v55, %v1276_v35  ;;  %v987_v60 = vsel %vm923_vm14, %v955_v29, %v3187_v6  ;;  %v382_v48 = vfloor.f32 %v3194_v34 }
  0x9d   : > { %v1051_v17 = vsel %vm923_vm14, %v2645_v49, %v891_v24  ;;  %v2677_v39 = vadd.f32 -1.0, %v987_v60  ;;  %v701_v18 = vsel %vm637_vm13, %v2615_v59, %v541_v7  ;;  %v765_v52 = vsel %vm637_vm13, %v733_v21, %v605_v22 }
  0x9e   : > { %v1414_v0 = vadd.f32 %v1382_v12, %v1346_v31  ;;  %vm1083_vm15 = vcmp.lt.f32.partialorder %v1051_v17, 0.0  ;;  %v1179_v25 = vadd.f32 16.0, %v1051_v17  ;;  %v797_v23 = vmul.f32 0.0625, %v701_v18 }
  0x9f   : > { %v3295_v51 = vadd.f32 %v1448_v19, %v1412_v41  ;;  %v1147_v20 = vsel %vm1083_vm15, %v2677_v39, %v987_v60  ;;  %v1309_v42 = vmul.f32 0.06666667, %v765_v52  ;;  %v414_v30 = vmul.f32 16.0, %v382_v48 }
  0xa0   : > { %v1211_v32 = vsel %vm1083_vm15, %v1179_v25, %v1051_v17  ;;  %v1243_v45 = vmul.f32 0.06666667, %v1147_v20  ;;  %v829_v57 = vfloor.f32 %v797_v23  ;;  %v510_v1 = vadd.f32 1.0, %v382_v48 }
  0xa1   : > { %v3297_v6 = vadd.f32 %v1450_v61, %v1414_v0  ;;  %v1275_v34 = vmul.f32 0.06666667, %v1211_v32  ;;  %v446_v27 = vsub.f32 %v283_v14, %v414_v30  ;;  %v285_v5 = vcvt.s32.f32 %v3197_v28 }
  0xa2   : > { %v1345_v9 = vmul.f32 %v3183_v36, %v1243_v45  ;;  %v861_v26 = vmul.f32 16.0, %v829_v57  ;;  %v957_v10 = vadd.f32 1.0, %v829_v57  ;;  %v284_v11 = vcvt.s32.f32 %v3206_v8 }
  0xa3   : > { %v1381_v19 = vmul.f32 %v3232_v55, %v1275_v34  ;;  %vm478_vm0 = vcmp.ge.f32.partialorder %v446_v27, 16.0  ;;  %v2584_v46 = vadd.f32 -16.0, %v446_v27  ;;  %v352_v47 = vmul.f32 0.0625, %v285_v5 }
  0xa4   : > { %v893_v53 = vsub.f32 %v701_v18, %v861_v26  ;;  %v3306_v43 = vmul.f32 %v3185_v38, %v1309_v42  ;;  %v542_v16 = vsel %vm478_vm0, %v510_v1, %v382_v48  ;;  %v351_v54 = vmul.f32 0.0625, %v284_v11 }
  0xa5   : > { %v606_v14 = vsel %vm478_vm0, %v2584_v46, %v446_v27  ;;  %v2616_v44 = vadd.f32 -1.0, %v542_v16  ;;  %v384_v28 = vfloor.f32 %v352_v47  ;;  %v3309_v41 = vadd.s32 1920, %v2902_v37 }
  0xa6   : > { %vm925_vm2 = vcmp.ge.f32.partialorder %v893_v53, 16.0  ;;  %v2647_v61 = vadd.f32 -16.0, %v893_v53  ;;  %vm638_vm1 = vcmp.lt.f32.partialorder %v606_v14, 0.0  ;;  %v734_v8 = vadd.f32 16.0, %v606_v14 }
  0xa7   : > { %v1413_v29 = vadd.f32 %v1381_v19, %v1345_v9  ;;  %v989_v7 = vsel %vm925_vm2, %v957_v10, %v829_v57  ;;  %v702_v56 = vsel %vm638_vm1, %v2616_v44, %v542_v16  ;;  %v416_v63 = vmul.f32 16.0, %v384_v28 }
  0xa8   : > { %v1053_v24 = vsel %vm925_vm2, %v2647_v61, %v893_v53  ;;  %v2679_v22 = vadd.f32 -1.0, %v989_v7  ;;  %v766_v33 = vsel %vm638_vm1, %v734_v8, %v606_v14  ;;  %v798_v35 = vmul.f32 0.0625, %v702_v56 }
  0xa9   : > { %vm1085_vm3 = vcmp.lt.f32.partialorder %v1053_v24, 0.0  ;;  %v1181_v49 = vadd.f32 16.0, %v1053_v24  ;;  %v1310_v59 = vmul.f32 0.06666667, %v766_v33  ;;  %v448_v21 = vsub.f32 %v285_v5, %v416_v63 }
  0xaa   : > { %v1149_v31 = vsel %vm1085_vm3, %v2679_v22, %v989_v7  ;;  %v830_v12 = vfloor.f32 %v798_v35  ;;  %v512_v60 = vadd.f32 1.0, %v384_v28  ;;  %v383_v48 = vfloor.f32 %v351_v54 }
  0xab   : > { %v3312_v17 = vadd.f32 %v3289_v4, %v1413_v29  ;;  %v1213_v39 = vsel %vm1085_vm3, %v1181_v49, %v1053_v24  ;;  %v1245_v18 = vmul.f32 0.06666667, %v1149_v31  ;;  %vm480_vm4 = vcmp.ge.f32.partialorder %v448_v21, 16.0 }
  0xac   : > { %v1277_v52 = vmul.f32 0.06666667, %v1213_v39  ;;  %v862_v0 = vmul.f32 16.0, %v830_v12  ;;  %v3315_v25 = vmul.f32 %v3185_v38, %v1310_v59  ;;  %v544_v23 = vsel %vm480_vm4, %v512_v60, %v384_v28 }
  0xad   : > { %v958_v20 = vadd.f32 1.0, %v830_v12  ;;  %v2586_v42 = vadd.f32 -16.0, %v448_v21  ;;  %v2618_v30 = vadd.f32 -1.0, %v544_v23  ;;  %v415_v32 = vmul.f32 16.0, %v383_v48 }
  0xae   : > { %v1347_v45 = vmul.f32 %v3183_v36, %v1245_v18  ;;  %v1383_v57 = vmul.f32 %v3232_v55, %v1277_v52  ;;  %v894_v1 = vsub.f32 %v702_v56, %v862_v0  ;;  %v511_v4 = vadd.f32 1.0, %v383_v48 }
  0xaf   : > { %v608_v34 = vsel %vm480_vm4, %v2586_v42, %v448_v21  ;;  %v447_v27 = vsub.f32 %v284_v11, %v415_v32  ;;  %v286_v5 = vcvt.s32.f32 %v3309_v41  ;;  %v3321_v9 = vadd.s32 2048, %v2902_v37 }
  0xb0   : > { %vm926_vm5 = vcmp.ge.f32.partialorder %v894_v1, 16.0  ;;  %v2648_v26 = vadd.f32 -16.0, %v894_v1  ;;  %vm640_vm6 = vcmp.lt.f32.partialorder %v608_v34, 0.0  ;;  %v3324_v10 = vadd.s32 2304, %v2902_v37 }
  0xb1   : > { %v990_v19 = vsel %vm926_vm5, %v958_v20, %v830_v12  ;;  %v704_v46 = vsel %vm640_vm6, %v2618_v30, %v544_v23  ;;  %v736_v47 = vadd.f32 16.0, %v608_v34  ;;  %vm479_vm7 = vcmp.ge.f32.partialorder %v447_v27, 16.0 }
  0xb2   : > { %v1415_v53 = vadd.f32 %v1383_v57, %v1347_v45  ;;  %v1054_v16 = vsel %vm926_vm5, %v2648_v26, %v894_v1  ;;  %v2680_v54 = vadd.f32 -1.0, %v990_v19  ;;  %v800_v14 = vmul.f32 0.0625, %v704_v46 }
  0xb3   : > { %vm1086_vm8 = vcmp.lt.f32.partialorder %v1054_v16, 0.0  ;;  %v1182_v11 = vadd.f32 16.0, %v1054_v16  ;;  %v768_v44 = vsel %vm640_vm6, %v736_v47, %v608_v34  ;;  %v543_v28 = vsel %vm479_vm7, %v511_v4, %v383_v48 }
  0xb4   : > { %v1150_v41 = vsel %vm1086_vm8, %v2680_v54, %v990_v19  ;;  %v832_v61 = vfloor.f32 %v800_v14  ;;  %v1312_v8 = vmul.f32 0.06666667, %v768_v44  ;;  %v2585_v29 = vadd.f32 -16.0, %v447_v27 }
  0xb5   : > { %v1214_v7 = vsel %vm1086_vm8, %v1182_v11, %v1054_v16  ;;  %v1246_v56 = vmul.f32 0.06666667, %v1150_v41  ;;  %v2617_v63 = vadd.f32 -1.0, %v543_v28  ;;  %v353_v24 = vmul.f32 0.0625, %v286_v5 }
  0xb6   : > { %v3328_v22 = vadd.f32 %v3306_v43, %v1415_v53  ;;  %v1278_v33 = vmul.f32 0.06666667, %v1214_v7  ;;  %v864_v35 = vmul.f32 16.0, %v832_v61  ;;  %v960_v49 = vadd.f32 1.0, %v832_v61 }
  0xb7   : > { %v1348_v59 = vmul.f32 %v3183_v36, %v1246_v56  ;;  %v607_v21 = vsel %vm479_vm7, %v2585_v29, %v447_v27  ;;  %v385_v31 = vfloor.f32 %v353_v24  ;;  %v287_v12 = vcvt.s32.f32 %v3321_v9 }
  0xb8   : > { %v1384_v60 = vmul.f32 %v3232_v55, %v1278_v33  ;;  %v896_v48 = vsub.f32 %v704_v46, %v864_v35  ;;  %vm639_vm9 = vcmp.lt.f32.partialorder %v607_v21, 0.0  ;;  %v735_v39 = vadd.f32 16.0, %v607_v21 }
  0xb9   : > { %v1454_v18 = vmul.f32 %v3185_v38, %v1312_v8  ;;  %v703_v52 = vsel %vm639_vm9, %v2617_v63, %v543_v28  ;;  %v417_v43 = vmul.f32 16.0, %v385_v31  ;;  %v354_v0 = vmul.f32 0.0625, %v287_v12 }
  0xba   : > { %v1416_v23 = vadd.f32 %v1384_v60, %v1348_v59  ;;  %vm928_vm10 = vcmp.ge.f32.partialorder %v896_v48, 16.0  ;;  %v2650_v20 = vadd.f32 -16.0, %v896_v48  ;;  %v767_v42 = vsel %vm639_vm9, %v735_v39, %v607_v21 }
  0xbb   : > { %v992_v30 = vsel %vm928_vm10, %v960_v49, %v832_v61  ;;  %v799_v32 = vmul.f32 0.0625, %v703_v52  ;;  %v449_v45 = vsub.f32 %v286_v5, %v417_v43  ;;  %v513_v57 = vadd.f32 1.0, %v385_v31 }
  0xbc   : > { %v1056_v1 = vsel %vm928_vm10, %v2650_v20, %v896_v48  ;;  %v2682_v4 = vadd.f32 -1.0, %v992_v30  ;;  %v1311_v34 = vmul.f32 0.06666667, %v767_v42  ;;  %v386_v27 = vfloor.f32 %v354_v0 }
  0xbd   : > { %v3336_v9 = vadd.f32 %v3315_v25, %v1416_v23  ;;  %vm1088_vm11 = vcmp.lt.f32.partialorder %v1056_v1, 0.0  ;;  %v1184_v26 = vadd.f32 16.0, %v1056_v1  ;;  %v831_v19 = vfloor.f32 %v799_v32 }
  0xbe   : > { %v1152_v46 = vsel %vm1088_vm11, %v2682_v4, %v992_v30  ;;  %vm481_vm12 = vcmp.ge.f32.partialorder %v449_v45, 16.0  ;;  %v2587_v47 = vadd.f32 -16.0, %v449_v45  ;;  %v418_v53 = vmul.f32 16.0, %v386_v27 }
  0xbf   : > { %v1216_v16 = vsel %vm1088_vm11, %v1184_v26, %v1056_v1  ;;  %v1248_v54 = vmul.f32 0.06666667, %v1152_v46  ;;  %v863_v14 = vmul.f32 16.0, %v831_v19  ;;  %v959_v11 = vadd.f32 1.0, %v831_v19 }
  0xc0   : > { %v1280_v5 = vmul.f32 0.06666667, %v1216_v16  ;;  %v545_v44 = vsel %vm481_vm12, %v513_v57, %v385_v31  ;;  %v609_v28 = vsel %vm481_vm12, %v2587_v47, %v449_v45  ;;  %v450_v41 = vsub.f32 %v287_v12, %v418_v53 }
  0xc1   : > { %v1350_v61 = vmul.f32 %v3183_v36, %v1248_v54  ;;  %v895_v8 = vsub.f32 %v703_v52, %v863_v14  ;;  %vm641_vm13 = vcmp.lt.f32.partialorder %v609_v28, 0.0  ;;  %v2619_v25 = vadd.f32 -1.0, %v545_v44 }
  0xc2   : > { %v1386_v29 = vmul.f32 %v3232_v55, %v1280_v5  ;;  %v737_v7 = vadd.f32 16.0, %v609_v28  ;;  %vm482_vm14 = vcmp.ge.f32.partialorder %v450_v41, 16.0  ;;  %v514_v56 = vadd.f32 1.0, %v386_v27 }
  0xc3   : > { %vm927_vm15 = vcmp.ge.f32.partialorder %v895_v8, 16.0  ;;  %v2649_v63 = vadd.f32 -16.0, %v895_v8  ;;  %v705_v24 = vsel %vm641_vm13, %v2619_v25, %v545_v44  ;;  %v2588_v33 = vadd.f32 -16.0, %v450_v41 }
  0xc4   : > { %v1418_v35 = vadd.f32 %v1386_v29, %v1350_v61  ;;  %v991_v49 = vsel %vm927_vm15, %v959_v11, %v831_v19  ;;  %v769_v59 = vsel %vm641_vm13, %v737_v7, %v609_v28  ;;  %v801_v21 = vmul.f32 0.0625, %v705_v24 }
  0xc5   : > { %v1055_v31 = vsel %vm927_vm15, %v2649_v63, %v895_v8  ;;  %v2681_v12 = vadd.f32 -1.0, %v991_v49  ;;  %v1453_v60 = vmul.f32 %v3185_v38, %v1311_v34  ;;  %v546_v48 = vsel %vm482_vm14, %v514_v56, %v386_v27 }
  0xc6   : > { %vm1087_vm0 = vcmp.lt.f32.partialorder %v1055_v31, 0.0  ;;  %v1183_v39 = vadd.f32 16.0, %v1055_v31  ;;  %v833_v52 = vfloor.f32 %v801_v21  ;;  %v1313_v43 = vmul.f32 0.06666667, %v769_v59 }
  0xc7   : > { %v3342_v0 = vadd.f32 %v1454_v18, %v1418_v35  ;;  %v1151_v23 = vsel %vm1087_vm0, %v2681_v12, %v991_v49  ;;  %v610_v20 = vsel %vm482_vm14, %v2588_v33, %v450_v41  ;;  %v2620_v42 = vadd.f32 -1.0, %v546_v48 }
  0xc8   : > { %v1215_v30 = vsel %vm1087_vm0, %v1183_v39, %v1055_v31  ;;  %v1247_v32 = vmul.f32 0.06666667, %v1151_v23  ;;  %v865_v45 = vmul.f32 16.0, %v833_v52  ;;  %v961_v57 = vadd.f32 1.0, %v833_v52 }
  0xc9   : > { %v1279_v1 = vmul.f32 0.06666667, %v1215_v30  ;;  %vm642_vm2 = vcmp.lt.f32.partialorder %v610_v20, 0.0  ;;  %v738_v4 = vadd.f32 16.0, %v610_v20  ;;  %v289_v34 = vcvt.s32.f32 %v3324_v10 }
  0xca   : > { %v1349_v27 = vmul.f32 %v3183_v36, %v1247_v32  ;;  %v897_v26 = vsub.f32 %v705_v24, %v865_v45  ;;  %v706_v19 = vsel %vm642_vm2, %v2620_v42, %v546_v48  ;;  %v256_v18 = vadd.s32 2176, %v2902_v37 }
  0xcb   : > { %v1385_v46 = vmul.f32 %v3232_v55, %v1279_v1  ;;  %v770_v47 = vsel %vm642_vm2, %v738_v4, %v610_v20  ;;  %v802_v53 = vmul.f32 0.0625, %v706_v19  ;;  %v356_v16 = vmul.f32 0.0625, %v289_v34 }
  0xcc   : > { %vm929_vm1 = vcmp.ge.f32.partialorder %v897_v26, 16.0  ;;  %v2651_v54 = vadd.f32 -16.0, %v897_v26  ;;  %v1314_v14 = vmul.f32 0.06666667, %v770_v47  ;;  %v288_v11 = vcvt.s32.f32 %v256_v18 }
  0xcd   : > { %v993_v5 = vsel %vm929_vm1, %v961_v57, %v833_v52  ;;  %v1455_v44 = vmul.f32 %v3185_v38, %v1313_v43  ;;  %v834_v28 = vfloor.f32 %v802_v53  ;;  %v388_v10 = vfloor.f32 %v356_v16 }
  0xce   : > { %v1417_v41 = vadd.f32 %v1385_v46, %v1349_v27  ;;  %v1057_v61 = vsel %vm929_vm1, %v2651_v54, %v897_v26  ;;  %v2683_v8 = vadd.f32 -1.0, %v993_v5  ;;  %v355_v25 = vmul.f32 0.0625, %v288_v11 }
  0xcf   : > { %vm1089_vm3 = vcmp.lt.f32.partialorder %v1057_v61, 0.0  ;;  %v1185_v29 = vadd.f32 16.0, %v1057_v61  ;;  %v866_v7 = vmul.f32 16.0, %v834_v28  ;;  %v3351_v56 = vmul.f32 %v3185_v38, %v1314_v14 }
  0xd0   : > { %v1153_v63 = vsel %vm1089_vm3, %v2683_v8, %v993_v5  ;;  %v962_v24 = vadd.f32 1.0, %v834_v28  ;;  %v420_v33 = vmul.f32 16.0, %v388_v10  ;;  %v516_v35 = vadd.f32 1.0, %v388_v10 }
  0xd1   : > { %v1217_v49 = vsel %vm1089_vm3, %v1185_v29, %v1057_v61  ;;  %v1249_v59 = vmul.f32 0.06666667, %v1153_v63  ;;  %v898_v21 = vsub.f32 %v706_v19, %v866_v7  ;;  %v387_v31 = vfloor.f32 %v355_v25 }
  0xd2   : > { %v3353_v12 = vadd.f32 %v1453_v60, %v1417_v41  ;;  %v1281_v48 = vmul.f32 0.06666667, %v1217_v49  ;;  %v452_v39 = vsub.f32 %v289_v34, %v420_v33  ;;  %v3356_v52 = vadd.s32 2432, %v2902_v37 }
  0xd3   : > { %v1351_v43 = vmul.f32 %v3183_v36, %v1249_v59  ;;  %vm930_vm4 = vcmp.ge.f32.partialorder %v898_v21, 16.0  ;;  %v2652_v23 = vadd.f32 -16.0, %v898_v21  ;;  %v419_v20 = vmul.f32 16.0, %v387_v31 }
  0xd4   : > { %v1387_v42 = vmul.f32 %v3232_v55, %v1281_v48  ;;  %v994_v30 = vsel %vm930_vm4, %v962_v24, %v834_v28  ;;  %vm484_vm5 = vcmp.ge.f32.partialorder %v452_v39, 16.0  ;;  %v2590_v32 = vadd.f32 -16.0, %v452_v39  ;;  %v3363_v28 = vpop.permute.xlu1 %2361 }
  0xd5   : > { %v1058_v45 = vsel %vm930_vm4, %v2652_v23, %v898_v21  ;;  %v2684_v57 = vadd.f32 -1.0, %v994_v30  ;;  %v548_v1 = vsel %vm484_vm5, %v516_v35, %v388_v10  ;;  %v451_v60 = vsub.f32 %v288_v11, %v419_v20 }
  0xd6   : > { %v1419_v4 = vadd.f32 %v1387_v42, %v1351_v43  ;;  %vm1090_vm6 = vcmp.lt.f32.partialorder %v1058_v45, 0.0  ;;  %v1186_v34 = vadd.f32 16.0, %v1058_v45  ;;  %v612_v27 = vsel %vm484_vm5, %v2590_v32, %v452_v39 }
  0xd7   : > { %v1154_v26 = vsel %vm1090_vm6, %v2684_v57, %v994_v30  ;;  %vm644_vm7 = vcmp.lt.f32.partialorder %v612_v27, 0.0  ;;  %v2622_v19 = vadd.f32 -1.0, %v548_v1  ;;  %v740_v18 = vadd.f32 16.0, %v612_v27 }
  0xd8   : > { %v1218_v46 = vsel %vm1090_vm6, %v1186_v34, %v1058_v45  ;;  %v1250_v47 = vmul.f32 0.06666667, %v1154_v26  ;;  %vm483_vm8 = vcmp.ge.f32.partialorder %v451_v60, 16.0  ;;  %v3361_v53 = vadd.s32 2560, %v2902_v37 }
  0xd9   : > { %v1282_v16 = vmul.f32 0.06666667, %v1218_v46  ;;  %v708_v54 = vsel %vm644_vm7, %v2622_v19, %v548_v1  ;;  %v772_v14 = vsel %vm644_vm7, %v740_v18, %v612_v27  ;;  %v515_v5 = vadd.f32 1.0, %v387_v31  ;;  %v1736_v8 = vpop.f32.mrf.mxu0  ;;  %v1777_v25 = vpop.f32.mrf.mxu1 }
  0xda   : > { %v1352_v11 = vmul.f32 %v3183_v36, %v1250_v47  ;;  %v804_v10 = vmul.f32 0.0625, %v708_v54  ;;  %v1316_v41 = vmul.f32 0.06666667, %v772_v14  ;;  %v2589_v61 = vadd.f32 -16.0, %v451_v60 }
  0xdb   : > { %v3366_v29 = vadd.f32 %v1455_v44, %v1419_v4  ;;  %v1388_v7 = vmul.f32 %v3232_v55, %v1282_v16  ;;  %v547_v63 = vsel %vm483_vm8, %v515_v5, %v387_v31  ;;  %v290_v24 = vcvt.s32.f32 %v3356_v52  ;;  %v1738_v21 = vpop.f32.mrf.mxu0  ;;  %v1779_v48 = vpop.f32.mrf.mxu1 }
  0xdc   : > { %v1737_v33 = vadd.f32 %v1736_v8, %v3252_v58  ;;  %v1778_v35 = vadd.f32 %v1777_v25, %v3254_v13  ;;  %v836_v49 = vfloor.f32 %v804_v10  ;;  %v291_v59 = vcvt.s32.f32 %v3361_v53 }
  0xdd   : > { %v1420_v39 = vadd.f32 %v1388_v7, %v1352_v11  ;;  %v611_v43 = vsel %vm483_vm8, %v2589_v61, %v451_v60  ;;  %v2621_v44 = vadd.f32 -1.0, %v547_v63  ;;  %v357_v23 = vmul.f32 0.0625, %v290_v24  ;;  %v1740_v30 = vpop.f32.mrf.mxu0  ;;  %v1781_v32 = vpop.f32.mrf.mxu1 }
  0xde   : > { %v1739_v31 = vadd.f32 %v1738_v21, %v3256_v62  ;;  %v1780_v20 = vadd.f32 %v1779_v48, %v3260_v50  ;;  %v2364_v58 = vadd.f32 %v3363_v28, %v1737_v33  ;;  %v3381_v13 = vmul.f32 %v3185_v38, %v1316_v41 }
  0xdf   : > { %v2366_v42 = vadd.f32 %v3363_v28, %v1778_v35  ;;  %v868_v45 = vmul.f32 16.0, %v836_v49  ;;  %v964_v57 = vadd.f32 1.0, %v836_v49  ;;  %vm643_vm9 = vcmp.lt.f32.partialorder %v611_v43, 0.0  ;;  %v1741_v50 = vpop.f32.mrf.mxu0  ;;  %v1782_v34 = vpop.f32.mrf.mxu1 }
  0xe0   : > { %v2365_v1 = vadd.f32 %v3363_v28, %v1739_v31  ;;  %v2367_v60 = vadd.f32 %v3363_v28, %v1780_v20  ;;  %v707_v4 = vsel %vm643_vm9, %v2621_v44, %v547_v63  ;;  %v739_v62 = vadd.f32 16.0, %v611_v43 }
  0xe1   : > { %v3394_v27 = vadd.f32 %v3351_v56, %v1420_v39  ;;  %v900_v26 = vsub.f32 %v708_v54, %v868_v45  ;;  %v803_v19 = vmul.f32 0.0625, %v707_v4  ;;  %v3396_v18 = vfloor.f32 %v357_v23  ;;  %v1818_v5 = vpop.f32.mrf.mxu0  ;;  %v1859_v11 = vpop.f32.mrf.mxu1 }
  0xe2   : > { %v2428_v46 = vcombine.low %v2364_v58, %v2365_v1  ;;  %v2429_v47 = vcombine.low %v2366_v42, %v2367_v60  ;;  %v771_v16 = vsel %vm643_vm9, %v739_v62, %v611_v43  ;;  %v3400_v14 = vmul.f32 0.0625, %v291_v59 }
  0xe3   : > { %vm932_vm10 = vcmp.ge.f32.partialorder %v900_v26, 16.0  ;;  %v2654_v10 = vadd.f32 -16.0, %v900_v26  ;;  %v835_v41 = vfloor.f32 %v803_v19  ;;  %v3403_v61 = vadd.s32 2816, %v2902_v37  ;;  %v1820_v7 = vpop.f32.mrf.mxu0  ;;  %v1861_v63 = vpop.f32.mrf.mxu1 }
  0xe4   : > { %2460 = vst [vmem:[%s3391_s5] sm:$0xff] %v2428_v46  ;;  %2461 = vst [vmem:[%s3391_s5 + $0x8] sm:$0xff] %v2429_v47  ;;  %v1819_v56 = vadd.f32 %v1818_v5, %v3262_v3  ;;  %v1860_v54 = vadd.f32 %v1859_v11, %v3264_v15  ;;  %v996_v8 = vsel %vm932_vm10, %v964_v57, %v836_v49  ;;  %v421_v25 = vmul.f32 16.0, %v3396_v18 }
  0xe5   : > { %v1060_v33 = vsel %vm932_vm10, %v2654_v10, %v900_v26  ;;  %v2686_v35 = vadd.f32 -1.0, %v996_v8  ;;  %v867_v21 = vmul.f32 16.0, %v835_v41  ;;  %v1315_v48 = vmul.f32 0.06666667, %v771_v16  ;;  %v1822_v31 = vpop.f32.mrf.mxu0  ;;  %v1863_v15 = vpop.f32.mrf.mxu1 }
  0xe6   : > { %v2368_v39 = vadd.f32 %v3363_v28, %v1819_v56  ;;  %v1821_v43 = vadd.f32 %v1820_v7, %v3266_v2  ;;  %v1862_v44 = vadd.f32 %v1861_v63, %v3268_v40  ;;  %v963_v23 = vadd.f32 1.0, %v835_v41 }
  0xe7   : > { %v2370_v3 = vadd.f32 %v3363_v28, %v1860_v54  ;;  %vm1092_vm11 = vcmp.lt.f32.partialorder %v1060_v33, 0.0  ;;  %v1188_v49 = vadd.f32 16.0, %v1060_v33  ;;  %v899_v20 = vsub.f32 %v707_v4, %v867_v21  ;;  %v1823_v45 = vpop.f32.mrf.mxu0  ;;  %v1864_v2 = vpop.f32.mrf.mxu1 }
  0xe8   : > { %v2369_v58 = vadd.f32 %v3363_v28, %v1821_v43  ;;  %v2371_v42 = vadd.f32 %v3363_v28, %v1862_v44  ;;  %v1156_v30 = vsel %vm1092_vm11, %v2686_v35, %v996_v8  ;;  %v453_v32 = vsub.f32 %v290_v24, %v421_v25 }
  0xe9   : > { %v1220_v40 = vsel %vm1092_vm11, %v1188_v49, %v1060_v33  ;;  %v1252_v57 = vmul.f32 0.06666667, %v1156_v30  ;;  %vm931_vm12 = vcmp.ge.f32.partialorder %v899_v20, 16.0  ;;  %v2653_v1 = vadd.f32 -16.0, %v899_v20  ;;  %v1900_v34 = vpop.f32.mrf.mxu0  ;;  %v1941_v26 = vpop.f32.mrf.mxu1 }
  0xea   : > { %v2430_v60 = vcombine.low %v2368_v39, %v2369_v58  ;;  %v2431_v62 = vcombine.low %v2370_v3, %v2371_v42  ;;  %v1284_v50 = vmul.f32 0.06666667, %v1220_v40  ;;  %v995_v4 = vsel %vm931_vm12, %v963_v23, %v835_v41 }
  0xeb   : > { %v1354_v19 = vmul.f32 %v3183_v36, %v1252_v57  ;;  %v1059_v46 = vsel %vm931_vm12, %v2653_v1, %v899_v20  ;;  %v2685_v47 = vadd.f32 -1.0, %v995_v4  ;;  %vm485_vm13 = vcmp.ge.f32.partialorder %v453_v32, 16.0  ;;  %v1902_v5 = vpop.f32.mrf.mxu0  ;;  %v1943_v11 = vpop.f32.mrf.mxu1 }
  0xec   : > { %2462 = vst [vmem:[%s3391_s5 + $0x10] sm:$0xff] %v2430_v60  ;;  %2463 = vst [vmem:[%s3391_s5 + $0x18] sm:$0xff] %v2431_v62  ;;  %v1901_v52 = vadd.f32 %v1900_v34, %v3295_v51  ;;  %v1942_v24 = vadd.f32 %v1941_v26, %v3297_v6  ;;  %v1390_v16 = vmul.f32 %v3232_v55, %v1284_v50  ;;  %vm1091_vm14 = vcmp.lt.f32.partialorder %v1059_v46, 0.0 }
  0xed   : > { %v1155_v10 = vsel %vm1091_vm14, %v2685_v47, %v995_v4  ;;  %v1187_v41 = vadd.f32 16.0, %v1059_v46  ;;  %v517_v56 = vadd.f32 1.0, %v3396_v18  ;;  %v2591_v54 = vadd.f32 -16.0, %v453_v32  ;;  %v1904_v63 = vpop.f32.mrf.mxu0  ;;  %v1945_v33 = vpop.f32.mrf.mxu1 }
  0xee   : > { %v2372_v8 = vadd.f32 %v3363_v28, %v1901_v52  ;;  %v1903_v25 = vadd.f32 %v1902_v5, %v3312_v17  ;;  %v1944_v7 = vadd.f32 %v1943_v11, %v3328_v22  ;;  %v1457_v51 = vmul.f32 %v3185_v38, %v1315_v48 }
  0xef   : > { %v2374_v6 = vadd.f32 %v3363_v28, %v1942_v24  ;;  %v1219_v35 = vsel %vm1091_vm14, %v1187_v41, %v1059_v46  ;;  %v1251_v21 = vmul.f32 0.06666667, %v1155_v10  ;;  %v549_v39 = vsel %vm485_vm13, %v517_v56, %v3396_v18  ;;  %v1905_v3 = vpop.f32.mrf.mxu0  ;;  %v1946_v22 = vpop.f32.mrf.mxu1 }
  0xf0   : > { %v2373_v43 = vadd.f32 %v3363_v28, %v1903_v25  ;;  %v2375_v44 = vadd.f32 %v3363_v28, %v1944_v7  ;;  %v1283_v23 = vmul.f32 0.06666667, %v1219_v35  ;;  %v613_v17 = vsel %vm485_vm13, %v2591_v54, %v453_v32 }
  0xf1   : > { %v1422_v48 = vadd.f32 %v1390_v16, %v1354_v19  ;;  %v1353_v31 = vmul.f32 %v3183_v36, %v1251_v21  ;;  %vm645_vm15 = vcmp.lt.f32.partialorder %v613_v17, 0.0  ;;  %v2623_v15 = vadd.f32 -1.0, %v549_v39  ;;  %v1982_v42 = vpop.f32.mrf.mxu0  ;;  %v2023_v30 = vpop.f32.mrf.mxu1 }
  0xf2   : > { %v2432_v49 = vcombine.low %v2372_v8, %v2373_v43  ;;  %v2433_v20 = vcombine.low %v2374_v6, %v2375_v44  ;;  %v1389_v18 = vmul.f32 %v3232_v55, %v1283_v23  ;;  %v741_v58 = vadd.f32 16.0, %v613_v17 }
  0xf3   : > { %v709_v45 = vsel %vm645_vm15, %v2623_v15, %v549_v39  ;;  %v390_v32 = vfloor.f32 %v3400_v14  ;;  %v293_v2 = vcvt.s32.f32 %v3403_v61  ;;  %v3441_v40 = vadd.s32 2688, %v2902_v37  ;;  %v1984_v50 = vpop.f32.mrf.mxu0  ;;  %v2025_v4 = vpop.f32.mrf.mxu1 }
  0xf4   : > { %2464 = vst [vmem:[%s3391_s5 + $0x20] sm:$0xff] %v2432_v49  ;;  %2465 = vst [vmem:[%s3391_s5 + $0x28] sm:$0xff] %v2433_v20  ;;  %v1983_v57 = vadd.f32 %v1982_v42, %v3336_v9  ;;  %v2024_v1 = vadd.f32 %v2023_v30, %v3342_v0  ;;  %v1421_v60 = vadd.f32 %v1389_v18, %v1353_v31  ;;  %v805_v26 = vmul.f32 0.0625, %v709_v45 }
  0xf5   : > { %v773_v62 = vsel %vm645_vm15, %v741_v58, %v613_v17  ;;  %v1490_v34 = vadd.f32 %v3381_v13, %v1422_v48  ;;  %v422_v19 = vmul.f32 16.0, %v390_v32  ;;  %v1985_v47 = vadd.f32 %v1984_v50, %v3353_v12  ;;  %v1986_v0 = vpop.f32.mrf.mxu0  ;;  %v2027_v16 = vpop.f32.mrf.mxu1 }
  0xf6   : > { %v1317_v14 = vmul.f32 0.06666667, %v773_v62  ;;  %v2376_v46 = vadd.f32 %v3363_v28, %v1983_v57  ;;  %v2026_v52 = vadd.f32 %v2025_v4, %v3366_v29  ;;  %v518_v24 = vadd.f32 1.0, %v390_v32 }
  0xf7   : > { %v2378_v9 = vadd.f32 %v3363_v28, %v2024_v1  ;;  %v1489_v5 = vadd.f32 %v1457_v51, %v1421_v60  ;;  %v837_v11 = vfloor.f32 %v805_v26  ;;  %v454_v10 = vsub.f32 %v291_v59, %v422_v19  ;;  %v1987_v29 = vpop.f32.mrf.mxu0  ;;  %v2028_v54 = vpop.f32.mrf.mxu1 }
  0xf8   : > { %v2377_v13 = vadd.f32 %v3363_v28, %v1985_v47  ;;  %v2379_v41 = vadd.f32 %v3363_v28, %v2026_v52  ;;  %v360_v56 = vmul.f32 0.0625, %v293_v2  ;;  %v292_v12 = vcvt.s32.f32 %v3441_v40 }
  0xf9   : > { %v869_v8 = vmul.f32 16.0, %v837_v11  ;;  %v965_v25 = vadd.f32 1.0, %v837_v11  ;;  %vm486_vm0 = vcmp.ge.f32.partialorder %v454_v10, 16.0  ;;  %v2592_v7 = vadd.f32 -16.0, %v454_v10  ;;  %v2064_v63 = vpop.f32.mrf.mxu0  ;;  %v2105_v33 = vpop.f32.mrf.mxu1 }
  0xfa   : > { %v2434_v51 = vcombine.low %v2376_v46, %v2377_v13  ;;  %v2435_v53 = vcombine.low %v2378_v9, %v2379_v41  ;;  %v550_v59 = vsel %vm486_vm0, %v518_v24, %v390_v32  ;;  %v392_v6 = vfloor.f32 %v360_v56 }
  0xfb   : > { %v901_v35 = vsub.f32 %v709_v45, %v869_v8  ;;  %v3461_v21 = vmul.f32 %v3185_v38, %v1317_v14  ;;  %v614_v39 = vsel %vm486_vm0, %v2592_v7, %v454_v10  ;;  %v2624_v43 = vadd.f32 -1.0, %v550_v59  ;;  %v2066_v3 = vpop.f32.mrf.mxu0  ;;  %v3468_v48 = vpop.f32.mrf.mxu1 }
  0xfc   : > { %2466 = vst [vmem:[%s3391_s5 + $0x30] sm:$0xff] %v2434_v51  ;;  %2467 = vst [vmem:[%s3391_s5 + $0x38] sm:$0xff] %v2435_v53  ;;  %v2065_v44 = vadd.f32 %v2064_v63, %v3394_v27  ;;  %vm646_vm2 = vcmp.lt.f32.partialorder %v614_v39, 0.0  ;;  %v742_v23 = vadd.f32 16.0, %v614_v39  ;;  %v359_v17 = vmul.f32 0.0625, %v292_v12 }
  0xfd   : > { %vm933_vm1 = vcmp.ge.f32.partialorder %v901_v35, 16.0  ;;  %v2655_v22 = vadd.f32 -16.0, %v901_v35  ;;  %v710_v31 = vsel %vm646_vm2, %v2624_v43, %v550_v59  ;;  %v424_v15 = vmul.f32 16.0, %v392_v6  ;;  %v2068_v30 = vpop.f32.mrf.mxu0  ;;  %v2109_v45 = vpop.f32.mrf.mxu1 }
  0xfe   : > { %v2380_v49 = vadd.f32 %v3363_v28, %v2065_v44  ;;  %v2106_v20 = vadd.f32 %v2105_v33, %v1490_v34  ;;  %v2067_v18 = vadd.f32 %v2066_v3, %v1489_v5  ;;  %v997_v58 = vsel %vm933_vm1, %v965_v25, %v837_v11 }
  0xff   : > { %v1061_v42 = vsel %vm933_vm1, %v2655_v22, %v901_v35  ;;  %v2687_v27 = vadd.f32 -1.0, %v997_v58  ;;  %v774_v32 = vsel %vm646_vm2, %v742_v23, %v614_v39  ;;  %v806_v57 = vmul.f32 0.0625, %v710_v31  ;;  %v2069_v4 = vpop.f32.mrf.mxu0  ;;  %v2110_v26 = vpop.f32.mrf.mxu1 }
 0x100   : > { %v2381_v1 = vadd.f32 %v3363_v28, %v2067_v18  ;;  %vm1093_vm3 = vcmp.lt.f32.partialorder %v1061_v42, 0.0  ;;  %v1189_v60 = vadd.f32 16.0, %v1061_v42  ;;  %v1318_v62 = vmul.f32 0.06666667, %v774_v32 }
 0x101   : > { %v1157_v50 = vsel %vm1093_vm3, %v2687_v27, %v997_v58  ;;  %v838_v14 = vfloor.f32 %v806_v57  ;;  %v456_v34 = vsub.f32 %v293_v2, %v424_v15  ;;  %v520_v19 = vadd.f32 1.0, %v392_v6  ;;  %v3479_v5 = vpop.f32.mrf.mxu0  ;;  %v3481_v11 = vpop.f32.mrf.mxu1 }
 0x102   : > { %v3477_v46 = vadd.f32 %v3363_v28, %v2106_v20  ;;  %v2436_v47 = vcombine.low %v2380_v49, %v2381_v1  ;;  %v1221_v52 = vsel %vm1093_vm3, %v1189_v60, %v1061_v42  ;;  %v1253_v24 = vmul.f32 0.06666667, %v1157_v50 }
 0x103   : > { %v1285_v9 = vmul.f32 0.06666667, %v1221_v52  ;;  %v870_v0 = vmul.f32 16.0, %v838_v14  ;;  %v966_v16 = vadd.f32 1.0, %v838_v14  ;;  %vm488_vm4 = vcmp.ge.f32.partialorder %v456_v34, 16.0  ;;  %v3489_v8 = vpop.f32.mrf.mxu0  ;;  %v3491_v25 = vpop.f32.mrf.mxu1 }
 0x104   : > { %2468 = vst [vmem:[%s3391_s5 + $0x40] sm:$0xff] %v2436_v47  ;;  %v1355_v10 = vmul.f32 %v3183_v36, %v1253_v24  ;;  %v552_v61 = vsel %vm488_vm4, %v520_v19, %v392_v6  ;;  %v2594_v2 = vadd.f32 -16.0, %v456_v34  ;;  %v391_v13 = vfloor.f32 %v359_v17 }
 0x105   : > { %v1391_v41 = vmul.f32 %v3232_v55, %v1285_v9  ;;  %v902_v56 = vsub.f32 %v710_v31, %v870_v0  ;;  %v3487_v29 = vmul.f32 %v3185_v38, %v1318_v62  ;;  %v2626_v54 = vadd.f32 -1.0, %v552_v61  ;;  %v2150_v33 = vpop.f32.mrf.mxu0  ;;  %v2191_v35 = vpop.f32.mrf.mxu1 }
 0x106   : > { %v616_v7 = vsel %vm488_vm4, %v2594_v2, %v456_v34  ;;  %v423_v51 = vmul.f32 16.0, %v391_v13  ;;  %v519_v53 = vadd.f32 1.0, %v391_v13  ;;  %v3494_v59 = vadd.s32 2944, %v2902_v37 }
 0x107   : > { %v1423_v6 = vadd.f32 %v1391_v41, %v1355_v10  ;;  %vm934_vm5 = vcmp.ge.f32.partialorder %v902_v56, 16.0  ;;  %v2656_v63 = vadd.f32 -16.0, %v902_v56  ;;  %vm648_vm6 = vcmp.lt.f32.partialorder %v616_v7, 0.0  ;;  %v2151_v15 = vpop.f32.mrf.mxu0  ;;  %v2192_v49 = vpop.f32.mrf.mxu1 }
 0x108   : > { %v998_v39 = vsel %vm934_vm5, %v966_v16, %v838_v14  ;;  %v712_v43 = vsel %vm648_vm6, %v2626_v54, %v552_v61  ;;  %v744_v44 = vadd.f32 16.0, %v616_v7  ;;  %v455_v23 = vsub.f32 %v292_v12, %v423_v51 }
 0x109   : > { %v1491_v17 = vadd.f32 %v3461_v21, %v1423_v6  ;;  %v1062_v3 = vsel %vm934_vm5, %v2656_v63, %v902_v56  ;;  %v2688_v22 = vadd.f32 -1.0, %v998_v39  ;;  %v808_v31 = vmul.f32 0.0625, %v712_v43  ;;  %v3503_v40 = vpop.f32.mrf.mxu0  ;;  %v3505_v12 = vpop.f32.mrf.mxu1 }
 0x10a   : > { %vm1094_vm7 = vcmp.lt.f32.partialorder %v1062_v3, 0.0  ;;  %v1190_v20 = vadd.f32 16.0, %v1062_v3  ;;  %v776_v18 = vsel %vm648_vm6, %v744_v44, %v616_v7  ;;  %vm487_vm8 = vcmp.ge.f32.partialorder %v455_v23, 16.0 }
 0x10b   : > { %v2108_v58 = vadd.f32 %v3468_v48, %v1491_v17  ;;  %v1158_v42 = vsel %vm1094_vm7, %v2688_v22, %v998_v39  ;;  %v840_v27 = vfloor.f32 %v808_v31  ;;  %v3501_v30 = vadd.s32 3072, %v2902_v37  ;;  %v3509_v48 = vpop.f32.mrf.mxu0  ;;  %v3511_v4 = vpop.f32.mrf.mxu1 }
 0x10c   : > { %v1222_v21 = vsel %vm1094_vm7, %v1190_v20, %v1062_v3  ;;  %v1254_v45 = vmul.f32 0.06666667, %v1158_v42  ;;  %v551_v32 = vsel %vm487_vm8, %v519_v53, %v391_v13  ;;  %v2593_v57 = vadd.f32 -16.0, %v455_v23 }
 0x10d   : > { %v2383_v1 = vadd.f32 %v3363_v28, %v2108_v58  ;;  %v1286_v60 = vmul.f32 0.06666667, %v1222_v21  ;;  %v872_v62 = vmul.f32 16.0, %v840_v27  ;;  %v1320_v50 = vmul.f32 0.06666667, %v776_v18  ;;  %v2232_v9 = vpop.f32.mrf.mxu0  ;;  %v2273_v0 = vpop.f32.mrf.mxu1 }
 0x10e   : > { %v1356_v26 = vmul.f32 %v3183_v36, %v1254_v45  ;;  %v968_v14 = vadd.f32 1.0, %v840_v27  ;;  %v615_v34 = vsel %vm487_vm8, %v2593_v57, %v455_v23  ;;  %v2625_v19 = vadd.f32 -1.0, %v551_v32 }
 0x10f   : > { %v2437_v47 = vcombine.low %v3477_v46, %v2383_v1  ;;  %v1392_v52 = vmul.f32 %v3232_v55, %v1286_v60  ;;  %v904_v24 = vsub.f32 %v712_v43, %v872_v62  ;;  %vm647_vm9 = vcmp.lt.f32.partialorder %v615_v34, 0.0  ;;  %v2233_v54 = vpop.f32.mrf.mxu0  ;;  %v2274_v7 = vpop.f32.mrf.mxu1 }
 0x110   : > { %v711_v16 = vsel %vm647_vm9, %v2625_v19, %v551_v32  ;;  %v743_v10 = vadd.f32 16.0, %v615_v34  ;;  %v294_v61 = vcvt.s32.f32 %v3494_v59  ;;  %v295_v2 = vcvt.s32.f32 %v3501_v30 }
 0x111   : > { %2469 = vst [vmem:[%s3391_s5 + $0x48] sm:$0xff] %v2437_v47  ;;  %v1424_v13 = vadd.f32 %v1392_v52, %v1356_v26  ;;  %vm936_vm10 = vcmp.ge.f32.partialorder %v904_v24, 16.0  ;;  %v2658_v41 = vadd.f32 -16.0, %v904_v24  ;;  %v807_v56 = vmul.f32 0.0625, %v711_v16  ;;  %v3522_v39 = vpop.f32.mrf.mxu0  ;;  %v3524_v59 = vpop.f32.mrf.mxu1 }
 0x112   : > { %v1000_v46 = vsel %vm936_vm10, %v968_v14, %v840_v27  ;;  %v775_v51 = vsel %vm647_vm9, %v743_v10, %v615_v34  ;;  %v361_v53 = vmul.f32 0.0625, %v294_v61  ;;  %v362_v35 = vmul.f32 0.0625, %v295_v2 }
 0x113   : > { %v1064_v6 = vsel %vm936_vm10, %v2658_v41, %v904_v24  ;;  %v2690_v63 = vadd.f32 -1.0, %v1000_v46  ;;  %v839_v33 = vfloor.f32 %v807_v56  ;;  %v1492_v43 = vadd.f32 %v3487_v29, %v1424_v13  ;;  %v3528_v31 = vpop.f32.mrf.mxu0  ;;  %v3530_v15 = vpop.f32.mrf.mxu1 }
 0x114   : > { %vm1096_vm11 = vcmp.lt.f32.partialorder %v1064_v6, 0.0  ;;  %v1192_v44 = vadd.f32 16.0, %v1064_v6  ;;  %v393_v23 = vfloor.f32 %v361_v53  ;;  %v1462_v3 = vmul.f32 %v3185_v38, %v1320_v50 }
 0x115   : > { %v1160_v17 = vsel %vm1096_vm11, %v2690_v63, %v1000_v46  ;;  %v871_v22 = vmul.f32 16.0, %v839_v33  ;;  %v967_v18 = vadd.f32 1.0, %v839_v33  ;;  %v1319_v21 = vmul.f32 0.06666667, %v775_v51  ;;  %v2314_v29 = vpop.f32.mrf.mxu0  ;;  %v2355_v32 = vpop.f32.mrf.mxu1 }
 0x116   : > { %v1224_v49 = vsel %vm1096_vm11, %v1192_v44, %v1064_v6  ;;  %v1256_v20 = vmul.f32 0.06666667, %v1160_v17  ;;  %v425_v58 = vmul.f32 16.0, %v393_v23  ;;  %v521_v45 = vadd.f32 1.0, %v393_v23 }
 0x117   : > { %v1288_v42 = vmul.f32 0.06666667, %v1224_v49  ;;  %v903_v27 = vsub.f32 %v711_v16, %v871_v22  ;;  %v2147_v57 = vadd.f32 %v3479_v5, %v1492_v43  ;;  %v394_v62 = vfloor.f32 %v362_v35  ;;  %v2315_v34 = vpop.f32.mrf.mxu0  ;;  %v2356_v19 = vpop.f32.mrf.mxu1 }
 0x118   : > { %v1358_v1 = vmul.f32 %v3183_v36, %v1256_v20  ;;  %v457_v60 = vsub.f32 %v294_v61, %v425_v58  ;;  %v3536_v14 = vadd.s32 3328, %v2902_v37  ;;  %v3541_v35 = vadd.s32 3200, %v2902_v37 }
 0x119   : > { %v1394_v50 = vmul.f32 %v3232_v55, %v1288_v42  ;;  %vm935_vm12 = vcmp.ge.f32.partialorder %v903_v27, 16.0  ;;  %v2657_v26 = vadd.f32 -16.0, %v903_v27  ;;  %v426_v24 = vmul.f32 16.0, %v394_v62 }
 0x11a   : > { %v999_v47 = vsel %vm935_vm12, %v967_v18, %v839_v33  ;;  %vm489_vm13 = vcmp.ge.f32.partialorder %v457_v60, 16.0  ;;  %v2595_v52 = vadd.f32 -16.0, %v457_v60  ;;  %v1461_v44 = vmul.f32 %v3185_v38, %v1319_v21 }
 0x11b   : > { %v1426_v9 = vadd.f32 %v1394_v50, %v1358_v1  ;;  %v1063_v0 = vsel %vm935_vm12, %v2657_v26, %v903_v27  ;;  %v2689_v5 = vadd.f32 -1.0, %v999_v47  ;;  %v553_v16 = vsel %vm489_vm13, %v521_v45, %v393_v23 }
 0x11c   : > { %vm1095_vm14 = vcmp.lt.f32.partialorder %v1063_v0, 0.0  ;;  %v1191_v10 = vadd.f32 16.0, %v1063_v0  ;;  %v617_v61 = vsel %vm489_vm13, %v2595_v52, %v457_v60  ;;  %v2627_v13 = vadd.f32 -1.0, %v553_v16 }
 0x11d   : > { %v1494_v41 = vadd.f32 %v1462_v3, %v1426_v9  ;;  %v1159_v56 = vsel %vm1095_vm14, %v2689_v5, %v999_v47  ;;  %vm649_vm15 = vcmp.lt.f32.partialorder %v617_v61, 0.0  ;;  %v745_v54 = vadd.f32 16.0, %v617_v61 }
 0x11e   : > { %v1223_v7 = vsel %vm1095_vm14, %v1191_v10, %v1063_v0  ;;  %v1255_v46 = vmul.f32 0.06666667, %v1159_v56  ;;  %v713_v51 = vsel %vm649_vm15, %v2627_v13, %v553_v16  ;;  %v458_v53 = vsub.f32 %v295_v2, %v426_v24 }
 0x11f   : > { %v1287_v6 = vmul.f32 0.06666667, %v1223_v7  ;;  %v777_v63 = vsel %vm649_vm15, %v745_v54, %v617_v61  ;;  %v809_v33 = vmul.f32 0.0625, %v713_v51  ;;  %v522_v23 = vadd.f32 1.0, %v394_v62 }
 0x120   : > { %v1357_v43 = vmul.f32 %v3183_v36, %v1255_v46  ;;  %vm490_vm0 = vcmp.ge.f32.partialorder %v458_v53, 16.0  ;;  %v2188_v17 = vadd.f32 %v3481_v11, %v1494_v41  ;;  %v2596_v49 = vadd.f32 -16.0, %v458_v53 }
 0x121   : > { %v1393_v3 = vmul.f32 %v3232_v55, %v1287_v6  ;;  %v841_v22 = vfloor.f32 %v809_v33  ;;  %v1321_v30 = vmul.f32 0.06666667, %v777_v63  ;;  %v554_v2 = vsel %vm490_vm0, %v522_v23, %v394_v62 }
 0x122   : > { %v297_v20 = vcvt.s32.f32 %v3536_v14  ;;  %v618_v42 = vsel %vm490_vm0, %v2596_v49, %v458_v53  ;;  %v296_v27 = vcvt.s32.f32 %v3541_v35  ;;  %v2628_v21 = vadd.f32 -1.0, %v554_v2 }
 0x123   : > { %v1425_v18 = vadd.f32 %v1393_v3, %v1357_v43  ;;  %v873_v58 = vmul.f32 16.0, %v841_v22  ;;  %v969_v45 = vadd.f32 1.0, %v841_v22  ;;  %vm650_vm2 = vcmp.lt.f32.partialorder %v618_v42, 0.0 }
 0x124   : > { %v364_v29 = vmul.f32 0.0625, %v297_v20  ;;  %v2384_v32 = vadd.f32 %v3363_v28, %v2147_v57  ;;  %v3551_v11 = vadd.f32 %v3363_v28, %v2188_v17  ;;  %v1463_v62 = vmul.f32 %v3185_v38, %v1321_v30 }
 0x125   : > { %v1493_v1 = vadd.f32 %v1461_v44, %v1425_v18  ;;  %v905_v60 = vsub.f32 %v713_v51, %v873_v58  ;;  %v714_v50 = vsel %vm650_vm2, %v2628_v21, %v554_v2  ;;  %v746_v26 = vadd.f32 16.0, %v618_v42 }
 0x126   : > { %v396_v14 = vfloor.f32 %v364_v29  ;;  %v810_v47 = vmul.f32 0.0625, %v714_v50  ;;  %v363_v57 = vmul.f32 0.0625, %v296_v27  ;;  %v3561_v17 = vadd.s32 3456, %v2902_v37 }
 0x127   : > { %v2149_v34 = vadd.f32 %v3489_v8, %v1493_v1  ;;  %vm937_vm1 = vcmp.ge.f32.partialorder %v905_v60, 16.0  ;;  %v2659_v19 = vadd.f32 -16.0, %v905_v60  ;;  %v778_v13 = vsel %vm650_vm2, %v746_v26, %v618_v42 }
 0x128   : > { %v1001_v52 = vsel %vm937_vm1, %v969_v45, %v841_v22  ;;  %v428_v24 = vmul.f32 16.0, %v396_v14  ;;  %v524_v9 = vadd.f32 1.0, %v396_v14  ;;  %v842_v10 = vfloor.f32 %v810_v47 }
 0x129   : > { %v2385_v0 = vadd.f32 %v3363_v28, %v2149_v34  ;;  %v1065_v5 = vsel %vm937_vm1, %v2659_v19, %v905_v60  ;;  %v2691_v16 = vadd.f32 -1.0, %v1001_v52  ;;  %v395_v35 = vfloor.f32 %v363_v57 }
 0x12a   : > { %vm1097_vm3 = vcmp.lt.f32.partialorder %v1065_v5, 0.0  ;;  %v1193_v61 = vadd.f32 16.0, %v1065_v5  ;;  %v460_v41 = vsub.f32 %v297_v20, %v428_v24  ;;  %v874_v54 = vmul.f32 16.0, %v842_v10 }
 0x12b   : > { %v2438_v56 = vcombine.low %v2384_v32, %v2385_v0  ;;  %v1161_v8 = vsel %vm1097_vm3, %v2691_v16, %v1001_v52  ;;  %v970_v7 = vadd.f32 1.0, %v842_v10  ;;  %v1322_v30 = vmul.f32 0.06666667, %v778_v13 }
 0x12c   : > { %v1225_v46 = vsel %vm1097_vm3, %v1193_v61, %v1065_v5  ;;  %v1257_v51 = vmul.f32 0.06666667, %v1161_v8  ;;  %vm492_vm4 = vcmp.ge.f32.partialorder %v460_v41, 16.0  ;;  %v2598_v53 = vadd.f32 -16.0, %v460_v41 }
 0x12d   : > { %2470 = vst [vmem:[%s3391_s5 + $0x50] sm:$0xff] %v2438_v56  ;;  %v1289_v6 = vmul.f32 0.06666667, %v1225_v46  ;;  %v906_v63 = vsub.f32 %v714_v50, %v874_v54  ;;  %v556_v33 = vsel %vm492_vm4, %v524_v9, %v396_v14  ;;  %v427_v20 = vmul.f32 16.0, %v395_v35 }
 0x12e   : > { %v1359_v43 = vmul.f32 %v3183_v36, %v1257_v51  ;;  %v620_v44 = vsel %vm492_vm4, %v2598_v53, %v460_v41  ;;  %v2630_v23 = vadd.f32 -1.0, %v556_v33  ;;  %v298_v32 = vcvt.s32.f32 %v3561_v17 }
 0x12f   : > { %v1395_v3 = vmul.f32 %v3232_v55, %v1289_v6  ;;  %vm938_vm5 = vcmp.ge.f32.partialorder %v906_v63, 16.0  ;;  %v2660_v22 = vadd.f32 -16.0, %v906_v63  ;;  %vm652_vm6 = vcmp.lt.f32.partialorder %v620_v44, 0.0 }
 0x130   : > { %v1002_v49 = vsel %vm938_vm5, %v970_v7, %v842_v10  ;;  %v716_v2 = vsel %vm652_vm6, %v2630_v23, %v556_v33  ;;  %v459_v29 = vsub.f32 %v296_v27, %v427_v20  ;;  %v748_v50 = vadd.f32 16.0, %v620_v44 }
 0x131   : > { %v1427_v18 = vadd.f32 %v1395_v3, %v1359_v43  ;;  %v1066_v58 = vsel %vm938_vm5, %v2660_v22, %v906_v63  ;;  %v2692_v42 = vadd.f32 -1.0, %v1002_v49  ;;  %v812_v45 = vmul.f32 0.0625, %v716_v2 }
 0x132   : > { %vm1098_vm7 = vcmp.lt.f32.partialorder %v1066_v58, 0.0  ;;  %v1194_v21 = vadd.f32 16.0, %v1066_v58  ;;  %vm491_vm8 = vcmp.ge.f32.partialorder %v459_v29, 16.0  ;;  %v523_v19 = vadd.f32 1.0, %v395_v35 }
 0x133   : > { %v1495_v1 = vadd.f32 %v1463_v62, %v1427_v18  ;;  %v1162_v60 = vsel %vm1098_vm7, %v2692_v42, %v1002_v49  ;;  %v844_v26 = vfloor.f32 %v812_v45  ;;  %v1464_v24 = vmul.f32 %v3185_v38, %v1322_v30 }
 0x134   : > { %v1226_v14 = vsel %vm1098_vm7, %v1194_v21, %v1066_v58  ;;  %v1258_v34 = vmul.f32 0.06666667, %v1162_v60  ;;  %v555_v27 = vsel %vm491_vm8, %v523_v19, %v395_v35  ;;  %v2597_v5 = vadd.f32 -16.0, %v459_v29 }
 0x135   : > { %v2190_v47 = vadd.f32 %v3491_v25, %v1495_v1  ;;  %v1290_v52 = vmul.f32 0.06666667, %v1226_v14  ;;  %v876_v9 = vmul.f32 16.0, %v844_v26  ;;  %v972_v0 = vadd.f32 1.0, %v844_v26 }
 0x136   : > { %v1360_v57 = vmul.f32 %v3183_v36, %v1258_v34  ;;  %v2629_v61 = vadd.f32 -1.0, %v555_v27  ;;  %v780_v13 = vsel %vm652_vm6, %v748_v50, %v620_v44  ;;  %v619_v41 = vsel %vm491_vm8, %v2597_v5, %v459_v29 }
 0x137   : > { %v2387_v62 = vadd.f32 %v3363_v28, %v2190_v47  ;;  %v1396_v16 = vmul.f32 %v3232_v55, %v1290_v52  ;;  %v908_v10 = vsub.f32 %v716_v2, %v876_v9  ;;  %v365_v25 = vmul.f32 0.0625, %v298_v32 }
 0x138   : > { %v267_v56 = vadd.s32 3584, %v2902_v37  ;;  %vm651_vm10 = vcmp.lt.f32.partialorder %v619_v41, 0.0  ;;  %v747_v51 = vadd.f32 16.0, %v619_v41  ;;  %v1324_v43 = vmul.f32 0.06666667, %v780_v13 }
 0x139   : > { %v2439_v8 = vcombine.low %v3551_v11, %v2387_v62  ;;  %v1428_v54 = vadd.f32 %v1396_v16, %v1360_v57  ;;  %vm940_vm9 = vcmp.ge.f32.partialorder %v908_v10, 16.0  ;;  %v2662_v7 = vadd.f32 -16.0, %v908_v10 }
 0x13a   : > { %v1004_v46 = vsel %vm940_vm9, %v972_v0, %v844_v26  ;;  %v397_v53 = vfloor.f32 %v365_v25  ;;  %v715_v35 = vsel %vm651_vm10, %v2629_v61, %v555_v27  ;;  %v299_v23 = vcvt.s32.f32 %v267_v56 }
 0x13b   : > { %2471 = vst [vmem:[%s3391_s5 + $0x58] sm:$0xff] %v2439_v8  ;;  %v1496_v6 = vadd.f32 %v1464_v24, %v1428_v54  ;;  %v1068_v63 = vsel %vm940_vm9, %v2662_v7, %v908_v10  ;;  %v2694_v33 = vadd.f32 -1.0, %v1004_v46  ;;  %v811_v44 = vmul.f32 0.0625, %v715_v35 }
 0x13c   : > { %vm1100_vm11 = vcmp.lt.f32.partialorder %v1068_v63, 0.0  ;;  %v1196_v17 = vadd.f32 16.0, %v1068_v63  ;;  %v779_v3 = vsel %vm651_vm10, %v747_v51, %v619_v41  ;;  %v429_v22 = vmul.f32 16.0, %v397_v53 }
 0x13d   : > { %v843_v11 = vfloor.f32 %v811_v44  ;;  %v525_v49 = vadd.f32 1.0, %v397_v53  ;;  %v2229_v30 = vadd.f32 %v3503_v40, %v1496_v6  ;;  %v1164_v2 = vsel %vm1100_vm11, %v2694_v33, %v1004_v46 }
 0x13e   : > { %v461_v20 = vsub.f32 %v298_v32, %v429_v22  ;;  %v3578_v18 = vadd.s32 3840, %v2902_v37  ;;  %v3581_v58 = vmul.f32 %v3185_v38, %v1324_v43  ;;  %v1323_v45 = vmul.f32 0.06666667, %v779_v3 }
 0x13f   : > { %v875_v42 = vmul.f32 16.0, %v843_v11  ;;  %v366_v21 = vmul.f32 0.0625, %v299_v23  ;;  %v1228_v29 = vsel %vm1100_vm11, %v1196_v17, %v1068_v63  ;;  %v971_v1 = vadd.f32 1.0, %v843_v11 }
 0x140   : > { %vm493_vm12 = vcmp.ge.f32.partialorder %v461_v20, 16.0  ;;  %v2599_v60 = vadd.f32 -16.0, %v461_v20  ;;  %v1260_v50 = vmul.f32 0.06666667, %v1164_v2  ;;  %v3585_v32 = vadd.f32 %v3363_v28, %v2229_v30 }
 0x141   : > { %v907_v26 = vsub.f32 %v715_v35, %v875_v42  ;;  %v557_v40 = vsel %vm493_vm12, %v525_v49, %v397_v53  ;;  %v398_v14 = vfloor.f32 %v366_v21  ;;  %v301_v47 = vcvt.s32.f32 %v3578_v18 }
 0x142   : > { %v621_v34 = vsel %vm493_vm12, %v2599_v60, %v461_v20  ;;  %v2631_v19 = vadd.f32 -1.0, %v557_v40  ;;  %v1292_v52 = vmul.f32 0.06666667, %v1228_v29  ;;  %v1465_v16 = vmul.f32 %v3185_v38, %v1323_v45 }
 0x143   : > { %vm939_vm13 = vcmp.ge.f32.partialorder %v907_v26, 16.0  ;;  %v2661_v24 = vadd.f32 -16.0, %v907_v26  ;;  %vm653_vm14 = vcmp.lt.f32.partialorder %v621_v34, 0.0  ;;  %v749_v0 = vadd.f32 16.0, %v621_v34 }
 0x144   : > { %v1003_v9 = vsel %vm939_vm13, %v971_v1, %v843_v11  ;;  %v717_v57 = vsel %vm653_vm14, %v2631_v19, %v557_v40  ;;  %v430_v27 = vmul.f32 16.0, %v398_v14  ;;  %v1362_v61 = vmul.f32 %v3183_v36, %v1260_v50 }
 0x145   : > { %v1067_v5 = vsel %vm939_vm13, %v2661_v24, %v907_v26  ;;  %v2693_v62 = vadd.f32 -1.0, %v1003_v9  ;;  %v813_v10 = vmul.f32 0.0625, %v717_v57  ;;  %v368_v41 = vmul.f32 0.0625, %v301_v47 }
 0x146   : > { %vm1099_vm15 = vcmp.lt.f32.partialorder %v1067_v5, 0.0  ;;  %v1195_v13 = vadd.f32 16.0, %v1067_v5  ;;  %v462_v8 = vsub.f32 %v299_v23, %v430_v27  ;;  %v526_v54 = vadd.f32 1.0, %v398_v14 }
 0x147   : > { %v1163_v25 = vsel %vm1099_vm15, %v2693_v62, %v1003_v9  ;;  %v845_v56 = vfloor.f32 %v813_v10  ;;  %v1398_v7 = vmul.f32 %v3232_v55, %v1292_v52  ;;  %v781_v53 = vsel %vm653_vm14, %v749_v0, %v621_v34 }
 0x148   : > { %v1227_v46 = vsel %vm1099_vm15, %v1195_v13, %v1067_v5  ;;  %v1259_v51 = vmul.f32 0.06666667, %v1163_v25  ;;  %vm494_vm0 = vcmp.ge.f32.partialorder %v462_v8, 16.0  ;;  %v2600_v44 = vadd.f32 -16.0, %v462_v8 }
 0x149   : > { %v1291_v6 = vmul.f32 0.06666667, %v1227_v46  ;;  %v877_v63 = vmul.f32 16.0, %v845_v56  ;;  %v973_v33 = vadd.f32 1.0, %v845_v56  ;;  %v558_v43 = vsel %vm494_vm0, %v526_v54, %v398_v14 }
 0x14a   : > { %v1361_v35 = vmul.f32 %v3183_v36, %v1259_v51  ;;  %v400_v17 = vfloor.f32 %v368_v41  ;;  %v2632_v23 = vadd.f32 -1.0, %v558_v43  ;;  %v268_v11 = vadd.s32 3712, %v2902_v37 }
 0x14b   : > { %v1397_v3 = vmul.f32 %v3232_v55, %v1291_v6  ;;  %v909_v22 = vsub.f32 %v717_v57, %v877_v63  ;;  %v1430_v49 = vadd.f32 %v1398_v7, %v1362_v61  ;;  %v1325_v30 = vmul.f32 0.06666667, %v781_v53 }
 0x14c   : > { %v3596_v2 = vsel %vm494_vm0, %v2600_v44, %v462_v8  ;;  %v432_v20 = vmul.f32 16.0, %v400_v17  ;;  %v528_v1 = vadd.f32 1.0, %v400_v17  ;;  %v300_v34 = vcvt.s32.f32 %v268_v11 }
 0x14d   : > { %v1429_v18 = vadd.f32 %v1397_v3, %v1361_v35  ;;  %vm941_vm2 = vcmp.ge.f32.partialorder %v909_v22, 16.0  ;;  %v2663_v42 = vadd.f32 -16.0, %v909_v22  ;;  %vm654_vm1 = vcmp.lt.f32.partialorder %v3596_v2, 0.0 }
 0x14e   : > { %v1005_v45 = vsel %vm941_vm2, %v973_v33, %v845_v56  ;;  %v718_v21 = vsel %vm654_vm1, %v2632_v23, %v558_v43  ;;  %v464_v29 = vsub.f32 %v301_v47, %v432_v20  ;;  %v270_v9 = vadd.s32 3968, %v2902_v37 }
 0x14f   : > { %v1497_v60 = vadd.f32 %v1465_v16, %v1429_v18  ;;  %v1069_v50 = vsel %vm941_vm2, %v2663_v42, %v909_v22  ;;  %v2695_v26 = vadd.f32 -1.0, %v1005_v45  ;;  %v814_v40 = vmul.f32 0.0625, %v718_v21 }
 0x150   : > { %vm1101_vm3 = vcmp.lt.f32.partialorder %v1069_v50, 0.0  ;;  %v1197_v14 = vadd.f32 16.0, %v1069_v50  ;;  %vm496_vm4 = vcmp.ge.f32.partialorder %v464_v29, 16.0  ;;  %v2602_v47 = vadd.f32 -16.0, %v464_v29 }
 0x151   : > { %v2231_v19 = vadd.f32 %v3509_v48, %v1497_v60  ;;  %v1165_v52 = vsel %vm1101_vm3, %v2695_v26, %v1005_v45  ;;  %v846_v24 = vfloor.f32 %v814_v40  ;;  %v560_v27 = vsel %vm496_vm4, %v528_v1, %v400_v17 }
 0x152   : > { %v1229_v57 = vsel %vm1101_vm3, %v1197_v14, %v1069_v50  ;;  %v1261_v0 = vmul.f32 0.06666667, %v1165_v52  ;;  %v1498_v5 = vadd.f32 %v3581_v58, %v1430_v49  ;;  %v1467_v48 = vmul.f32 %v3185_v38, %v1325_v30 }
 0x153   : > { %v2389_v62 = vadd.f32 %v3363_v28, %v2231_v19  ;;  %v1293_v16 = vmul.f32 0.06666667, %v1229_v57  ;;  %v878_v10 = vmul.f32 16.0, %v846_v24  ;;  %v3609_v13 = vsel %vm496_vm4, %v2602_v47, %v464_v29 }
 0x154   : > { %v1363_v61 = vmul.f32 %v3183_v36, %v1261_v0  ;;  %v2634_v37 = vadd.f32 -1.0, %v560_v27  ;;  %vm656_vm5 = vcmp.lt.f32.partialorder %v3609_v13, 0.0  ;;  %v367_v8 = vmul.f32 0.0625, %v300_v34 }
 0x155   : > { %v2440_v41 = vcombine.low %v3585_v32, %v2389_v62  ;;  %v1399_v25 = vmul.f32 %v3232_v55, %v1293_v16  ;;  %v910_v56 = vsub.f32 %v718_v21, %v878_v10  ;;  %v302_v54 = vcvt.s32.f32 %v270_v9 }
 0x156   : > { %v720_v58 = vsel %vm656_vm5, %v2634_v37, %v560_v27  ;;  %v974_v51 = vadd.f32 1.0, %v846_v24  ;;  %v399_v6 = vfloor.f32 %v367_v8  ;;  %v2270_v63 = vadd.f32 %v3505_v12, %v1498_v5 }
 0x157   : > { %2472 = vst [vmem:[%s3391_s5 + $0x60] sm:$0xff] %v2440_v41  ;;  %v1431_v7 = vadd.f32 %v1399_v25, %v1363_v61  ;;  %v816_v46 = vmul.f32 0.0625, %v720_v58  ;;  %v2664_v53 = vadd.f32 -16.0, %v910_v56  ;;  %vm942_vm6 = vcmp.ge.f32.partialorder %v910_v56, 16.0 }
 0x158   : > { %v431_v35 = vmul.f32 16.0, %v399_v6  ;;  %v369_v43 = vmul.f32 0.0625, %v302_v54  ;;  %v1006_v17 = vsel %vm942_vm6, %v974_v51, %v846_v24  ;;  %v2390_v11 = vadd.f32 %v3363_v28, %v2270_v63 }
 0x159   : > { %v1499_v33 = vadd.f32 %v1467_v48, %v1431_v7  ;;  %v848_v32 = vfloor.f32 %v816_v46  ;;  %v1070_v3 = vsel %vm942_vm6, %v2664_v53, %v910_v56  ;;  %v527_v30 = vadd.f32 1.0, %v399_v6 }
 0x15a   : > { %v463_v23 = vsub.f32 %v300_v34, %v431_v35  ;;  %v401_v12 = vfloor.f32 %v369_v43  ;;  %vm1102_vm8 = vcmp.lt.f32.partialorder %v1070_v3, 0.0  ;;  %v2696_v42 = vadd.f32 -1.0, %v1006_v17 }
 0x15b   : > { %v2272_v44 = vadd.f32 %v3511_v4, %v1499_v33  ;;  %v880_v22 = vmul.f32 16.0, %v848_v32  ;;  %v1198_v1 = vadd.f32 16.0, %v1070_v3  ;;  %v750_v60 = vadd.f32 16.0, %v3596_v2 }
 0x15c   : > { %vm495_vm7 = vcmp.ge.f32.partialorder %v463_v23, 16.0  ;;  %v2601_v20 = vadd.f32 -16.0, %v463_v23  ;;  %v433_v4 = vmul.f32 16.0, %v401_v12  ;;  %v1166_v26 = vsel %vm1102_vm8, %v2696_v42, %v1006_v17 }
 0x15d   : > { %v2391_v49 = vadd.f32 %v3363_v28, %v2272_v44  ;;  %v912_v45 = vsub.f32 %v720_v58, %v880_v22  ;;  %v559_v21 = vsel %vm495_vm7, %v527_v30, %v399_v6  ;;  %v976_v40 = vadd.f32 1.0, %v848_v32 }
 0x15e   : > { %v623_v29 = vsel %vm495_vm7, %v2601_v20, %v463_v23  ;;  %v2633_v50 = vadd.f32 -1.0, %v559_v21  ;;  %v465_v14 = vsub.f32 %v302_v54, %v433_v4  ;;  %v529_v52 = vadd.f32 1.0, %v401_v12 }
 0x15f   : > { %v2441_v18 = vcombine.low %v2390_v11, %v2391_v49  ;;  %vm655_vm9 = vcmp.lt.f32.partialorder %v623_v29, 0.0  ;;  %vm944_vm10 = vcmp.ge.f32.partialorder %v912_v45, 16.0  ;;  %v2666_v34 = vadd.f32 -16.0, %v912_v45 }
 0x160   : > { %v719_v19 = vsel %vm655_vm9, %v2633_v50, %v559_v21  ;;  %v1230_v24 = vsel %vm1102_vm8, %v1198_v1, %v1070_v3  ;;  %v782_v57 = vsel %vm654_vm1, %v750_v60, %v3596_v2  ;;  %vm497_vm11 = vcmp.ge.f32.partialorder %v465_v14, 16.0 }
 0x161   : > { %2473 = vst [vmem:[%s3391_s5 + $0x68] sm:$0xff] %v2441_v18  ;;  %v815_v9 = vmul.f32 0.0625, %v719_v19  ;;  %v2603_v0 = vadd.f32 -16.0, %v465_v14  ;;  %v1262_v27 = vmul.f32 0.06666667, %v1166_v26  ;;  %v1008_v47 = vsel %vm944_vm10, %v976_v40, %v848_v32 }
 0x162   : > { %v1294_v62 = vmul.f32 0.06666667, %v1230_v24  ;;  %v1072_v16 = vsel %vm944_vm10, %v2666_v34, %v912_v45  ;;  %v561_v10 = vsel %vm497_vm11, %v529_v52, %v401_v12  ;;  %v1326_v48 = vmul.f32 0.06666667, %v782_v57 }
 0x163   : > { %v847_v5 = vfloor.f32 %v815_v9  ;;  %v625_v61 = vsel %vm497_vm11, %v2603_v0, %v465_v14  ;;  %v2698_v41 = vadd.f32 -1.0, %v1008_v47  ;;  %v751_v25 = vadd.f32 16.0, %v623_v29 }
 0x164   : > { %vm657_vm12 = vcmp.lt.f32.partialorder %v625_v61, 0.0  ;;  %v2635_v58 = vadd.f32 -1.0, %v561_v10  ;;  %v752_v8 = vadd.f32 16.0, %v3609_v13  ;;  %vm1104_vm13 = vcmp.lt.f32.partialorder %v1072_v16, 0.0 }
 0x165   : > { %v879_v37 = vmul.f32 16.0, %v847_v5  ;;  %v975_v56 = vadd.f32 1.0, %v847_v5  ;;  %v1364_v54 = vmul.f32 %v3183_v36, %v1262_v27  ;;  %v1400_v7 = vmul.f32 %v3232_v55, %v1294_v62 }
 0x166   : > { %v1200_v46 = vadd.f32 16.0, %v1072_v16  ;;  %v721_v51 = vsel %vm657_vm12, %v2635_v58, %v561_v10  ;;  %v1468_v63 = vmul.f32 %v3185_v38, %v1326_v48  ;;  %v1168_v33 = vsel %vm1104_vm13, %v2698_v41, %v1008_v47 }
 0x167   : > { %v911_v2 = vsub.f32 %v719_v19, %v879_v37  ;;  %v817_v6 = vmul.f32 0.0625, %v721_v51  ;;  %v783_v32 = vsel %vm655_vm9, %v751_v25, %v623_v29  ;;  %v784_v43 = vsel %vm656_vm5, %v752_v8, %v3609_v13 }
 0x168   : > { %v1432_v22 = vadd.f32 %v1400_v7, %v1364_v54  ;;  %v1232_v23 = vsel %vm1104_vm13, %v1200_v46, %v1072_v16  ;;  %v1264_v49 = vmul.f32 0.06666667, %v1168_v33  ;;  %v1327_v20 = vmul.f32 0.06666667, %v783_v32 }
 0x169   : > { %vm943_vm14 = vcmp.ge.f32.partialorder %v911_v2, 16.0  ;;  %v2665_v53 = vadd.f32 -16.0, %v911_v2  ;;  %v849_v3 = vfloor.f32 %v817_v6  ;;  %v753_v45 = vadd.f32 16.0, %v625_v61 }
 0x16a   : > { %v1007_v35 = vsel %vm943_vm14, %v975_v56, %v847_v5  ;;  %v1296_v29 = vmul.f32 0.06666667, %v1232_v23  ;;  %v1328_v13 = vmul.f32 0.06666667, %v784_v43  ;;  %v1469_v26 = vmul.f32 %v3185_v38, %v1327_v20 }
 0x16b   : > { %v1071_v44 = vsel %vm943_vm14, %v2665_v53, %v911_v2  ;;  %v2697_v17 = vadd.f32 -1.0, %v1007_v35  ;;  %v881_v12 = vmul.f32 16.0, %v849_v3  ;;  %v977_v21 = vadd.f32 1.0, %v849_v3 }
 0x16c   : > { %vm1103_vm15 = vcmp.lt.f32.partialorder %v1071_v44, 0.0  ;;  %v1199_v11 = vadd.f32 16.0, %v1071_v44  ;;  %v1500_v14 = vadd.f32 %v1468_v63, %v1432_v22  ;;  %v1366_v34 = vmul.f32 %v3183_v36, %v1264_v49 }
 0x16d   : > { %v1167_v30 = vsel %vm1103_vm15, %v2697_v17, %v1007_v35  ;;  %v913_v1 = vsub.f32 %v721_v51, %v881_v12  ;;  %v785_v19 = vsel %vm657_vm12, %v753_v45, %v625_v61  ;;  %v1402_v24 = vmul.f32 %v3232_v55, %v1296_v29 }
 0x16e   : > { %v1231_v18 = vsel %vm1103_vm15, %v1199_v11, %v1071_v44  ;;  %v1263_v42 = vmul.f32 0.06666667, %v1167_v30  ;;  %v2311_v47 = vadd.f32 %v3522_v39, %v1500_v14  ;;  %v1329_v16 = vmul.f32 0.06666667, %v785_v19 }
 0x16f   : > { %v1295_v4 = vmul.f32 0.06666667, %v1231_v18  ;;  %vm945_vm0 = vcmp.ge.f32.partialorder %v913_v1, 16.0  ;;  %v2667_v40 = vadd.f32 -16.0, %v913_v1  ;;  %v1434_v37 = vadd.f32 %v1402_v24, %v1366_v34 }
 0x170   : > { %v1365_v60 = vmul.f32 %v3183_v36, %v1263_v42  ;;  %v1009_v52 = vsel %vm945_vm0, %v977_v21, %v849_v3  ;;  %v1470_v41 = vmul.f32 %v3185_v38, %v1328_v13  ;;  %v2392_v58 = vadd.f32 %v3363_v28, %v2311_v47 }
 0x171   : > { %v1401_v50 = vmul.f32 %v3232_v55, %v1295_v4  ;;  %v1073_v57 = vsel %vm945_vm0, %v2667_v40, %v913_v1  ;;  %v2699_v0 = vadd.f32 -1.0, %v1009_v52  ;;  %v1471_v2 = vmul.f32 %v3185_v38, %v1329_v16 }
 0x172   : > { %vm1105_vm2 = vcmp.lt.f32.partialorder %v1073_v57, 0.0  ;;  %v1201_v27 = vadd.f32 16.0, %v1073_v57  ;;  %v1502_v54 = vadd.f32 %v1470_v41, %v1434_v37 }
 0x173   : > { %v1433_v9 = vadd.f32 %v1401_v50, %v1365_v60  ;;  %v1169_v62 = vsel %vm1105_vm2, %v2699_v0, %v1009_v52 }
 0x174   : > { %v1233_v10 = vsel %vm1105_vm2, %v1201_v27, %v1073_v57  ;;  %v1265_v48 = vmul.f32 0.06666667, %v1169_v62  ;;  %v2352_v51 = vadd.f32 %v3524_v59, %v1502_v54 }
 0x175   : > { %v1501_v5 = vadd.f32 %v1469_v26, %v1433_v9  ;;  %v1297_v25 = vmul.f32 0.06666667, %v1233_v10 }
 0x176   : > { %v1367_v56 = vmul.f32 %v3183_v36, %v1265_v48  ;;  %v2394_v6 = vadd.f32 %v3363_v28, %v2352_v51 }
 0x177   : > { %v2313_v61 = vadd.f32 %v3528_v31, %v1501_v5  ;;  %v1403_v39 = vmul.f32 %v3232_v55, %v1297_v25 }
 0x179   : > { %v2393_v8 = vadd.f32 %v3363_v28, %v2313_v61  ;;  %v1435_v46 = vadd.f32 %v1403_v39, %v1367_v56 }
 0x17b   : > { %v2442_v7 = vcombine.low %v2392_v58, %v2393_v8  ;;  %v1503_v53 = vadd.f32 %v1471_v2, %v1435_v46 }
 0x17d   : > { %2474 = vst [vmem:[%s3391_s5 + $0x70] sm:$0xff] %v2442_v7  ;;  %v2354_v31 = vadd.f32 %v3530_v15, %v1503_v53 }
 0x17f   : > { %v2395_v36 = vadd.f32 %v3363_v28, %v2354_v31 }
 0x181   : > { %v2443_v63 = vcombine.low %v2394_v6, %v2395_v36 }
 0x183   : > { %2475 = vst [vmem:[%s3391_s5 + $0x78] sm:$0xff] %v2443_v63 }
 0x184 PF: > { %s14_s17 = sadd.s32 1, %s2806_s17   ;;  %s3674_s15 = smov %s2802_s16 }
 0x185   : > { %p11_p5 = scmp.ge.s32.totalorder %s14_s17, 4   ;;  %s3675_s16 = smov %s3677_s18 }
 0x187   :  { %13 = sbr.rel (!%p11_p5) target bundleno = 2 (0x2), region = 66 }

// kernel: fno_forward.7
= control target key start
LH: loop header
LB: loop body
LE: loop exit
PB: predicated region body
PF: predicated region fallthrough
CT: control target
= control target key end

     0   :  { %s1021_s18 = smov 0   ;;  %s1023_s19 = smov 0   ;;  %s1200_s0 = inlined_call_operand.vmem [shape: f32[2,4,256], index: 0, kind: input, shape index: {}]   ;;  %s1201_s1 = inlined_call_operand.vmem [shape: f32[2,4,256], index: 1, kind: input, shape index: {}]   ;;  %s1202_s2 = inlined_call_operand.vmem [shape: f32[4,4,256], index: 2, kind: input, shape index: {}]   ;;  %s1203_s3 = inlined_call_operand.vmem [shape: f32[4,4,256], index: 3, kind: input, shape index: {}]   ;;  %s1204_s4 = inlined_call_operand.vmem [shape: f32[2,4,256], index: 4, kind: output, shape index: {0}]   ;;  %s1205_s5 = inlined_call_operand.vmem [shape: f32[2,4,256], index: 5, kind: output, shape index: {1}]  }
   0x1   :  { %s1025_s20 = smov 0  }
   0x2 LB: > { %s1037_s21 = sadd.s32 4294967295, %s989_s20   ;;  %s1040_s22 = sadd.s32 1, %s989_s20   ;;  %s989_s20 = sphi %s1025_s20, %s1210_s20   ;;  %s985_s19 = sphi %s1023_s19, %s1209_s19   ;;  %s981_s18 = sphi %s1021_s18, %s1208_s18  }
   0x3   : > { %s20_s23 = ssub.s32 %s989_s20, %s1040_s22  ;;  %s23_s24 = sadd.s32 1, %s985_s19 }
   0x4   : > { %p21_p0 = scmp.eq.s32.totalorder %s20_s23, 0  ;;  %p30_p1 = scmp.ne.s32.totalorder %s985_s19, %s981_s18 }
   0x5   : > { %p31_p2 = scmp.eq.s32.totalorder %s989_s20, 0  ;;  %p138_p3 = scmp.eq.s32.totalorder %s1037_s21, 1 }
   0x6   : > { %s1050_s25 = scalar_select %p21_p0, %s985_s19, %s23_s24  }
   0x7   : > { %p1052_p4 = por %p31_p2, %p30_p1  ;;  %p1056_p5 = por %p138_p3, %p30_p1 }
   0x8   : > { %p919_p6 = scmp.ge.s32.totalorder %s989_s20, 2 }
   0xa   : > { %186 = sbr.rel (%p919_p6) target bundleno = 37 (0x25), region = 16 }
   0xf   : > { %189 = sbr.rel (!%p1052_p4) target bundleno = 20 (0x14), region = 20  ;;  %s191_s28 = sand.u32 (%p1052_p4), 1, %s985_s19  }
  0x10   : > { %s921_s29 = sshll.u32 (%p1052_p4), %s989_s20, 2  ;;  %s920_s30 = sshll.u32 (%p1052_p4), %s191_s28, 3 }
  0x11   : > { %s195_s8 = scalar_lea.vmem (%p1052_p4), %s1200_s0, %s921_s29  ;;  %s193_s9 = scalar_lea.vmem (%p1052_p4), [#allocation2], %s920_s30 }
  0x12   : > { %v212_v0 = vld [vmem:[%s195_s8] sm:$0xf] (%p1052_p4)  ;;  %v214_v1 = vld [vmem:[%s195_s8 + $0x8] sm:$0xf] (%p1052_p4) }
  0x13   : > { %213 = vst [vmem:[%s193_s9] sm:$0xf] (%p1052_p4), %v212_v0  ;;  %215 = vst [vmem:[%s193_s9 + $0x4] sm:$0xf] (%p1052_p4), %v214_v1 }
  0x14 PF: > { %243 = sbr.rel (!%p1052_p4) target bundleno = 25 (0x19), region = 61  ;;  %s245_s10 = sand.u32 (%p1052_p4), 1, %s985_s19  }
  0x15   : > { %s923_s11 = sshll.u32 (%p1052_p4), %s989_s20, 2  ;;  %s922_s12 = sshll.u32 (%p1052_p4), %s245_s10, 3 }
  0x16   : > { %s249_s15 = scalar_lea.vmem (%p1052_p4), %s1201_s1, %s923_s11  ;;  %s247_s16 = scalar_lea.vmem (%p1052_p4), [#allocation3], %s922_s12 }
  0x17   : > { %v266_v2 = vld [vmem:[%s249_s15] sm:$0xf] (%p1052_p4)  ;;  %v268_v3 = vld [vmem:[%s249_s15 + $0x8] sm:$0xf] (%p1052_p4) }
  0x18   : > { %267 = vst [vmem:[%s247_s16] sm:$0xf] (%p1052_p4), %v266_v2  ;;  %269 = vst [vmem:[%s247_s16 + $0x4] sm:$0xf] (%p1052_p4), %v268_v3 }
  0x19 PF: > { %297 = sbr.rel (!%p1052_p4) target bundleno = 31 (0x1f), region = 102  ;;  %s299_s17 = sand.u32 (%p1052_p4), 1, %s985_s19  }
  0x1a   : > { %s925_s23 = sshll.u32 (%p1052_p4), %s989_s20, 2  ;;  %s924_s24 = sshll.u32 (%p1052_p4), %s299_s17, 4 }
  0x1b   : > { %s303_s30 = scalar_lea.vmem (%p1052_p4), %s1202_s2, %s925_s23  ;;  %s301_s6 = scalar_lea.vmem (%p1052_p4), [#allocation4], %s924_s24 }
  0x1c   : > { %v320_v4 = vld [vmem:[%s303_s30] sm:$0xf] (%p1052_p4)  ;;  %v322_v5 = vld [vmem:[%s303_s30 + $0x8] sm:$0xf] (%p1052_p4)  ;;  %v324_v6 = vld [vmem:[%s303_s30 + $0x10] sm:$0xf] (%p1052_p4) }
  0x1d   : > { %321 = vst [vmem:[%s301_s6] sm:$0xf] (%p1052_p4), %v320_v4  ;;  %323 = vst [vmem:[%s301_s6 + $0x4] sm:$0xf] (%p1052_p4), %v322_v5  ;;  %v326_v7 = vld [vmem:[%s303_s30 + $0x18] sm:$0xf] (%p1052_p4) }
  0x1e   : > { %325 = vst [vmem:[%s301_s6 + $0x8] sm:$0xf] %v324_v6  ;;  %327 = vst [vmem:[%s301_s6 + $0xc] sm:$0xf] %v326_v7 }
  0x1f PF: > { %359 = sbr.rel (!%p1052_p4) target bundleno = 37 (0x25), region = 143  ;;  %s361_s7 = sand.u32 (%p1052_p4), 1, %s985_s19  }
  0x20   : > { %s927_s8 = sshll.u32 (%p1052_p4), %s989_s20, 2  ;;  %s926_s9 = sshll.u32 (%p1052_p4), %s361_s7, 4 }
  0x21   : > { %s365_s12 = scalar_lea.vmem (%p1052_p4), %s1203_s3, %s927_s8  ;;  %s363_s13 = scalar_lea.vmem (%p1052_p4), [#allocation5], %s926_s9 }
  0x22   : > { %v382_v8 = vld [vmem:[%s365_s12] sm:$0xf] (%p1052_p4)  ;;  %v384_v9 = vld [vmem:[%s365_s12 + $0x8] sm:$0xf] (%p1052_p4)  ;;  %v386_v10 = vld [vmem:[%s365_s12 + $0x10] sm:$0xf] (%p1052_p4) }
  0x23   : > { %383 = vst [vmem:[%s363_s13] sm:$0xf] (%p1052_p4), %v382_v8  ;;  %385 = vst [vmem:[%s363_s13 + $0x4] sm:$0xf] (%p1052_p4), %v384_v9  ;;  %v388_v11 = vld [vmem:[%s365_s12 + $0x18] sm:$0xf] (%p1052_p4) }
  0x24   : > { %387 = vst [vmem:[%s363_s13 + $0x8] sm:$0xf] %v386_v10  ;;  %389 = vst [vmem:[%s363_s13 + $0xc] sm:$0xf] %v388_v11 }
  0x25 PF: > { %p928_p7 = scmp.ge.s32.totalorder %s989_s20, 1  ;;  %p420_p8 = scmp.lt.s32.totalorder %s989_s20, 3 }
  0x27   : > { %p421_p9 = pnand %p928_p7, %p420_p8 }
  0x28   : > { %s427_s26 = sand.u32 (!%p421_p9), 1, %s981_s18  }
  0x29   : > { %424 = sbr.rel (%p421_p9) target bundleno = 91 (0x5b), region = 184  ;;  %s1092_s14 = sshll.u32 (!%p421_p9), %s427_s26, 3 }
  0x2a   : > { %s931_s15 = sshll.u32 (!%p421_p9), %s427_s26, 4  ;;  %s429_s16 = scalar_lea.vmem (!%p421_p9), [#allocation2], %s1092_s14 }
  0x2b   : > { %s436_s17 = scalar_lea.vmem (!%p421_p9), [#allocation3], %s1092_s14  ;;  %s443_s20 = scalar_lea.vmem (!%p421_p9), [#allocation4], %s931_s15 }
  0x2c   : > { %s450_s18 = scalar_lea.vmem (!%p421_p9), [#allocation5], %s931_s15  ;;  %s1157_s23 = scalar_lea.vmem (!%p421_p9), [#allocation6], %s1092_s14 }
  0x2d   : > { %s489_s24 = scalar_lea.vmem (!%p421_p9), [#allocation7], %s1092_s14 }
  0x2e   : > { %v511_v12 = vlaneseq  ;;  %v1095_v14 = vld [vmem:[%s429_s16] sm:$0xf]  ;;  %v1097_v15 = vld [vmem:[%s429_s16 + $0x4] sm:$0xf]  ;;  %v492_v16 = vld [vmem:[%s436_s17] sm:$0xf] }
  0x2f   : > { %v1100_v17 = vld [vmem:[%s436_s17 + $0x4] sm:$0xf]  ;;  %v494_v19 = vld [vmem:[%s443_s20] sm:$0xf]  ;;  %v495_v20 = vld [vmem:[%s443_s20 + $0x4] sm:$0xf]  ;;  %v510_v22 = vadd.f32 %v492_v16, %v1095_v14 }
  0x30   : > { %v512_v13 = vshrl.u32 %v511_v12, 7  ;;  %v1104_v21 = vld [vmem:[%s443_s20 + $0x8] sm:$0xf]  ;;  %v1109_v23 = vadd.f32 %v1100_v17, %v1097_v15  ;;  %v1111_v24 = vld [vmem:[%s443_s20 + $0xc] sm:$0xf]  ;;  %s939_s28 = sshll.u32 (%p1056_p5), %s1037_s21, 2 }
  0x31   : > { %v498_v25 = vld [vmem:[%s450_s18] sm:$0xf]  ;;  %v499_v26 = vld [vmem:[%s450_s18 + $0x4] sm:$0xf]  ;;  %v500_v31 = vld [vmem:[%s450_s18 + $0x8] sm:$0xf]  ;;  %s682_s6 = scalar_lea.vmem (%p1056_p5), %s1204_s4, %s939_s28 }
  0x32   : > { %v1102_v18 = vsub.s32 0, %v512_v13  ;;  %v501_v32 = vld [vmem:[%s450_s18 + $0xc] sm:$0xf]  ;;  %v506_v33 = vadd.f32 %v498_v25, %v494_v19  ;;  %v507_v34 = vadd.f32 %v499_v26, %v495_v20  ;;  %v1121_v36 = vsub.s32 1, %v512_v13 }
  0x33   : > { %v508_v37 = vadd.f32 %v500_v31, %v1104_v21  ;;  %v509_v38 = vadd.f32 %v501_v32, %v1111_v24  ;;  %v1125_v39 = vsub.s32 2, %v512_v13  ;;  %v1127_v40 = vsub.s32 3, %v512_v13 }
  0x34   : > { %v519_v27 = vrot.slane %v492_v16, %v1102_v18  ;;  %v526_v28 = vrot.slane %v1095_v14, %v1102_v18  ;;  %v598_v29 = vrot.slane %v1100_v17, %v1102_v18  ;;  %v605_v30 = vrot.slane %v1097_v15, %v1102_v18 }
  0x35   : > { %v514_v35 = vrot.slane %v510_v22, %v1102_v18  ;;  %v533_v43 = vrot.slane %v510_v22, %v1121_v36  ;;  %v538_v44 = vrot.slane %v492_v16, %v1121_v36  ;;  %v552_v45 = vrot.slane %v510_v22, %v1125_v39 }
  0x36   : > { %v520_v42 = vmul.f32 %v519_v27, %v506_v33  ;;  %v557_v46 = vrot.slane %v492_v16, %v1125_v39  ;;  %v571_v47 = vrot.slane %v510_v22, %v1127_v40  ;;  %v576_v48 = vrot.slane %v492_v16, %v1127_v40 }
  0x37   : > { %v515_v41 = vmul.f32 %v514_v35, %v494_v19  ;;  %v534_v50 = vmul.f32 %v533_v43, %v495_v20  ;;  %v539_v51 = vmul.f32 %v538_v44, %v507_v34  ;;  %v502_v52 = vsub.f32 %v498_v25, %v494_v19 }
  0x38   : > { %v553_v53 = vmul.f32 %v552_v45, %v1104_v21  ;;  %v558_v54 = vmul.f32 %v557_v46, %v508_v37  ;;  %v572_v55 = vmul.f32 %v571_v47, %v1111_v24  ;;  %v577_v56 = vmul.f32 %v576_v48, %v509_v38 }
  0x39   : > { %v521_v49 = vsub.f32 %v515_v41, %v520_v42  ;;  %v540_v57 = vsub.f32 %v534_v50, %v539_v51  ;;  %v503_v58 = vsub.f32 %v499_v26, %v495_v20  ;;  %v504_v59 = vsub.f32 %v500_v31, %v1104_v21 }
  0x3a   : > { %v505_v60 = vsub.f32 %v501_v32, %v1111_v24  ;;  %v559_v61 = vsub.f32 %v553_v53, %v558_v54  ;;  %v578_v62 = vsub.f32 %v572_v55, %v577_v56  ;;  %v527_v63 = vmul.f32 %v526_v28, %v502_v52 }
  0x3b   : > { %v545_v0 = vrot.slane %v1095_v14, %v1121_v36  ;;  %v541_v1 = vadd.f32 %v540_v57, %v521_v49  ;;  %v564_v2 = vrot.slane %v1095_v14, %v1125_v39  ;;  %v583_v3 = vrot.slane %v1095_v14, %v1127_v40 }
  0x3c   : > { %v593_v4 = vrot.slane %v1109_v23, %v1102_v18  ;;  %v528_v5 = vadd.f32 %v527_v63, %v515_v41  ;;  %v599_v7 = vmul.f32 %v598_v29, %v506_v33  ;;  %v612_v8 = vrot.slane %v1109_v23, %v1121_v36 }
  0x3d   : > { %v546_v6 = vmul.f32 %v545_v0, %v503_v58  ;;  %v560_v9 = vadd.f32 %v559_v61, %v541_v1  ;;  %v565_v10 = vmul.f32 %v564_v2, %v504_v59  ;;  %v584_v11 = vmul.f32 %v583_v3, %v505_v60 }
  0x3e   : > { %v594_v12 = vmul.f32 %v593_v4, %v494_v19  ;;  %v613_v16 = vmul.f32 %v612_v8, %v495_v20  ;;  %v617_v22 = vrot.slane %v1100_v17, %v1121_v36  ;;  %v631_v14 = vrot.slane %v1109_v23, %v1125_v39 }
  0x3f   : > { %v547_v13 = vadd.f32 %v546_v6, %v534_v50  ;;  %v579_v25 = vadd.f32 %v578_v62, %v560_v9  ;;  %v566_v26 = vadd.f32 %v565_v10, %v553_v53  ;;  %v585_v27 = vadd.f32 %v584_v11, %v572_v55 }
  0x40   : > { %v600_v28 = vsub.f32 %v594_v12, %v599_v7  ;;  %v618_v31 = vmul.f32 %v617_v22, %v507_v34  ;;  %v632_v32 = vmul.f32 %v631_v14, %v1104_v21  ;;  %v636_v33 = vrot.slane %v1100_v17, %v1125_v39 }
  0x41   : > { %v548_v29 = vadd.f32 %v547_v13, %v528_v5  ;;  %587 = vst [vmem:[%s1157_s23] sm:$0xf] %v579_v25  ;;  %v650_v19 = vrot.slane %v1109_v23, %v1127_v40  ;;  %v655_v20 = vrot.slane %v1100_v17, %v1127_v40  ;;  %v606_v35 = vmul.f32 %v605_v30, %v502_v52 }
  0x42   : > { %v624_v21 = vrot.slane %v1097_v15, %v1121_v36  ;;  %v619_v41 = vsub.f32 %v613_v16, %v618_v31  ;;  %v637_v42 = vmul.f32 %v636_v33, %v508_v37  ;;  %v643_v43 = vrot.slane %v1097_v15, %v1125_v39 }
  0x43   : > { %v567_v34 = vadd.f32 %v566_v26, %v548_v29  ;;  %v651_v44 = vmul.f32 %v650_v19, %v1111_v24  ;;  %v656_v23 = vmul.f32 %v655_v20, %v509_v38  ;;  %v607_v45 = vadd.f32 %v606_v35, %v594_v12 }
  0x44   : > { %v625_v46 = vmul.f32 %v624_v21, %v503_v58  ;;  %v620_v47 = vadd.f32 %v619_v41, %v600_v28  ;;  %v638_v18 = vsub.f32 %v632_v32, %v637_v42  ;;  %v644_v30 = vmul.f32 %v643_v43, %v504_v59 }
  0x45   : > { %v586_v17 = vadd.f32 %v585_v27, %v567_v34  ;;  %v657_v48 = vsub.f32 %v651_v44, %v656_v23  ;;  %v662_v36 = vrot.slane %v1097_v15, %v1127_v40 }
  0x46   : > { %v626_v49 = vadd.f32 %v625_v46, %v613_v16  ;;  %v639_v37 = vadd.f32 %v638_v18, %v620_v47  ;;  %v645_v50 = vadd.f32 %v644_v30, %v632_v32 }
  0x47   : > { %588 = vst [vmem:[%s489_s24] sm:$0xf] %v586_v17  ;;  %v663_v51 = vmul.f32 %v662_v36, %v505_v60 }
  0x48   : > { %v627_v39 = vadd.f32 %v626_v49, %v607_v45  ;;  %v658_v24 = vadd.f32 %v657_v48, %v639_v37  ;;  %v699_v15 = vld [vmem:[%s1157_s23] sm:$0xf] (%p1056_p5) }
  0x49   : > { %v664_v52 = vadd.f32 %v663_v51, %v651_v44  ;;  %700 = vst [vmem:[%s682_s6] sm:$0xf] (%p1056_p5), %v699_v15 }
  0x4a   : > { %v646_v38 = vadd.f32 %v645_v50, %v627_v39  ;;  %935 = vst [vmem:[%s1157_s23 + $0x4] sm:$0xf] %v658_v24  ;;  %680 = sbr.rel (!%p1056_p5) target bundleno = 83 (0x53), region = 204 }
  0x4c   : > { %v665_v53 = vadd.f32 %v664_v52, %v646_v38 }
  0x4e   : > { %936 = vst [vmem:[%s489_s24 + $0x4] sm:$0xf] %v665_v53 }
  0x51   : > { %v701_v40 = vld [vmem:[%s1157_s23 + $0x4] sm:$0xf] }
  0x52   : > { %702 = vst [vmem:[%s682_s6 + $0x8] sm:$0xf] %v701_v40 }
  0x53 PF: > { %730 = sbr.rel (!%p1056_p5) target bundleno = 91 (0x5b), region = 245  ;;  %s940_s7 = sshll.u32 (%p1056_p5), %s1037_s21, 2  ;;  %v749_v54 = vld [vmem:[%s489_s24] sm:$0xf] (%p1056_p5) }
  0x54   : > { %s732_s10 = scalar_lea.vmem (%p1056_p5), %s1205_s5, %s940_s7 }
  0x55   : > { %750 = vst [vmem:[%s732_s10] sm:$0xf] (%p1056_p5), %v749_v54 }
  0x59   : > { %v751_v55 = vld [vmem:[%s489_s24 + $0x4] sm:$0xf] }
  0x5a   : > { %752 = vst [vmem:[%s732_s10 + $0x8] sm:$0xf] %v751_v55 }
  0x5b PF: > { %p13_p10 = scmp.ge.s32.totalorder %s1040_s22, 4   ;;  %s1208_s18 = smov %s985_s19 }
  0x5c   : > { %s1209_s19 = smov %s1050_s25  ;;  %s1210_s20 = smov %s1040_s22 }
  0x5d   :  { %15 = sbr.rel (!%p13_p10) target bundleno = 2 (0x2), region = 355 }

// kernel: reverse.4
= control target key start
LH: loop header
LB: loop body
LE: loop exit
PB: predicated region body
PF: predicated region fallthrough
CT: control target
= control target key end

     0   :  { %s1352_s0 = inlined_call_operand.vmem [shape: f32[2,4,16,16,7], index: 0, kind: input, shape index: {}]   ;;  %s1353_s1 = inlined_call_operand.vmem [shape: f32[2,4,16,16,7], index: 1, kind: output, shape index: {}]  }
   0x1   :  { %v448_v0 = vld [vmem:[%s1352_s0 + $0x60] sm:$0xff]  ;;  %v451_v2 = vld [vmem:[%s1352_s0 + $0xd0] sm:$0xff]  ;;  %v558_v56 = vld [vmem:[%s1352_s0 + $0x68] sm:$0xff] }
   0x2   :  { %v449_v1 = vld [vmem:[%s1352_s0 + $0x220] sm:$0xff]  ;;  %4 = vst [vmem:[%s1353_s1] sm:$0xff] %v448_v0  ;;  %452 = vst [vmem:[%s1353_s1 + $0x70] sm:$0xff] %v451_v2  ;;  %v453_v3 = vld [vmem:[%s1352_s0 + $0x290] sm:$0xff] }
   0x3   :  { %450 = vst [vmem:[%s1353_s1 + $0x1c0] sm:$0xff] %v449_v1  ;;  %v455_v4 = vld [vmem:[%s1352_s0 + $0x140] sm:$0xff]  ;;  %454 = vst [vmem:[%s1353_s1 + $0x230] sm:$0xff] %v453_v3  ;;  %v459_v6 = vld [vmem:[%s1352_s0 + $0x1b0] sm:$0xff] }
   0x4   :  { %v457_v5 = vld [vmem:[%s1352_s0 + $0x300] sm:$0xff]  ;;  %456 = vst [vmem:[%s1353_s1 + $0xe0] sm:$0xff] %v455_v4  ;;  %v461_v7 = vld [vmem:[%s1352_s0 + $0x370] sm:$0xff]  ;;  %460 = vst [vmem:[%s1353_s1 + $0x150] sm:$0xff] %v459_v6 }
   0x5   :  { %458 = vst [vmem:[%s1353_s1 + $0x2a0] sm:$0xff] %v457_v5  ;;  %v463_v8 = vld [vmem:[%s1352_s0 + $0x50] sm:$0xff]  ;;  %462 = vst [vmem:[%s1353_s1 + $0x310] sm:$0xff] %v461_v7  ;;  %v467_v10 = vld [vmem:[%s1352_s0 + $0xc0] sm:$0xff] }
   0x6   :  { %464 = vst [vmem:[%s1353_s1 + $0x10] sm:$0xff] %v463_v8  ;;  %v465_v9 = vld [vmem:[%s1352_s0 + $0x210] sm:$0xff]  ;;  %v469_v11 = vld [vmem:[%s1352_s0 + $0x280] sm:$0xff]  ;;  %468 = vst [vmem:[%s1353_s1 + $0x80] sm:$0xff] %v467_v10 }
   0x7   :  { %466 = vst [vmem:[%s1353_s1 + $0x1d0] sm:$0xff] %v465_v9  ;;  %470 = vst [vmem:[%s1353_s1 + $0x240] sm:$0xff] %v469_v11  ;;  %v471_v12 = vld [vmem:[%s1352_s0 + $0x130] sm:$0xff]  ;;  %v475_v14 = vld [vmem:[%s1352_s0 + $0x1a0] sm:$0xff] }
   0x8   :  { %v473_v13 = vld [vmem:[%s1352_s0 + $0x2f0] sm:$0xff]  ;;  %472 = vst [vmem:[%s1353_s1 + $0xf0] sm:$0xff] %v471_v12  ;;  %476 = vst [vmem:[%s1353_s1 + $0x160] sm:$0xff] %v475_v14  ;;  %v477_v15 = vld [vmem:[%s1352_s0 + $0x360] sm:$0xff] }
   0x9   :  { %474 = vst [vmem:[%s1353_s1 + $0x2b0] sm:$0xff] %v473_v13  ;;  %v479_v16 = vld [vmem:[%s1352_s0 + $0x40] sm:$0xff]  ;;  %478 = vst [vmem:[%s1353_s1 + $0x320] sm:$0xff] %v477_v15  ;;  %v483_v18 = vld [vmem:[%s1352_s0 + $0xb0] sm:$0xff] }
   0xa   :  { %v481_v17 = vld [vmem:[%s1352_s0 + $0x200] sm:$0xff]  ;;  %480 = vst [vmem:[%s1353_s1 + $0x20] sm:$0xff] %v479_v16  ;;  %v485_v19 = vld [vmem:[%s1352_s0 + $0x270] sm:$0xff]  ;;  %484 = vst [vmem:[%s1353_s1 + $0x90] sm:$0xff] %v483_v18 }
   0xb   :  { %482 = vst [vmem:[%s1353_s1 + $0x1e0] sm:$0xff] %v481_v17  ;;  %v487_v20 = vld [vmem:[%s1352_s0 + $0x120] sm:$0xff]  ;;  %486 = vst [vmem:[%s1353_s1 + $0x250] sm:$0xff] %v485_v19  ;;  %v491_v22 = vld [vmem:[%s1352_s0 + $0x190] sm:$0xff] }
   0xc   :  { %488 = vst [vmem:[%s1353_s1 + $0x100] sm:$0xff] %v487_v20  ;;  %v489_v21 = vld [vmem:[%s1352_s0 + $0x2e0] sm:$0xff]  ;;  %v493_v23 = vld [vmem:[%s1352_s0 + $0x350] sm:$0xff]  ;;  %492 = vst [vmem:[%s1353_s1 + $0x170] sm:$0xff] %v491_v22 }
   0xd   :  { %490 = vst [vmem:[%s1353_s1 + $0x2c0] sm:$0xff] %v489_v21  ;;  %494 = vst [vmem:[%s1353_s1 + $0x330] sm:$0xff] %v493_v23  ;;  %v495_v24 = vld [vmem:[%s1352_s0 + $0x30] sm:$0xff]  ;;  %v499_v26 = vld [vmem:[%s1352_s0 + $0xa0] sm:$0xff] }
   0xe   :  { %v497_v25 = vld [vmem:[%s1352_s0 + $0x1f0] sm:$0xff]  ;;  %496 = vst [vmem:[%s1353_s1 + $0x30] sm:$0xff] %v495_v24  ;;  %500 = vst [vmem:[%s1353_s1 + $0xa0] sm:$0xff] %v499_v26  ;;  %v501_v27 = vld [vmem:[%s1352_s0 + $0x260] sm:$0xff] }
   0xf   :  { %498 = vst [vmem:[%s1353_s1 + $0x1f0] sm:$0xff] %v497_v25  ;;  %v503_v28 = vld [vmem:[%s1352_s0 + $0x110] sm:$0xff]  ;;  %502 = vst [vmem:[%s1353_s1 + $0x260] sm:$0xff] %v501_v27  ;;  %v507_v30 = vld [vmem:[%s1352_s0 + $0x180] sm:$0xff] }
  0x10   :  { %v505_v29 = vld [vmem:[%s1352_s0 + $0x2d0] sm:$0xff]  ;;  %504 = vst [vmem:[%s1353_s1 + $0x110] sm:$0xff] %v503_v28  ;;  %v509_v31 = vld [vmem:[%s1352_s0 + $0x340] sm:$0xff]  ;;  %508 = vst [vmem:[%s1353_s1 + $0x180] sm:$0xff] %v507_v30 }
  0x11   :  { %506 = vst [vmem:[%s1353_s1 + $0x2d0] sm:$0xff] %v505_v29  ;;  %v511_v32 = vld [vmem:[%s1352_s0 + $0x20] sm:$0xff]  ;;  %510 = vst [vmem:[%s1353_s1 + $0x340] sm:$0xff] %v509_v31  ;;  %v515_v34 = vld [vmem:[%s1352_s0 + $0x90] sm:$0xff] }
  0x12   :  { %512 = vst [vmem:[%s1353_s1 + $0x40] sm:$0xff] %v511_v32  ;;  %v513_v33 = vld [vmem:[%s1352_s0 + $0x1e0] sm:$0xff]  ;;  %v517_v35 = vld [vmem:[%s1352_s0 + $0x250] sm:$0xff]  ;;  %516 = vst [vmem:[%s1353_s1 + $0xb0] sm:$0xff] %v515_v34 }
  0x13   :  { %514 = vst [vmem:[%s1353_s1 + $0x200] sm:$0xff] %v513_v33  ;;  %518 = vst [vmem:[%s1353_s1 + $0x270] sm:$0xff] %v517_v35  ;;  %v519_v36 = vld [vmem:[%s1352_s0 + $0x100] sm:$0xff]  ;;  %v523_v38 = vld [vmem:[%s1352_s0 + $0x170] sm:$0xff] }
  0x14   :  { %v521_v37 = vld [vmem:[%s1352_s0 + $0x2c0] sm:$0xff]  ;;  %520 = vst [vmem:[%s1353_s1 + $0x120] sm:$0xff] %v519_v36  ;;  %524 = vst [vmem:[%s1353_s1 + $0x190] sm:$0xff] %v523_v38  ;;  %v525_v39 = vld [vmem:[%s1352_s0 + $0x330] sm:$0xff] }
  0x15   :  { %522 = vst [vmem:[%s1353_s1 + $0x2e0] sm:$0xff] %v521_v37  ;;  %v527_v40 = vld [vmem:[%s1352_s0 + $0x10] sm:$0xff]  ;;  %526 = vst [vmem:[%s1353_s1 + $0x350] sm:$0xff] %v525_v39  ;;  %v531_v42 = vld [vmem:[%s1352_s0 + $0x80] sm:$0xff] }
  0x16   :  { %v529_v41 = vld [vmem:[%s1352_s0 + $0x1d0] sm:$0xff]  ;;  %528 = vst [vmem:[%s1353_s1 + $0x50] sm:$0xff] %v527_v40  ;;  %v533_v43 = vld [vmem:[%s1352_s0 + $0x240] sm:$0xff]  ;;  %532 = vst [vmem:[%s1353_s1 + $0xc0] sm:$0xff] %v531_v42 }
  0x17   :  { %530 = vst [vmem:[%s1353_s1 + $0x210] sm:$0xff] %v529_v41  ;;  %v535_v44 = vld [vmem:[%s1352_s0 + $0xf0] sm:$0xff]  ;;  %534 = vst [vmem:[%s1353_s1 + $0x280] sm:$0xff] %v533_v43  ;;  %v539_v46 = vld [vmem:[%s1352_s0 + $0x160] sm:$0xff] }
  0x18   :  { %536 = vst [vmem:[%s1353_s1 + $0x130] sm:$0xff] %v535_v44  ;;  %v537_v45 = vld [vmem:[%s1352_s0 + $0x2b0] sm:$0xff]  ;;  %v541_v47 = vld [vmem:[%s1352_s0 + $0x320] sm:$0xff]  ;;  %540 = vst [vmem:[%s1353_s1 + $0x1a0] sm:$0xff] %v539_v46 }
  0x19   :  { %538 = vst [vmem:[%s1353_s1 + $0x2f0] sm:$0xff] %v537_v45  ;;  %542 = vst [vmem:[%s1353_s1 + $0x360] sm:$0xff] %v541_v47  ;;  %v193_v48 = vld [vmem:[%s1352_s0] sm:$0xff]  ;;  %v546_v50 = vld [vmem:[%s1352_s0 + $0x70] sm:$0xff] }
  0x1a   :  { %v544_v49 = vld [vmem:[%s1352_s0 + $0x1c0] sm:$0xff]  ;;  %543 = vst [vmem:[%s1353_s1 + $0x60] sm:$0xff] %v193_v48  ;;  %547 = vst [vmem:[%s1353_s1 + $0xd0] sm:$0xff] %v546_v50  ;;  %v548_v51 = vld [vmem:[%s1352_s0 + $0x230] sm:$0xff] }
  0x1b   :  { %545 = vst [vmem:[%s1353_s1 + $0x220] sm:$0xff] %v544_v49  ;;  %v550_v52 = vld [vmem:[%s1352_s0 + $0xe0] sm:$0xff]  ;;  %549 = vst [vmem:[%s1353_s1 + $0x290] sm:$0xff] %v548_v51  ;;  %v554_v54 = vld [vmem:[%s1352_s0 + $0x150] sm:$0xff] }
  0x1c   :  { %v552_v53 = vld [vmem:[%s1352_s0 + $0x2a0] sm:$0xff]  ;;  %551 = vst [vmem:[%s1353_s1 + $0x140] sm:$0xff] %v550_v52  ;;  %v556_v55 = vld [vmem:[%s1352_s0 + $0x310] sm:$0xff]  ;;  %555 = vst [vmem:[%s1353_s1 + $0x1b0] sm:$0xff] %v554_v54 }
  0x1d   :  { %553 = vst [vmem:[%s1353_s1 + $0x300] sm:$0xff] %v552_v53  ;;  %557 = vst [vmem:[%s1353_s1 + $0x370] sm:$0xff] %v556_v55  ;;  %v560_v57 = vld [vmem:[%s1352_s0 + $0x228] sm:$0xff]  ;;  %v562_v58 = vld [vmem:[%s1352_s0 + $0xd8] sm:$0xff] }
  0x1e   :  { %559 = vst [vmem:[%s1353_s1 + $0x8] sm:$0xff] %v558_v56  ;;  %v564_v59 = vld [vmem:[%s1352_s0 + $0x298] sm:$0xff]  ;;  %561 = vst [vmem:[%s1353_s1 + $0x1c8] sm:$0xff] %v560_v57  ;;  %v566_v60 = vld [vmem:[%s1352_s0 + $0x148] sm:$0xff] }
  0x1f   :  { %563 = vst [vmem:[%s1353_s1 + $0x78] sm:$0xff] %v562_v58  ;;  %565 = vst [vmem:[%s1353_s1 + $0x238] sm:$0xff] %v564_v59  ;;  %v568_v61 = vld [vmem:[%s1352_s0 + $0x308] sm:$0xff]  ;;  %v570_v62 = vld [vmem:[%s1352_s0 + $0x1b8] sm:$0xff] }
  0x20   :  { %567 = vst [vmem:[%s1353_s1 + $0xe8] sm:$0xff] %v566_v60  ;;  %569 = vst [vmem:[%s1353_s1 + $0x2a8] sm:$0xff] %v568_v61  ;;  %v572_v63 = vld [vmem:[%s1352_s0 + $0x378] sm:$0xff]  ;;  %v578_v2 = vld [vmem:[%s1352_s0 + $0xc8] sm:$0xff] }
  0x21   :  { %571 = vst [vmem:[%s1353_s1 + $0x158] sm:$0xff] %v570_v62  ;;  %v574_v0 = vld [vmem:[%s1352_s0 + $0x58] sm:$0xff]  ;;  %573 = vst [vmem:[%s1353_s1 + $0x318] sm:$0xff] %v572_v63  ;;  %v580_v3 = vld [vmem:[%s1352_s0 + $0x288] sm:$0xff] }
  0x22   :  { %v576_v1 = vld [vmem:[%s1352_s0 + $0x218] sm:$0xff]  ;;  %575 = vst [vmem:[%s1353_s1 + $0x18] sm:$0xff] %v574_v0  ;;  %579 = vst [vmem:[%s1353_s1 + $0x88] sm:$0xff] %v578_v2  ;;  %v586_v6 = vld [vmem:[%s1352_s0 + $0x1a8] sm:$0xff] }
  0x23   :  { %577 = vst [vmem:[%s1353_s1 + $0x1d8] sm:$0xff] %v576_v1  ;;  %v582_v4 = vld [vmem:[%s1352_s0 + $0x138] sm:$0xff]  ;;  %581 = vst [vmem:[%s1353_s1 + $0x248] sm:$0xff] %v580_v3  ;;  %v588_v7 = vld [vmem:[%s1352_s0 + $0x368] sm:$0xff] }
  0x24   :  { %583 = vst [vmem:[%s1353_s1 + $0xf8] sm:$0xff] %v582_v4  ;;  %v584_v5 = vld [vmem:[%s1352_s0 + $0x2f8] sm:$0xff]  ;;  %587 = vst [vmem:[%s1353_s1 + $0x168] sm:$0xff] %v586_v6  ;;  %v590_v8 = vld [vmem:[%s1352_s0 + $0x48] sm:$0xff] }
  0x25   :  { %585 = vst [vmem:[%s1353_s1 + $0x2b8] sm:$0xff] %v584_v5  ;;  %589 = vst [vmem:[%s1353_s1 + $0x328] sm:$0xff] %v588_v7  ;;  %v592_v9 = vld [vmem:[%s1352_s0 + $0x208] sm:$0xff]  ;;  %v594_v10 = vld [vmem:[%s1352_s0 + $0xb8] sm:$0xff] }
  0x26   :  { %591 = vst [vmem:[%s1353_s1 + $0x28] sm:$0xff] %v590_v8  ;;  %593 = vst [vmem:[%s1353_s1 + $0x1e8] sm:$0xff] %v592_v9  ;;  %v596_v11 = vld [vmem:[%s1352_s0 + $0x278] sm:$0xff]  ;;  %v598_v12 = vld [vmem:[%s1352_s0 + $0x128] sm:$0xff] }
  0x27   :  { %595 = vst [vmem:[%s1353_s1 + $0x98] sm:$0xff] %v594_v10  ;;  %v600_v13 = vld [vmem:[%s1352_s0 + $0x2e8] sm:$0xff]  ;;  %597 = vst [vmem:[%s1353_s1 + $0x258] sm:$0xff] %v596_v11  ;;  %v602_v14 = vld [vmem:[%s1352_s0 + $0x198] sm:$0xff] }
  0x28   :  { %599 = vst [vmem:[%s1353_s1 + $0x108] sm:$0xff] %v598_v12  ;;  %601 = vst [vmem:[%s1353_s1 + $0x2c8] sm:$0xff] %v600_v13  ;;  %v604_v15 = vld [vmem:[%s1352_s0 + $0x358] sm:$0xff]  ;;  %v610_v18 = vld [vmem:[%s1352_s0 + $0xa8] sm:$0xff] }
  0x29   :  { %v606_v16 = vld [vmem:[%s1352_s0 + $0x38] sm:$0xff]  ;;  %603 = vst [vmem:[%s1353_s1 + $0x178] sm:$0xff] %v602_v14  ;;  %605 = vst [vmem:[%s1353_s1 + $0x338] sm:$0xff] %v604_v15  ;;  %v612_v19 = vld [vmem:[%s1352_s0 + $0x268] sm:$0xff] }
  0x2a   :  { %607 = vst [vmem:[%s1353_s1 + $0x38] sm:$0xff] %v606_v16  ;;  %v608_v17 = vld [vmem:[%s1352_s0 + $0x1f8] sm:$0xff]  ;;  %611 = vst [vmem:[%s1353_s1 + $0xa8] sm:$0xff] %v610_v18  ;;  %v618_v22 = vld [vmem:[%s1352_s0 + $0x188] sm:$0xff] }
  0x2b   :  { %609 = vst [vmem:[%s1353_s1 + $0x1f8] sm:$0xff] %v608_v17  ;;  %613 = vst [vmem:[%s1353_s1 + $0x268] sm:$0xff] %v612_v19  ;;  %v614_v20 = vld [vmem:[%s1352_s0 + $0x118] sm:$0xff]  ;;  %v620_v23 = vld [vmem:[%s1352_s0 + $0x348] sm:$0xff] }
  0x2c   :  { %v616_v21 = vld [vmem:[%s1352_s0 + $0x2d8] sm:$0xff]  ;;  %615 = vst [vmem:[%s1353_s1 + $0x118] sm:$0xff] %v614_v20  ;;  %619 = vst [vmem:[%s1353_s1 + $0x188] sm:$0xff] %v618_v22  ;;  %v622_v24 = vld [vmem:[%s1352_s0 + $0x28] sm:$0xff] }
  0x2d   :  { %617 = vst [vmem:[%s1353_s1 + $0x2d8] sm:$0xff] %v616_v21  ;;  %v624_v25 = vld [vmem:[%s1352_s0 + $0x1e8] sm:$0xff]  ;;  %621 = vst [vmem:[%s1353_s1 + $0x348] sm:$0xff] %v620_v23  ;;  %v626_v26 = vld [vmem:[%s1352_s0 + $0x98] sm:$0xff] }
  0x2e   :  { %623 = vst [vmem:[%s1353_s1 + $0x48] sm:$0xff] %v622_v24  ;;  %625 = vst [vmem:[%s1353_s1 + $0x208] sm:$0xff] %v624_v25  ;;  %v628_v27 = vld [vmem:[%s1352_s0 + $0x258] sm:$0xff]  ;;  %v630_v28 = vld [vmem:[%s1352_s0 + $0x108] sm:$0xff] }
  0x2f   :  { %627 = vst [vmem:[%s1353_s1 + $0xb8] sm:$0xff] %v626_v26  ;;  %629 = vst [vmem:[%s1353_s1 + $0x278] sm:$0xff] %v628_v27  ;;  %v632_v29 = vld [vmem:[%s1352_s0 + $0x2c8] sm:$0xff]  ;;  %v634_v30 = vld [vmem:[%s1352_s0 + $0x178] sm:$0xff] }
  0x30   :  { %631 = vst [vmem:[%s1353_s1 + $0x128] sm:$0xff] %v630_v28  ;;  %v636_v31 = vld [vmem:[%s1352_s0 + $0x338] sm:$0xff]  ;;  %633 = vst [vmem:[%s1353_s1 + $0x2e8] sm:$0xff] %v632_v29  ;;  %v642_v34 = vld [vmem:[%s1352_s0 + $0x88] sm:$0xff] }
  0x31   :  { %635 = vst [vmem:[%s1353_s1 + $0x198] sm:$0xff] %v634_v30  ;;  %637 = vst [vmem:[%s1353_s1 + $0x358] sm:$0xff] %v636_v31  ;;  %v638_v32 = vld [vmem:[%s1352_s0 + $0x18] sm:$0xff]  ;;  %v644_v35 = vld [vmem:[%s1352_s0 + $0x248] sm:$0xff] }
  0x32   :  { %v640_v33 = vld [vmem:[%s1352_s0 + $0x1d8] sm:$0xff]  ;;  %639 = vst [vmem:[%s1353_s1 + $0x58] sm:$0xff] %v638_v32  ;;  %643 = vst [vmem:[%s1353_s1 + $0xc8] sm:$0xff] %v642_v34  ;;  %v650_v38 = vld [vmem:[%s1352_s0 + $0x168] sm:$0xff] }
  0x33   :  { %641 = vst [vmem:[%s1353_s1 + $0x218] sm:$0xff] %v640_v33  ;;  %v646_v36 = vld [vmem:[%s1352_s0 + $0xf8] sm:$0xff]  ;;  %645 = vst [vmem:[%s1353_s1 + $0x288] sm:$0xff] %v644_v35  ;;  %v652_v39 = vld [vmem:[%s1352_s0 + $0x328] sm:$0xff] }
  0x34   :  { %v648_v37 = vld [vmem:[%s1352_s0 + $0x2b8] sm:$0xff]  ;;  %647 = vst [vmem:[%s1353_s1 + $0x138] sm:$0xff] %v646_v36  ;;  %v654_v40 = vld [vmem:[%s1352_s0 + $0x8] sm:$0xff]  ;;  %651 = vst [vmem:[%s1353_s1 + $0x1a8] sm:$0xff] %v650_v38 }
  0x35   :  { %649 = vst [vmem:[%s1353_s1 + $0x2f8] sm:$0xff] %v648_v37  ;;  %653 = vst [vmem:[%s1353_s1 + $0x368] sm:$0xff] %v652_v39  ;;  %v656_v41 = vld [vmem:[%s1352_s0 + $0x1c8] sm:$0xff]  ;;  %v658_v42 = vld [vmem:[%s1352_s0 + $0x78] sm:$0xff] }
  0x36   :  { %655 = vst [vmem:[%s1353_s1 + $0x68] sm:$0xff] %v654_v40  ;;  %v660_v43 = vld [vmem:[%s1352_s0 + $0x238] sm:$0xff]  ;;  %657 = vst [vmem:[%s1353_s1 + $0x228] sm:$0xff] %v656_v41  ;;  %v662_v44 = vld [vmem:[%s1352_s0 + $0xe8] sm:$0xff] }
  0x37   :  { %659 = vst [vmem:[%s1353_s1 + $0xd8] sm:$0xff] %v658_v42  ;;  %661 = vst [vmem:[%s1353_s1 + $0x298] sm:$0xff] %v660_v43  ;;  %v664_v45 = vld [vmem:[%s1352_s0 + $0x2a8] sm:$0xff]  ;;  %v666_v46 = vld [vmem:[%s1352_s0 + $0x158] sm:$0xff] }
  0x38   :  { %663 = vst [vmem:[%s1353_s1 + $0x148] sm:$0xff] %v662_v44  ;;  %665 = vst [vmem:[%s1353_s1 + $0x308] sm:$0xff] %v664_v45  ;;  %v668_v47 = vld [vmem:[%s1352_s0 + $0x318] sm:$0xff] }
  0x39   :  { %667 = vst [vmem:[%s1353_s1 + $0x1b8] sm:$0xff] %v666_v46  ;;  %669 = vst [vmem:[%s1353_s1 + $0x378] sm:$0xff] %v668_v47 }

// kernel: fno_forward.8
= control target key start
LH: loop header
LB: loop body
LE: loop exit
PB: predicated region body
PF: predicated region fallthrough
CT: control target
= control target key end

     0   :  { %s1667_s15 = smov 0   ;;  %s1669_s16 = smov 0   ;;  %s1983_s0 = inlined_call_operand.vmem [shape: f32[2,4,4096], index: 0, kind: input, shape index: {}]   ;;  %s1984_s1 = inlined_call_operand.vmem [shape: f32[2,4,4096], index: 1, kind: input, shape index: {}]   ;;  %s1985_s2 = inlined_call_operand.vmem [shape: bf16[4,4], index: 2, kind: input, shape index: {}]   ;;  %s1986_s3 = inlined_call_operand.vmem [shape: f32[4,1], index: 3, kind: input, shape index: {}]   ;;  %s1987_s4 = inlined_call_operand.vmem [shape: f32[2,4,4096], index: 4, kind: output, shape index: {}]  }
   0x1   :  { %s1671_s17 = smov 0  }
   0x2 LB: > { %s26_s18 = sadd.s32 1, %s1635_s16  ;;  %p1499_p0 = scmp.ge.s32.totalorder %s1639_s17, 1  ;;  %s1639_s17 = sphi %s1671_s17, %s14_s17   ;;  %s1635_s16 = sphi %s1669_s16, %s1989_s16   ;;  %s1631_s15 = sphi %s1667_s15, %s1988_s15  }
   0x3   : > { %p28_p1 = scmp.ge.s32.totalorder %s26_s18, 2  ;;  %p200_p2 = scmp.lt.s32.totalorder %s1639_s17, 3 }
   0x5   : > { %s1991_s18 = smov (%p28_p1, %s26_s18), 0  ;;  %p201_p3 = pnand %p1499_p0, %p200_p2 }
   0x6   : > { %p244_p4 = scmp.lt.s32.totalorder (!%p201_p3), %s1631_s15, 1 }
   0x7   : > { %204 = sbr.rel (%p201_p3) target bundleno = 313 (0x139), region = 36 }
   0xc   : > { %v1641_v0 = vmov 0   ;;  %v371_v1 = vld [vmem:[%s1986_s3] sm:$0xf]  ;;  %s1993_s15 = smov (!%p244_p4, %s1631_s15), 1  ;;  %vm381_vm0 = vcmask 1041408   ;;  %vm377_vm1 = vcmask 31744  }
   0xd   : > { %510 = vmatprep.mubr.bf16.mxu0 %v1641_v0  ;;  %551 = vmatprep.mubr.bf16.mxu1 %v1641_v0  ;;  %s1691_s21 = sshll.u32 %s1993_s15, 7  ;;  %v1712_v24 = vld [vmem:[%s1985_s2] sm:$0x3] }
   0xe   : > { %1568 = vset.pattern.permute.xlu0 %v1641_v0  ;;  %s1697_s24 = scalar_lea.vmem %s1983_s0, %s1691_s21  ;;  %s1804_s29 = scalar_lea.vmem %s1984_s1, %s1691_s21 }
   0xf   : > { %374 = vperm.xlu0 %1568, %v371_v1   ;;  %v275_v2 = vld [vmem:[%s1697_s24] sm:$0xff]  ;;  %v276_v3 = vld [vmem:[%s1697_s24 + $0x8] sm:$0xff]  ;;  %v277_v4 = vld [vmem:[%s1697_s24 + $0x10] sm:$0xff]  ;;  %s1882_s6 = scalar_lea.vmem %s1987_s4, %s1691_s21 }
  0x10   : > { %v307_v5 = vcombine.high %v275_v2, %v275_v2  ;;  %v308_v6 = vcombine.high %v276_v3, %v276_v3  ;;  %v339_v7 = vpack.c.bf16 %v275_v2, %v275_v2  ;;  %v341_v8 = vpack.c.bf16 %v276_v3, %v276_v3  ;;  %v278_v9 = vld [vmem:[%s1697_s24 + $0x18] sm:$0xff]  ;;  %v279_v14 = vld [vmem:[%s1697_s24 + $0x20] sm:$0xff]  ;;  %v280_v15 = vld [vmem:[%s1697_s24 + $0x28] sm:$0xff] }
  0x11   : > { %v309_v10 = vcombine.high %v277_v4, %v277_v4  ;;  %v310_v11 = vcombine.high %v278_v9, %v278_v9  ;;  %v343_v12 = vpack.c.bf16 %v277_v4, %v277_v4  ;;  %v345_v13 = vpack.c.bf16 %v278_v9, %v278_v9  ;;  %v281_v29 = vld [vmem:[%s1697_s24 + $0x30] sm:$0xff]  ;;  %v282_v30 = vld [vmem:[%s1697_s24 + $0x38] sm:$0xff]  ;;  %v283_v39 = vld [vmem:[%s1697_s24 + $0x40] sm:$0xff] }
  0x12   : > { %v340_v16 = vpack.c.bf16 %v307_v5, %v307_v5  ;;  %v342_v17 = vpack.c.bf16 %v308_v6, %v308_v6  ;;  %v383_v18 = vsel %vm381_vm0, %v339_v7, 0  ;;  %v389_v19 = vsel %vm381_vm0, %v341_v8, 0  ;;  %v284_v40 = vld [vmem:[%s1697_s24 + $0x48] sm:$0xff]  ;;  %v285_v49 = vld [vmem:[%s1697_s24 + $0x50] sm:$0xff]  ;;  %v286_v50 = vld [vmem:[%s1697_s24 + $0x58] sm:$0xff] }
  0x13   : > { %v344_v20 = vpack.c.bf16 %v309_v10, %v309_v10  ;;  %v346_v21 = vpack.c.bf16 %v310_v11, %v310_v11  ;;  %v311_v22 = vcombine.high %v279_v14, %v279_v14  ;;  %v312_v23 = vcombine.high %v280_v15, %v280_v15  ;;  %v287_v59 = vld [vmem:[%s1697_s24 + $0x60] sm:$0xff]  ;;  %v288_v60 = vld [vmem:[%s1697_s24 + $0x68] sm:$0xff]  ;;  %v289_v6 = vld [vmem:[%s1697_s24 + $0x70] sm:$0xff] }
  0x14   : > { %1506 = vmatprep.subr.msk.bf16.mxu0 %vm381_vm0, %v340_v16  ;;  %1508 = vmatprep.subr.msk.bf16.mxu1 %vm381_vm0, %v342_v17  ;;  %v395_v25 = vsel %vm381_vm0, %v343_v12, 0  ;;  %v401_v26 = vsel %vm381_vm0, %v345_v13, 0  ;;  %v347_v31 = vpack.c.bf16 %v279_v14, %v279_v14  ;;  %v349_v32 = vpack.c.bf16 %v280_v15, %v280_v15  ;;  %v290_v7 = vld [vmem:[%s1697_s24 + $0x78] sm:$0xff] }
  0x15   : > { %493 = vmatpush1.bf16.msra.mxu0 %v383_v18  ;;  %534 = vmatpush1.bf16.msra.mxu1 %v389_v19  ;;  %v348_v27 = vpack.c.bf16 %v311_v22, %v311_v22  ;;  %v350_v28 = vpack.c.bf16 %v312_v23, %v312_v23  ;;  %v313_v33 = vcombine.high %v281_v29, %v281_v29 }
  0x16   : > { %1510 = vmatprep.subr.msk.bf16.mxu0 %vm381_vm0, %v344_v20  ;;  %1512 = vmatprep.subr.msk.bf16.mxu1 %vm381_vm0, %v346_v21  ;;  %v314_v34 = vcombine.high %v282_v30, %v282_v30  ;;  %v407_v35 = vsel %vm381_vm0, %v347_v31, 0  ;;  %v413_v36 = vsel %vm381_vm0, %v349_v32, 0  ;;  %v351_v41 = vpack.c.bf16 %v281_v29, %v281_v29  ;;  %v1135_v29 = vld [vmem:[%s1804_s29 + $0x8] sm:$0xff] }
  0x17   : > { %v352_v37 = vpack.c.bf16 %v313_v33, %v313_v33  ;;  %v353_v42 = vpack.c.bf16 %v282_v30, %v282_v30  ;;  %v315_v43 = vcombine.high %v283_v39, %v283_v39  ;;  %v316_v44 = vcombine.high %v284_v40, %v284_v40 }
  0x18   : > { %1507 = vmatmul.mubr.msk.bf16.vlgmr.msra.gmra.mxu0 %vm377_vm1, %v1712_v24  ;;  %1509 = vmatmul.mubr.msk.bf16.vlgmr.msra.gmra.mxu1 %vm377_vm1, %v1712_v24  ;;  %v354_v38 = vpack.c.bf16 %v314_v34, %v314_v34  ;;  %v419_v45 = vsel %vm381_vm0, %v351_v41, 0  ;;  %v355_v51 = vpack.c.bf16 %v283_v39, %v283_v39  ;;  %v357_v52 = vpack.c.bf16 %v284_v40, %v284_v40 }
  0x19   : > { %575 = vmatpush1.bf16.msra.mxu0 %v395_v25  ;;  %616 = vmatpush1.bf16.msra.mxu1 %v401_v26  ;;  %v425_v46 = vsel %vm381_vm0, %v353_v42, 0  ;;  %v356_v47 = vpack.c.bf16 %v315_v43, %v315_v43  ;;  %v358_v48 = vpack.c.bf16 %v316_v44, %v316_v44  ;;  %v317_v53 = vcombine.high %v285_v49, %v285_v49 }
  0x1a   : > { %592 = vmatprep.mubr.bf16.mxu0 %v1641_v0  ;;  %633 = vmatprep.mubr.bf16.mxu1 %v1641_v0  ;;  %v318_v54 = vcombine.high %v286_v50, %v286_v50  ;;  %v431_v55 = vsel %vm381_vm0, %v355_v51, 0  ;;  %v437_v56 = vsel %vm381_vm0, %v357_v52, 0  ;;  %v359_v61 = vpack.c.bf16 %v285_v49, %v285_v49  ;;  %v1137_v51 = vld [vmem:[%s1804_s29 + $0x18] sm:$0xff] }
  0x1b   : > { %1514 = vmatprep.subr.msk.bf16.mxu0 %vm381_vm0, %v348_v27  ;;  %1516 = vmatprep.subr.msk.bf16.mxu1 %vm381_vm0, %v350_v28  ;;  %v360_v57 = vpack.c.bf16 %v317_v53, %v317_v53  ;;  %v361_v62 = vpack.c.bf16 %v286_v50, %v286_v50  ;;  %v319_v63 = vcombine.high %v287_v59, %v287_v59  ;;  %v1134_v28 = vld [vmem:[%s1804_s29] sm:$0xff]  ;;  %v1136_v50 = vld [vmem:[%s1804_s29 + $0x10] sm:$0xff] }
  0x1c   : > { %v362_v58 = vpack.c.bf16 %v318_v54, %v318_v54  ;;  %v320_v1 = vcombine.high %v288_v60, %v288_v60  ;;  %v443_v2 = vsel %vm381_vm0, %v359_v61, 0  ;;  %v363_v8 = vpack.c.bf16 %v287_v59, %v287_v59 }
  0x1d   : > { %v449_v3 = vsel %vm381_vm0, %v361_v62, 0  ;;  %v364_v4 = vpack.c.bf16 %v319_v63, %v319_v63  ;;  %v365_v9 = vpack.c.bf16 %v288_v60, %v288_v60  ;;  %v321_v10 = vcombine.high %v289_v6, %v289_v6 }
  0x1e   : > { %v366_v5 = vpack.c.bf16 %v320_v1, %v320_v1  ;;  %v322_v11 = vcombine.high %v290_v7, %v290_v7  ;;  %v455_v12 = vsel %vm381_vm0, %v363_v8, 0  ;;  %v367_v16 = vpack.c.bf16 %v289_v6, %v289_v6 }
  0x1f   : > { %v461_v13 = vsel %vm381_vm0, %v365_v9, 0  ;;  %v368_v14 = vpack.c.bf16 %v321_v10, %v321_v10  ;;  %v369_v17 = vpack.c.bf16 %v290_v7, %v290_v7 }
  0x20   : > { %1511 = vmatmul.mubr.msk.bf16.vlgmr.msra.gmra.mxu0 %vm377_vm1, %v1712_v24  ;;  %1513 = vmatmul.mubr.msk.bf16.vlgmr.msra.gmra.mxu1 %vm377_vm1, %v1712_v24  ;;  %v370_v15 = vpack.c.bf16 %v322_v11, %v322_v11  ;;  %v467_v18 = vsel %vm381_vm0, %v367_v16, 0 }
  0x21   : > { %657 = vmatpush1.bf16.msra.mxu0 %v407_v35  ;;  %698 = vmatpush1.bf16.msra.mxu1 %v413_v36  ;;  %v473_v19 = vsel %vm381_vm0, %v369_v17, 0 }
  0x22   : > { %674 = vmatprep.mubr.bf16.mxu0 %v1641_v0  ;;  %715 = vmatprep.mubr.bf16.mxu1 %v1641_v0 }
  0x23   : > { %1518 = vmatprep.subr.msk.bf16.mxu0 %vm381_vm0, %v352_v37  ;;  %1520 = vmatprep.subr.msk.bf16.mxu1 %vm381_vm0, %v354_v38 }
  0x28   : > { %1515 = vmatmul.mubr.msk.bf16.vlgmr.msra.gmra.mxu0 %vm377_vm1, %v1712_v24  ;;  %1517 = vmatmul.mubr.msk.bf16.vlgmr.msra.gmra.mxu1 %vm377_vm1, %v1712_v24 }
  0x29   : > { %739 = vmatpush1.bf16.msra.mxu0 %v419_v45  ;;  %780 = vmatpush1.bf16.msra.mxu1 %v425_v46 }
  0x2a   : > { %756 = vmatprep.mubr.bf16.mxu0 %v1641_v0  ;;  %797 = vmatprep.mubr.bf16.mxu1 %v1641_v0 }
  0x2b   : > { %1522 = vmatprep.subr.msk.bf16.mxu0 %vm381_vm0, %v356_v47  ;;  %1524 = vmatprep.subr.msk.bf16.mxu1 %vm381_vm0, %v358_v48 }
  0x30   : > { %1519 = vmatmul.mubr.msk.bf16.vlgmr.msra.gmra.mxu0 %vm377_vm1, %v1712_v24  ;;  %1521 = vmatmul.mubr.msk.bf16.vlgmr.msra.gmra.mxu1 %vm377_vm1, %v1712_v24 }
  0x31   : > { %821 = vmatpush1.bf16.msra.mxu0 %v431_v55  ;;  %862 = vmatpush1.bf16.msra.mxu1 %v437_v56 }
  0x32   : > { %838 = vmatprep.mubr.bf16.mxu0 %v1641_v0  ;;  %879 = vmatprep.mubr.bf16.mxu1 %v1641_v0 }
  0x33   : > { %1526 = vmatprep.subr.msk.bf16.mxu0 %vm381_vm0, %v360_v57  ;;  %1528 = vmatprep.subr.msk.bf16.mxu1 %vm381_vm0, %v362_v58 }
  0x38   : > { %1523 = vmatmul.mubr.msk.bf16.vlgmr.msra.gmra.mxu0 %vm377_vm1, %v1712_v24  ;;  %1525 = vmatmul.mubr.msk.bf16.vlgmr.msra.gmra.mxu1 %vm377_vm1, %v1712_v24 }
  0x39   : > { %903 = vmatpush1.bf16.msra.mxu0 %v443_v2  ;;  %944 = vmatpush1.bf16.msra.mxu1 %v449_v3 }
  0x3a   : > { %920 = vmatprep.mubr.bf16.mxu0 %v1641_v0  ;;  %961 = vmatprep.mubr.bf16.mxu1 %v1641_v0 }
  0x3b   : > { %1530 = vmatprep.subr.msk.bf16.mxu0 %vm381_vm0, %v364_v4  ;;  %1532 = vmatprep.subr.msk.bf16.mxu1 %vm381_vm0, %v366_v5 }
  0x40   : > { %1527 = vmatmul.mubr.msk.bf16.vlgmr.msra.gmra.mxu0 %vm377_vm1, %v1712_v24  ;;  %1529 = vmatmul.mubr.msk.bf16.vlgmr.msra.gmra.mxu1 %vm377_vm1, %v1712_v24 }
  0x41   : > { %985 = vmatpush1.bf16.msra.mxu0 %v455_v12  ;;  %1026 = vmatpush1.bf16.msra.mxu1 %v461_v13 }
  0x42   : > { %1002 = vmatprep.mubr.bf16.mxu0 %v1641_v0  ;;  %1043 = vmatprep.mubr.bf16.mxu1 %v1641_v0 }
  0x43   : > { %1534 = vmatprep.subr.msk.bf16.mxu0 %vm381_vm0, %v368_v14  ;;  %1536 = vmatprep.subr.msk.bf16.mxu1 %vm381_vm0, %v370_v15  ;;  %v1138_v14 = vld [vmem:[%s1804_s29 + $0x20] sm:$0xff] }
  0x48   : > { %1531 = vmatmul.mubr.msk.bf16.vlgmr.msra.gmra.mxu0 %vm377_vm1, %v1712_v24  ;;  %1533 = vmatmul.mubr.msk.bf16.vlgmr.msra.gmra.mxu1 %vm377_vm1, %v1712_v24 }
  0x49   : > { %1067 = vmatpush1.bf16.msra.mxu0 %v467_v18  ;;  %1108 = vmatpush1.bf16.msra.mxu1 %v473_v19 }
  0x4a   : > { %1084 = vmatprep.mubr.bf16.mxu0 %v1641_v0  ;;  %1125 = vmatprep.mubr.bf16.mxu1 %v1641_v0 }
  0x50   : > { %1535 = vmatmul.mubr.msk.bf16.vlgmr.msra.gmra.mxu0 %vm377_vm1, %v1712_v24  ;;  %1537 = vmatmul.mubr.msk.bf16.vlgmr.msra.gmra.mxu1 %vm377_vm1, %v1712_v24 }
  0x8a   : > { %v1798_v20 = vpop.permute.xlu0 %374 }
  0xd8   : > { %v512_v21 = vpop.f32.mrf.mxu0  ;;  %v553_v22 = vpop.f32.mrf.mxu1 }
  0xd9   : > { %v513_v0 = vadd.f32 %v512_v21, %v1798_v20  ;;  %v554_v27 = vadd.f32 %v553_v22, %v1798_v20  ;;  %v1139_v22 = vld [vmem:[%s1804_s29 + $0x28] sm:$0xff] }
  0xda   : > { %v514_v23 = vpop.f32.mrf.mxu0  ;;  %v555_v25 = vpop.f32.mrf.mxu1 }
  0xdb   : > { %v515_v26 = vadd.f32 %v514_v23, %v1798_v20  ;;  %v556_v24 = vadd.f32 %v555_v25, %v1798_v20 }
  0xdc   : > { %v516_v30 = vpop.f32.mrf.mxu0  ;;  %v557_v31 = vpop.f32.mrf.mxu1 }
  0xdd   : > { %v1182_v32 = vcombine.low %v513_v0, %v515_v26  ;;  %v1183_v33 = vcombine.low %v554_v27, %v556_v24 }
  0xde   : > { %v517_v34 = vpop.f32.mrf.mxu0  ;;  %v558_v35 = vpop.f32.mrf.mxu1 }
  0xdf   : > { %v1812_v36 = vadd.f32 %v1182_v32, %v1134_v28  ;;  %v1814_v37 = vadd.f32 %v1183_v33, %v1135_v29 }
  0xe0   : > { %v594_v38 = vpop.f32.mrf.mxu0  ;;  %v635_v39 = vpop.f32.mrf.mxu1 }
  0xe1   : > { %v1230_v40 = vmul.f32 %v1812_v36, %v1812_v36  ;;  %v1231_v41 = vmul.f32 %v1814_v37, %v1814_v37  ;;  %v595_v42 = vadd.f32 %v594_v38, %v1798_v20  ;;  %v636_v43 = vadd.f32 %v635_v39, %v1798_v20 }
  0xe2   : > { %v596_v44 = vpop.f32.mrf.mxu0  ;;  %v637_v45 = vpop.f32.mrf.mxu1 }
  0xe3   : > { %v1246_v46 = vmul.f32 %v1230_v40, %v1812_v36  ;;  %v1247_v47 = vmul.f32 %v1231_v41, %v1814_v37  ;;  %v597_v48 = vadd.f32 %v596_v44, %v1798_v20  ;;  %v638_v49 = vadd.f32 %v637_v45, %v1798_v20  ;;  %v1140_v45 = vld [vmem:[%s1804_s29 + $0x30] sm:$0xff] }
  0xe4   : > { %v598_v52 = vpop.f32.mrf.mxu0  ;;  %v639_v53 = vpop.f32.mrf.mxu1 }
  0xe5   : > { %v1262_v54 = vmul.f32 0.044715, %v1246_v46  ;;  %v1263_v55 = vmul.f32 0.044715, %v1247_v47  ;;  %v1184_v56 = vcombine.low %v595_v42, %v597_v48  ;;  %v1185_v57 = vcombine.low %v636_v43, %v638_v49  ;;  %v1141_v46 = vld [vmem:[%s1804_s29 + $0x38] sm:$0xff] }
  0xe6   : > { %v599_v58 = vpop.f32.mrf.mxu0  ;;  %v640_v59 = vpop.f32.mrf.mxu1 }
  0xe7   : > { %v1278_v60 = vadd.f32 %v1262_v54, %v1812_v36  ;;  %v1279_v61 = vadd.f32 %v1263_v55, %v1814_v37  ;;  %v1830_v62 = vadd.f32 %v1184_v56, %v1136_v50  ;;  %v1832_v63 = vadd.f32 %v1185_v57, %v1137_v51 }
  0xe8   : > { %v676_v1 = vpop.f32.mrf.mxu0  ;;  %v717_v2 = vpop.f32.mrf.mxu1 }
  0xe9   : > { %v1294_v3 = vmul.f32 0.7978846, %v1278_v60  ;;  %v1295_v4 = vmul.f32 0.7978846, %v1279_v61  ;;  %v1232_v5 = vmul.f32 %v1830_v62, %v1830_v62  ;;  %v1233_v6 = vmul.f32 %v1832_v63, %v1832_v63 }
  0xea   : > { %v677_v7 = vadd.f32 %v676_v1, %v1798_v20  ;;  %v678_v8 = vpop.f32.mrf.mxu0  ;;  %v719_v9 = vpop.f32.mrf.mxu1  ;;  %v718_v13 = vadd.f32 %v717_v2, %v1798_v20 }
  0xeb   : > { %1585 = vtanh.f32 %v1294_v3  ;;  %v1248_v10 = vmul.f32 %v1232_v5, %v1830_v62  ;;  %v1249_v11 = vmul.f32 %v1233_v6, %v1832_v63  ;;  %v679_v12 = vadd.f32 %v678_v8, %v1798_v20 }
  0xec   : > { %1587 = vtanh.f32 %v1295_v4  ;;  %v720_v15 = vadd.f32 %v719_v9, %v1798_v20  ;;  %v680_v16 = vpop.f32.mrf.mxu0  ;;  %v721_v17 = vpop.f32.mrf.mxu1 }
  0xed   : > { %v1264_v18 = vmul.f32 0.044715, %v1248_v10  ;;  %v1265_v19 = vmul.f32 0.044715, %v1249_v11  ;;  %v1186_v21 = vcombine.low %v677_v7, %v679_v12 }
  0xee   : > { %v1187_v23 = vcombine.low %v718_v13, %v720_v15  ;;  %v681_v25 = vpop.f32.mrf.mxu0  ;;  %v722_v0 = vpop.f32.mrf.mxu1 }
  0xef   : > { %v1280_v26 = vadd.f32 %v1264_v18, %v1830_v62  ;;  %v1281_v27 = vadd.f32 %v1265_v19, %v1832_v63  ;;  %v1848_v24 = vadd.f32 %v1186_v21, %v1138_v14  ;;  %v1142_v25 = vld [vmem:[%s1804_s29 + $0x40] sm:$0xff]  ;;  %v1143_v0 = vld [vmem:[%s1804_s29 + $0x48] sm:$0xff] }
  0xf0   : > { %v1850_v28 = vadd.f32 %v1187_v23, %v1139_v22  ;;  %v758_v29 = vpop.f32.mrf.mxu0  ;;  %v799_v30 = vpop.f32.mrf.mxu1 }
  0xf1   : > { %v1296_v31 = vmul.f32 0.7978846, %v1280_v26  ;;  %v1297_v32 = vmul.f32 0.7978846, %v1281_v27  ;;  %v1234_v33 = vmul.f32 %v1848_v24, %v1848_v24  ;;  %v759_v35 = vadd.f32 %v758_v29, %v1798_v20 }
  0xf2   : > { %v1235_v34 = vmul.f32 %v1850_v28, %v1850_v28  ;;  %v800_v38 = vadd.f32 %v799_v30, %v1798_v20  ;;  %v760_v39 = vpop.f32.mrf.mxu0  ;;  %v801_v40 = vpop.f32.mrf.mxu1 }
  0xf3   : > { %1589 = vtanh.f32 %v1296_v31  ;;  %v1250_v41 = vmul.f32 %v1234_v33, %v1848_v24  ;;  %v761_v42 = vadd.f32 %v760_v39, %v1798_v20  ;;  %v802_v43 = vadd.f32 %v801_v40, %v1798_v20 }
  0xf4   : > { %1591 = vtanh.f32 %v1297_v32  ;;  %v1251_v44 = vmul.f32 %v1235_v34, %v1850_v28  ;;  %v762_v47 = vpop.f32.mrf.mxu0  ;;  %v803_v48 = vpop.f32.mrf.mxu1 }
  0xf5   : > { %v1266_v49 = vmul.f32 0.044715, %v1250_v41  ;;  %v1188_v50 = vcombine.low %v759_v35, %v761_v42  ;;  %v1189_v51 = vcombine.low %v800_v38, %v802_v43 }
  0xf6   : > { %v1267_v52 = vmul.f32 0.044715, %v1251_v44  ;;  %v763_v53 = vpop.f32.mrf.mxu0  ;;  %v804_v54 = vpop.f32.mrf.mxu1 }
  0xf7   : > { %v1282_v55 = vadd.f32 %v1266_v49, %v1848_v24  ;;  %v1865_v56 = vadd.f32 %v1188_v50, %v1140_v45  ;;  %v1867_v57 = vadd.f32 %v1189_v51, %v1141_v46 }
  0xf8   : > { %v1586_v58 = vpop.eup %1585  ;;  %v1283_v59 = vadd.f32 %v1267_v52, %v1850_v28  ;;  %v840_v60 = vpop.f32.mrf.mxu0 }
  0xf9   : > { %v881_v61 = vpop.f32.mrf.mxu1  ;;  %v1588_v1 = vpop.eup %1587  ;;  %v1326_v2 = vadd.f32 1.0, %v1586_v58  ;;  %v1298_v3 = vmul.f32 0.7978846, %v1282_v55  ;;  %v1236_v4 = vmul.f32 %v1865_v56, %v1865_v56  ;;  %v1237_v5 = vmul.f32 %v1867_v57, %v1867_v57  ;;  %v1144_v58 = vld [vmem:[%s1804_s29 + $0x50] sm:$0xff] }
  0xfa   : > { %v1327_v6 = vadd.f32 1.0, %v1588_v1  ;;  %v1299_v7 = vmul.f32 0.7978846, %v1283_v59  ;;  %v841_v8 = vadd.f32 %v840_v60, %v1798_v20  ;;  %v882_v9 = vadd.f32 %v881_v61, %v1798_v20  ;;  %v842_v10 = vpop.f32.mrf.mxu0  ;;  %v1145_v59 = vld [vmem:[%s1804_s29 + $0x58] sm:$0xff] }
  0xfb   : > { %v883_v11 = vpop.f32.mrf.mxu1  ;;  %v1342_v12 = vmul.f32 0.5, %v1326_v2  ;;  %1593 = vtanh.f32 %v1298_v3  ;;  %v1252_v13 = vmul.f32 %v1236_v4, %v1865_v56  ;;  %v1253_v14 = vmul.f32 %v1237_v5, %v1867_v57 }
  0xfc   : > { %v1343_v15 = vmul.f32 0.5, %v1327_v6  ;;  %1595 = vtanh.f32 %v1299_v7  ;;  %v843_v16 = vadd.f32 %v842_v10, %v1798_v20  ;;  %v884_v17 = vadd.f32 %v883_v11, %v1798_v20  ;;  %v844_v18 = vpop.f32.mrf.mxu0 }
  0xfd   : > { %v885_v19 = vpop.f32.mrf.mxu1  ;;  %v1358_v21 = vmul.f32 %v1342_v12, %v1812_v36  ;;  %v1268_v22 = vmul.f32 0.044715, %v1252_v13  ;;  %v1269_v23 = vmul.f32 0.044715, %v1253_v14 }
  0xfe   : > { %v1359_v26 = vmul.f32 %v1343_v15, %v1814_v37  ;;  %v1190_v27 = vcombine.low %v841_v8, %v843_v16  ;;  %v1191_v29 = vcombine.low %v882_v9, %v884_v17  ;;  %v845_v30 = vpop.f32.mrf.mxu0 }
  0xff   : > { %v886_v31 = vpop.f32.mrf.mxu1  ;;  %1374 = vst [vmem:[%s1882_s6] sm:$0xff] %v1358_v21  ;;  %v1284_v32 = vadd.f32 %v1268_v22, %v1865_v56  ;;  %v1285_v33 = vadd.f32 %v1269_v23, %v1867_v57 }
 0x100   : > { %v1590_v34 = vpop.eup %1589  ;;  %1375 = vst [vmem:[%s1882_s6 + $0x8] sm:$0xff] %v1359_v26  ;;  %v1894_v35 = vadd.f32 %v1190_v27, %v1142_v25  ;;  %v1896_v36 = vadd.f32 %v1191_v29, %v1143_v0  ;;  %v922_v38 = vpop.f32.mrf.mxu0 }
 0x101   : > { %v963_v39 = vpop.f32.mrf.mxu1  ;;  %v1592_v40 = vpop.eup %1591  ;;  %v1328_v41 = vadd.f32 1.0, %v1590_v34  ;;  %v1300_v37 = vmul.f32 0.7978846, %v1284_v32  ;;  %v1301_v42 = vmul.f32 0.7978846, %v1285_v33  ;;  %v923_v43 = vadd.f32 %v922_v38, %v1798_v20 }
 0x102   : > { %v1329_v44 = vadd.f32 1.0, %v1592_v40  ;;  %v1238_v45 = vmul.f32 %v1894_v35, %v1894_v35  ;;  %v1239_v46 = vmul.f32 %v1896_v36, %v1896_v36  ;;  %v964_v47 = vadd.f32 %v963_v39, %v1798_v20  ;;  %v924_v48 = vpop.f32.mrf.mxu0 }
 0x103   : > { %v965_v49 = vpop.f32.mrf.mxu1  ;;  %v1344_v50 = vmul.f32 0.5, %v1328_v41  ;;  %1597 = vtanh.f32 %v1300_v37  ;;  %v925_v51 = vadd.f32 %v924_v48, %v1798_v20  ;;  %v1146_v41 = vld [vmem:[%s1804_s29 + $0x60] sm:$0xff]  ;;  %v1147_v37 = vld [vmem:[%s1804_s29 + $0x68] sm:$0xff] }
 0x104   : > { %v966_v52 = vadd.f32 %v965_v49, %v1798_v20  ;;  %v1345_v53 = vmul.f32 0.5, %v1329_v44  ;;  %1599 = vtanh.f32 %v1301_v42  ;;  %v1254_v54 = vmul.f32 %v1238_v45, %v1894_v35  ;;  %v926_v60 = vpop.f32.mrf.mxu0 }
 0x105   : > { %v1255_v55 = vmul.f32 %v1239_v46, %v1896_v36  ;;  %v967_v61 = vpop.f32.mrf.mxu1  ;;  %v1360_v1 = vmul.f32 %v1344_v50, %v1830_v62  ;;  %v1192_v2 = vcombine.low %v923_v43, %v925_v51 }
 0x106   : > { %v1193_v3 = vcombine.low %v964_v47, %v966_v52  ;;  %v1361_v4 = vmul.f32 %v1345_v53, %v1832_v63  ;;  %v1270_v5 = vmul.f32 0.044715, %v1254_v54  ;;  %v927_v7 = vpop.f32.mrf.mxu0 }
 0x107   : > { %v1271_v6 = vmul.f32 0.044715, %v1255_v55  ;;  %v968_v8 = vpop.f32.mrf.mxu1  ;;  %1376 = vst [vmem:[%s1882_s6 + $0x10] sm:$0xff] %v1360_v1  ;;  %v1913_v9 = vadd.f32 %v1192_v2, %v1144_v58 }
 0x108   : > { %v1915_v10 = vadd.f32 %v1193_v3, %v1145_v59  ;;  %v1594_v11 = vpop.eup %1593  ;;  %1377 = vst [vmem:[%s1882_s6 + $0x18] sm:$0xff] %v1361_v4  ;;  %v1286_v12 = vadd.f32 %v1270_v5, %v1894_v35  ;;  %v1004_v62 = vpop.f32.mrf.mxu0 }
 0x109   : > { %v1287_v13 = vadd.f32 %v1271_v6, %v1896_v36  ;;  %v1045_v14 = vpop.f32.mrf.mxu1  ;;  %v1596_v15 = vpop.eup %1595  ;;  %v1330_v16 = vadd.f32 1.0, %v1594_v11  ;;  %v1240_v63 = vmul.f32 %v1913_v9, %v1913_v9  ;;  %v1005_v22 = vadd.f32 %v1004_v62, %v1798_v20 }
 0x10a   : > { %v1241_v17 = vmul.f32 %v1915_v10, %v1915_v10  ;;  %v1331_v18 = vadd.f32 1.0, %v1596_v15  ;;  %v1302_v19 = vmul.f32 0.7978846, %v1286_v12  ;;  %v1006_v23 = vpop.f32.mrf.mxu0  ;;  %v1046_v31 = vadd.f32 %v1045_v14, %v1798_v20  ;;  %v1148_v12 = vld [vmem:[%s1804_s29 + $0x70] sm:$0xff] }
 0x10b   : > { %v1303_v21 = vmul.f32 0.7978846, %v1287_v13  ;;  %v1047_v25 = vpop.f32.mrf.mxu1  ;;  %v1346_v0 = vmul.f32 0.5, %v1330_v16  ;;  %v1256_v26 = vmul.f32 %v1240_v63, %v1913_v9  ;;  %v1007_v29 = vadd.f32 %v1006_v23, %v1798_v20  ;;  %v1149_v13 = vld [vmem:[%s1804_s29 + $0x78] sm:$0xff] }
 0x10c   : > { %v1257_v27 = vmul.f32 %v1241_v17, %v1915_v10  ;;  %v1347_v30 = vmul.f32 0.5, %v1331_v18  ;;  %1601 = vtanh.f32 %v1302_v19  ;;  %v1048_v32 = vadd.f32 %v1047_v25, %v1798_v20  ;;  %v1008_v33 = vpop.f32.mrf.mxu0 }
 0x10d   : > { %v1049_v34 = vpop.f32.mrf.mxu1  ;;  %v1362_v38 = vmul.f32 %v1346_v0, %v1848_v24  ;;  %1603 = vtanh.f32 %v1303_v21  ;;  %v1272_v39 = vmul.f32 0.044715, %v1256_v26  ;;  %v1194_v43 = vcombine.low %v1005_v22, %v1007_v29 }
 0x10e   : > { %v1273_v40 = vmul.f32 0.044715, %v1257_v27  ;;  %v1363_v42 = vmul.f32 %v1347_v30, %v1850_v28  ;;  %v1195_v44 = vcombine.low %v1046_v31, %v1048_v32  ;;  %v1009_v45 = vpop.f32.mrf.mxu0 }
 0x10f   : > { %v1050_v46 = vpop.f32.mrf.mxu1  ;;  %1378 = vst [vmem:[%s1882_s6 + $0x20] sm:$0xff] %v1362_v38  ;;  %v1288_v47 = vadd.f32 %v1272_v39, %v1913_v9  ;;  %v1938_v50 = vadd.f32 %v1194_v43, %v1146_v41 }
 0x110   : > { %v1289_v48 = vadd.f32 %v1273_v40, %v1915_v10  ;;  %v1598_v49 = vpop.eup %1597  ;;  %1379 = vst [vmem:[%s1882_s6 + $0x28] sm:$0xff] %v1363_v42  ;;  %v1940_v24 = vadd.f32 %v1195_v44, %v1147_v37  ;;  %v1086_v51 = vpop.f32.mrf.mxu0 }
 0x111   : > { %v1127_v52 = vpop.f32.mrf.mxu1  ;;  %v1600_v53 = vpop.eup %1599  ;;  %v1332_v54 = vadd.f32 1.0, %v1598_v49  ;;  %v1304_v28 = vmul.f32 0.7978846, %v1288_v47  ;;  %v1087_v58 = vadd.f32 %v1086_v51, %v1798_v20  ;;  %v1242_v60 = vmul.f32 %v1938_v50, %v1938_v50 }
 0x112   : > { %v1305_v55 = vmul.f32 0.7978846, %v1289_v48  ;;  %v1333_v59 = vadd.f32 1.0, %v1600_v53  ;;  %v1243_v61 = vmul.f32 %v1940_v24, %v1940_v24  ;;  %v1128_v1 = vadd.f32 %v1127_v52, %v1798_v20  ;;  %v1088_v2 = vpop.f32.mrf.mxu0 }
 0x113   : > { %v1129_v3 = vpop.f32.mrf.mxu1  ;;  %v1348_v4 = vmul.f32 0.5, %v1332_v54  ;;  %1605 = vtanh.f32 %v1304_v28  ;;  %v1089_v5 = vadd.f32 %v1088_v2, %v1798_v20  ;;  %v1258_v8 = vmul.f32 %v1242_v60, %v1938_v50 }
 0x114   : > { %v1130_v6 = vadd.f32 %v1129_v3, %v1798_v20  ;;  %v1349_v7 = vmul.f32 0.5, %v1333_v59  ;;  %1607 = vtanh.f32 %v1305_v55  ;;  %v1259_v11 = vmul.f32 %v1243_v61, %v1940_v24  ;;  %v1090_v62 = vpop.f32.mrf.mxu0 }
 0x115   : > { %v1131_v14 = vpop.f32.mrf.mxu1  ;;  %v1364_v15 = vmul.f32 %v1348_v4, %v1865_v56  ;;  %v1196_v16 = vcombine.low %v1087_v58, %v1089_v5  ;;  %v1274_v18 = vmul.f32 0.044715, %v1258_v8 }
 0x116   : > { %v1197_v63 = vcombine.low %v1128_v1, %v1130_v6  ;;  %v1365_v17 = vmul.f32 %v1349_v7, %v1867_v57  ;;  %v1275_v20 = vmul.f32 0.044715, %v1259_v11  ;;  %v1091_v19 = vpop.f32.mrf.mxu0 }
 0x117   : > { %v1132_v21 = vpop.f32.mrf.mxu1  ;;  %1380 = vst [vmem:[%s1882_s6 + $0x30] sm:$0xff] %v1364_v15  ;;  %v1228_v22 = vadd.f32 %v1196_v16, %v1148_v12  ;;  %v1290_v25 = vadd.f32 %v1274_v18, %v1938_v50 }
 0x118   : > { %v1229_v23 = vadd.f32 %v1197_v63, %v1149_v13  ;;  %1381 = vst [vmem:[%s1882_s6 + $0x38] sm:$0xff] %v1365_v17  ;;  %v1291_v0 = vadd.f32 %v1275_v20, %v1940_v24 }
 0x119   : > { %v1602_v26 = vpop.eup %1601  ;;  %v1244_v27 = vmul.f32 %v1228_v22, %v1228_v22  ;;  %v1306_v31 = vmul.f32 0.7978846, %v1290_v25 }
 0x11a   : > { %v1245_v29 = vmul.f32 %v1229_v23, %v1229_v23  ;;  %v1604_v56 = vpop.eup %1603  ;;  %v1334_v30 = vadd.f32 1.0, %v1602_v26  ;;  %v1307_v57 = vmul.f32 0.7978846, %v1291_v0 }
 0x11b   : > { %v1335_v32 = vadd.f32 1.0, %v1604_v56  ;;  %v1260_v33 = vmul.f32 %v1244_v27, %v1228_v22  ;;  %1609 = vtanh.f32 %v1306_v31 }
 0x11c   : > { %v1261_v34 = vmul.f32 %v1245_v29, %v1229_v23  ;;  %v1350_v38 = vmul.f32 0.5, %v1334_v30  ;;  %1611 = vtanh.f32 %v1307_v57 }
 0x11d   : > { %v1351_v39 = vmul.f32 0.5, %v1335_v32  ;;  %v1276_v40 = vmul.f32 0.044715, %v1260_v33 }
 0x11e   : > { %v1277_v41 = vmul.f32 0.044715, %v1261_v34  ;;  %v1366_v37 = vmul.f32 %v1350_v38, %v1894_v35 }
 0x11f   : > { %v1367_v42 = vmul.f32 %v1351_v39, %v1896_v36  ;;  %v1292_v43 = vadd.f32 %v1276_v40, %v1228_v22 }
 0x120   : > { %v1293_v44 = vadd.f32 %v1277_v41, %v1229_v23  ;;  %v1606_v45 = vpop.eup %1605  ;;  %1382 = vst [vmem:[%s1882_s6 + $0x40] sm:$0xff] %v1366_v37 }
 0x121   : > { %v1608_v46 = vpop.eup %1607  ;;  %1383 = vst [vmem:[%s1882_s6 + $0x48] sm:$0xff] %v1367_v42  ;;  %v1336_v47 = vadd.f32 1.0, %v1606_v45  ;;  %v1308_v48 = vmul.f32 0.7978846, %v1292_v43 }
 0x122   : > { %v1309_v49 = vmul.f32 0.7978846, %v1293_v44  ;;  %v1337_v51 = vadd.f32 1.0, %v1608_v46 }
 0x123   : > { %v1352_v52 = vmul.f32 0.5, %v1336_v47  ;;  %1613 = vtanh.f32 %v1308_v48 }
 0x124   : > { %v1353_v53 = vmul.f32 0.5, %v1337_v51  ;;  %1615 = vtanh.f32 %v1309_v49 }
 0x125   : > { %v1368_v35 = vmul.f32 %v1352_v52, %v1913_v9 }
 0x126   : > { %v1369_v36 = vmul.f32 %v1353_v53, %v1915_v10 }
 0x127   : > { %1384 = vst [vmem:[%s1882_s6 + $0x50] sm:$0xff] %v1368_v35 }
 0x128   : > { %1385 = vst [vmem:[%s1882_s6 + $0x58] sm:$0xff] %v1369_v36  ;;  %v1610_v54 = vpop.eup %1609 }
 0x129   : > { %v1612_v28 = vpop.eup %1611  ;;  %v1338_v55 = vadd.f32 1.0, %v1610_v54 }
 0x12a   : > { %v1339_v58 = vadd.f32 1.0, %v1612_v28 }
 0x12b   : > { %v1354_v59 = vmul.f32 0.5, %v1338_v55 }
 0x12c   : > { %v1355_v60 = vmul.f32 0.5, %v1339_v58 }
 0x12d   : > { %v1370_v61 = vmul.f32 %v1354_v59, %v1938_v50 }
 0x12e   : > { %v1371_v1 = vmul.f32 %v1355_v60, %v1940_v24 }
 0x12f   : > { %1386 = vst [vmem:[%s1882_s6 + $0x60] sm:$0xff] %v1370_v61 }
 0x130   : > { %v1614_v2 = vpop.eup %1613  ;;  %1387 = vst [vmem:[%s1882_s6 + $0x68] sm:$0xff] %v1371_v1 }
 0x131   : > { %v1616_v3 = vpop.eup %1615  ;;  %v1340_v9 = vadd.f32 1.0, %v1614_v2 }
 0x132   : > { %v1341_v10 = vadd.f32 1.0, %v1616_v3 }
 0x133   : > { %v1356_v4 = vmul.f32 0.5, %v1340_v9 }
 0x134   : > { %v1357_v5 = vmul.f32 0.5, %v1341_v10 }
 0x135   : > { %v1372_v6 = vmul.f32 %v1356_v4, %v1228_v22 }
 0x136   : > { %v1373_v7 = vmul.f32 %v1357_v5, %v1229_v23 }
 0x137   : > { %1388 = vst [vmem:[%s1882_s6 + $0x70] sm:$0xff] %v1372_v6 }
 0x138   : > { %1389 = vst [vmem:[%s1882_s6 + $0x78] sm:$0xff] %v1373_v7 }
 0x139 PF: > { %s14_s17 = sadd.s32 1, %s1639_s17   ;;  %s1988_s15 = smov %s1635_s16 }
 0x13a   : > { %p11_p5 = scmp.ge.s32.totalorder %s14_s17, 4   ;;  %s1989_s16 = smov %s1991_s18 }
 0x13c   :  { %13 = sbr.rel (!%p11_p5) target bundleno = 2 (0x2), region = 69 }

// kernel: fno_forward.11
= control target key start
LH: loop header
LB: loop body
LE: loop exit
PB: predicated region body
PF: predicated region fallthrough
CT: control target
= control target key end

     0   :  { %s2614_s18 = smov 0   ;;  %s2616_s19 = smov 0   ;;  %s3222_s0 = inlined_call_operand.vmem [shape: f32[2,4,4096], index: 0, kind: input, shape index: {}]   ;;  %s3223_s1 = inlined_call_operand.vmem [shape: bf16[8,4], index: 1, kind: input, shape index: {}]   ;;  %s3224_s2 = inlined_call_operand.vmem [shape: f32[8,1], index: 2, kind: input, shape index: {}]   ;;  %s3225_s3 = inlined_call_operand.vmem [shape: bf16[3,8], index: 3, kind: input, shape index: {}]   ;;  %s3226_s4 = inlined_call_operand.vmem [shape: f32[3,1], index: 4, kind: input, shape index: {}]   ;;  %s3227_s5 = inlined_call_operand.vmem [shape: f32[2,3,4096], index: 5, kind: output, shape index: {}]  }
   0x1   :  { %s2618_s20 = smov 0  }
   0x2 LB: > { %s27_s21 = sadd.s32 1, %s2577_s19  ;;  %p2380_p0 = scmp.ge.s32.totalorder %s2581_s20, 1  ;;  %s2581_s20 = sphi %s2618_s20, %s15_s20   ;;  %s2577_s19 = sphi %s2616_s19, %s3229_s19   ;;  %s2573_s18 = sphi %s2614_s18, %s3228_s18  }
   0x3   : > { %p29_p1 = scmp.ge.s32.totalorder %s27_s21, 2  ;;  %p208_p2 = scmp.lt.s32.totalorder %s2581_s20, 3 }
   0x5   : > { %s3231_s21 = smov (%p29_p1, %s27_s21), 0  ;;  %p209_p3 = pnand %p2380_p0, %p208_p2 }
   0x6   : > { %p245_p4 = scmp.lt.s32.totalorder (!%p209_p3), %s2573_s18, 1 }
   0x7   : > { %212 = sbr.rel (%p209_p3) target bundleno = 534 (0x216), region = 40 }
   0xc   : > { %v2583_v0 = vmov 0   ;;  %v362_v1 = vld [vmem:[%s3224_s2] sm:$0xff]  ;;  %s3233_s18 = smov (!%p245_p4, %s2573_s18), 1  ;;  %vm372_vm0 = vcmask 1041408   ;;  %vm368_vm1 = vcmask 31744   ;;  %vm1456_vm2 = vcmask 1043456  }
   0xd   : > { %501 = vmatprep.mubr.bf16.mxu0 %v2583_v0  ;;  %542 = vmatprep.mubr.bf16.mxu1 %v2583_v0  ;;  %s2451_s24 = sshll.u32 %s3233_s18, 7  ;;  %v1446_v2 = vld [vmem:[%s3226_s4] sm:$0x7]  ;;  %vm1452_vm3 = vcmask 64512  }
   0xe   : > { %2478 = vset.pattern.permute.xlu0 %v2583_v0  ;;  %s2649_s29 = scalar_lea.vmem %s3222_s0, %s2451_s24  ;;  %v2664_v25 = vld [vmem:[%s3223_s1] sm:$0xf]  ;;  %s3165_s11 = scalar_lea.vmem %s3227_s5, %s2451_s24 }
   0xf   : > { %365 = vperm.xlu0 %2478, %v362_v1   ;;  %v266_v3 = vld [vmem:[%s2649_s29] sm:$0xff]  ;;  %v267_v4 = vld [vmem:[%s2649_s29 + $0x8] sm:$0xff]  ;;  %v268_v5 = vld [vmem:[%s2649_s29 + $0x10] sm:$0xff] }
  0x10   : > { %v298_v6 = vcombine.high %v266_v3, %v266_v3  ;;  %v299_v7 = vcombine.high %v267_v4, %v267_v4  ;;  %v330_v8 = vpack.c.bf16 %v266_v3, %v266_v3  ;;  %v332_v9 = vpack.c.bf16 %v267_v4, %v267_v4  ;;  %v269_v10 = vld [vmem:[%s2649_s29 + $0x18] sm:$0xff]  ;;  %v270_v15 = vld [vmem:[%s2649_s29 + $0x20] sm:$0xff]  ;;  %v271_v16 = vld [vmem:[%s2649_s29 + $0x28] sm:$0xff] }
  0x11   : > { %v300_v11 = vcombine.high %v268_v5, %v268_v5  ;;  %v301_v12 = vcombine.high %v269_v10, %v269_v10  ;;  %v334_v13 = vpack.c.bf16 %v268_v5, %v268_v5  ;;  %v336_v14 = vpack.c.bf16 %v269_v10, %v269_v10  ;;  %v272_v30 = vld [vmem:[%s2649_s29 + $0x30] sm:$0xff]  ;;  %v273_v31 = vld [vmem:[%s2649_s29 + $0x38] sm:$0xff]  ;;  %v274_v40 = vld [vmem:[%s2649_s29 + $0x40] sm:$0xff] }
  0x12   : > { %v331_v17 = vpack.c.bf16 %v298_v6, %v298_v6  ;;  %v333_v18 = vpack.c.bf16 %v299_v7, %v299_v7  ;;  %v374_v19 = vsel %vm372_vm0, %v330_v8, 0  ;;  %v380_v20 = vsel %vm372_vm0, %v332_v9, 0  ;;  %v275_v41 = vld [vmem:[%s2649_s29 + $0x48] sm:$0xff]  ;;  %v276_v50 = vld [vmem:[%s2649_s29 + $0x50] sm:$0xff]  ;;  %v277_v51 = vld [vmem:[%s2649_s29 + $0x58] sm:$0xff] }
  0x13   : > { %1449 = vperm.xlu0 %2478, %v1446_v2   ;;  %v335_v21 = vpack.c.bf16 %v300_v11, %v300_v11  ;;  %v337_v22 = vpack.c.bf16 %v301_v12, %v301_v12  ;;  %v302_v23 = vcombine.high %v270_v15, %v270_v15  ;;  %v303_v24 = vcombine.high %v271_v16, %v271_v16  ;;  %v278_v60 = vld [vmem:[%s2649_s29 + $0x60] sm:$0xff]  ;;  %v279_v61 = vld [vmem:[%s2649_s29 + $0x68] sm:$0xff]  ;;  %v280_v7 = vld [vmem:[%s2649_s29 + $0x70] sm:$0xff] }
  0x14   : > { %2385 = vmatprep.subr.msk.bf16.mxu0 %vm372_vm0, %v331_v17  ;;  %2387 = vmatprep.subr.msk.bf16.mxu1 %vm372_vm0, %v333_v18  ;;  %v386_v26 = vsel %vm372_vm0, %v334_v13, 0  ;;  %v392_v27 = vsel %vm372_vm0, %v336_v14, 0  ;;  %v338_v32 = vpack.c.bf16 %v270_v15, %v270_v15  ;;  %v340_v33 = vpack.c.bf16 %v271_v16, %v271_v16  ;;  %v281_v8 = vld [vmem:[%s2649_s29 + $0x78] sm:$0xff] }
  0x15   : > { %484 = vmatpush1.bf16.msra.mxu0 %v374_v19  ;;  %525 = vmatpush1.bf16.msra.mxu1 %v380_v20  ;;  %v339_v28 = vpack.c.bf16 %v302_v23, %v302_v23  ;;  %v341_v29 = vpack.c.bf16 %v303_v24, %v303_v24  ;;  %v304_v34 = vcombine.high %v272_v30, %v272_v30 }
  0x16   : > { %2389 = vmatprep.subr.msk.bf16.mxu0 %vm372_vm0, %v335_v21  ;;  %2391 = vmatprep.subr.msk.bf16.mxu1 %vm372_vm0, %v337_v22  ;;  %v305_v35 = vcombine.high %v273_v31, %v273_v31  ;;  %v398_v36 = vsel %vm372_vm0, %v338_v32, 0  ;;  %v404_v37 = vsel %vm372_vm0, %v340_v33, 0  ;;  %v342_v42 = vpack.c.bf16 %v272_v30, %v272_v30 }
  0x17   : > { %v343_v38 = vpack.c.bf16 %v304_v34, %v304_v34  ;;  %v344_v43 = vpack.c.bf16 %v273_v31, %v273_v31  ;;  %v306_v44 = vcombine.high %v274_v40, %v274_v40  ;;  %v307_v45 = vcombine.high %v275_v41, %v275_v41 }
  0x18   : > { %2386 = vmatmul.mubr.msk.bf16.vlgmr.msra.gmra.mxu0 %vm368_vm1, %v2664_v25  ;;  %2388 = vmatmul.mubr.msk.bf16.vlgmr.msra.gmra.mxu1 %vm368_vm1, %v2664_v25  ;;  %v345_v39 = vpack.c.bf16 %v305_v35, %v305_v35  ;;  %v410_v46 = vsel %vm372_vm0, %v342_v42, 0  ;;  %v346_v52 = vpack.c.bf16 %v274_v40, %v274_v40  ;;  %v348_v53 = vpack.c.bf16 %v275_v41, %v275_v41 }
  0x19   : > { %566 = vmatpush1.bf16.msra.mxu0 %v386_v26  ;;  %607 = vmatpush1.bf16.msra.mxu1 %v392_v27  ;;  %v416_v47 = vsel %vm372_vm0, %v344_v43, 0  ;;  %v347_v48 = vpack.c.bf16 %v306_v44, %v306_v44  ;;  %v349_v49 = vpack.c.bf16 %v307_v45, %v307_v45  ;;  %v308_v54 = vcombine.high %v276_v50, %v276_v50 }
  0x1a   : > { %583 = vmatprep.mubr.bf16.mxu0 %v2583_v0  ;;  %624 = vmatprep.mubr.bf16.mxu1 %v2583_v0  ;;  %v309_v55 = vcombine.high %v277_v51, %v277_v51  ;;  %v422_v56 = vsel %vm372_vm0, %v346_v52, 0  ;;  %v428_v57 = vsel %vm372_vm0, %v348_v53, 0  ;;  %v350_v62 = vpack.c.bf16 %v276_v50, %v276_v50 }
  0x1b   : > { %2393 = vmatprep.subr.msk.bf16.mxu0 %vm372_vm0, %v339_v28  ;;  %2395 = vmatprep.subr.msk.bf16.mxu1 %vm372_vm0, %v341_v29  ;;  %v351_v58 = vpack.c.bf16 %v308_v54, %v308_v54  ;;  %v352_v63 = vpack.c.bf16 %v277_v51, %v277_v51  ;;  %v310_v1 = vcombine.high %v278_v60, %v278_v60 }
  0x1c   : > { %v353_v59 = vpack.c.bf16 %v309_v55, %v309_v55  ;;  %v311_v2 = vcombine.high %v279_v61, %v279_v61  ;;  %v434_v3 = vsel %vm372_vm0, %v350_v62, 0  ;;  %v354_v9 = vpack.c.bf16 %v278_v60, %v278_v60 }
  0x1d   : > { %v440_v4 = vsel %vm372_vm0, %v352_v63, 0  ;;  %v355_v5 = vpack.c.bf16 %v310_v1, %v310_v1  ;;  %v356_v10 = vpack.c.bf16 %v279_v61, %v279_v61  ;;  %v312_v11 = vcombine.high %v280_v7, %v280_v7 }
  0x1e   : > { %v357_v6 = vpack.c.bf16 %v311_v2, %v311_v2  ;;  %v313_v12 = vcombine.high %v281_v8, %v281_v8  ;;  %v446_v13 = vsel %vm372_vm0, %v354_v9, 0  ;;  %v358_v17 = vpack.c.bf16 %v280_v7, %v280_v7 }
  0x1f   : > { %v452_v14 = vsel %vm372_vm0, %v356_v10, 0  ;;  %v359_v15 = vpack.c.bf16 %v312_v11, %v312_v11  ;;  %v360_v18 = vpack.c.bf16 %v281_v8, %v281_v8 }
  0x20   : > { %2390 = vmatmul.mubr.msk.bf16.vlgmr.msra.gmra.mxu0 %vm368_vm1, %v2664_v25  ;;  %2392 = vmatmul.mubr.msk.bf16.vlgmr.msra.gmra.mxu1 %vm368_vm1, %v2664_v25  ;;  %v361_v16 = vpack.c.bf16 %v313_v12, %v313_v12  ;;  %v458_v19 = vsel %vm372_vm0, %v358_v17, 0 }
  0x21   : > { %648 = vmatpush1.bf16.msra.mxu0 %v398_v36  ;;  %689 = vmatpush1.bf16.msra.mxu1 %v404_v37  ;;  %v464_v20 = vsel %vm372_vm0, %v360_v18, 0 }
  0x22   : > { %665 = vmatprep.mubr.bf16.mxu0 %v2583_v0  ;;  %706 = vmatprep.mubr.bf16.mxu1 %v2583_v0 }
  0x23   : > { %2397 = vmatprep.subr.msk.bf16.mxu0 %vm372_vm0, %v343_v38  ;;  %2399 = vmatprep.subr.msk.bf16.mxu1 %vm372_vm0, %v345_v39 }
  0x28   : > { %2394 = vmatmul.mubr.msk.bf16.vlgmr.msra.gmra.mxu0 %vm368_vm1, %v2664_v25  ;;  %2396 = vmatmul.mubr.msk.bf16.vlgmr.msra.gmra.mxu1 %vm368_vm1, %v2664_v25 }
  0x29   : > { %730 = vmatpush1.bf16.msra.mxu0 %v410_v46  ;;  %771 = vmatpush1.bf16.msra.mxu1 %v416_v47 }
  0x2a   : > { %747 = vmatprep.mubr.bf16.mxu0 %v2583_v0  ;;  %788 = vmatprep.mubr.bf16.mxu1 %v2583_v0 }
  0x2b   : > { %2401 = vmatprep.subr.msk.bf16.mxu0 %vm372_vm0, %v347_v48  ;;  %2403 = vmatprep.subr.msk.bf16.mxu1 %vm372_vm0, %v349_v49 }
  0x30   : > { %2398 = vmatmul.mubr.msk.bf16.vlgmr.msra.gmra.mxu0 %vm368_vm1, %v2664_v25  ;;  %2400 = vmatmul.mubr.msk.bf16.vlgmr.msra.gmra.mxu1 %vm368_vm1, %v2664_v25 }
  0x31   : > { %812 = vmatpush1.bf16.msra.mxu0 %v422_v56  ;;  %853 = vmatpush1.bf16.msra.mxu1 %v428_v57 }
  0x32   : > { %829 = vmatprep.mubr.bf16.mxu0 %v2583_v0  ;;  %870 = vmatprep.mubr.bf16.mxu1 %v2583_v0 }
  0x33   : > { %2405 = vmatprep.subr.msk.bf16.mxu0 %vm372_vm0, %v351_v58  ;;  %2407 = vmatprep.subr.msk.bf16.mxu1 %vm372_vm0, %v353_v59 }
  0x38   : > { %2402 = vmatmul.mubr.msk.bf16.vlgmr.msra.gmra.mxu0 %vm368_vm1, %v2664_v25  ;;  %2404 = vmatmul.mubr.msk.bf16.vlgmr.msra.gmra.mxu1 %vm368_vm1, %v2664_v25 }
  0x39   : > { %894 = vmatpush1.bf16.msra.mxu0 %v434_v3  ;;  %935 = vmatpush1.bf16.msra.mxu1 %v440_v4 }
  0x3a   : > { %911 = vmatprep.mubr.bf16.mxu0 %v2583_v0  ;;  %952 = vmatprep.mubr.bf16.mxu1 %v2583_v0 }
  0x3b   : > { %2409 = vmatprep.subr.msk.bf16.mxu0 %vm372_vm0, %v355_v5  ;;  %2411 = vmatprep.subr.msk.bf16.mxu1 %vm372_vm0, %v357_v6 }
  0x40   : > { %2406 = vmatmul.mubr.msk.bf16.vlgmr.msra.gmra.mxu0 %vm368_vm1, %v2664_v25  ;;  %2408 = vmatmul.mubr.msk.bf16.vlgmr.msra.gmra.mxu1 %vm368_vm1, %v2664_v25 }
  0x41   : > { %976 = vmatpush1.bf16.msra.mxu0 %v446_v13  ;;  %1017 = vmatpush1.bf16.msra.mxu1 %v452_v14 }
  0x42   : > { %993 = vmatprep.mubr.bf16.mxu0 %v2583_v0  ;;  %1034 = vmatprep.mubr.bf16.mxu1 %v2583_v0 }
  0x43   : > { %2413 = vmatprep.subr.msk.bf16.mxu0 %vm372_vm0, %v359_v15  ;;  %2415 = vmatprep.subr.msk.bf16.mxu1 %vm372_vm0, %v361_v16 }
  0x48   : > { %2410 = vmatmul.mubr.msk.bf16.vlgmr.msra.gmra.mxu0 %vm368_vm1, %v2664_v25  ;;  %2412 = vmatmul.mubr.msk.bf16.vlgmr.msra.gmra.mxu1 %vm368_vm1, %v2664_v25 }
  0x49   : > { %1058 = vmatpush1.bf16.msra.mxu0 %v458_v19  ;;  %1099 = vmatpush1.bf16.msra.mxu1 %v464_v20 }
  0x4a   : > { %1075 = vmatprep.mubr.bf16.mxu0 %v2583_v0  ;;  %1116 = vmatprep.mubr.bf16.mxu1 %v2583_v0 }
  0x50   : > { %2414 = vmatmul.mubr.msk.bf16.vlgmr.msra.gmra.mxu0 %vm368_vm1, %v2664_v25  ;;  %2416 = vmatmul.mubr.msk.bf16.vlgmr.msra.gmra.mxu1 %vm368_vm1, %v2664_v25 }
  0x51   : > { %1585 = vmatprep.mubr.bf16.mxu0 %v2583_v0  ;;  %1626 = vmatprep.mubr.bf16.mxu1 %v2583_v0 }
  0x8a   : > { %v2752_v21 = vpop.permute.xlu0 %365 }
  0xd8   : > { %v503_v22 = vpop.f32.mrf.mxu0  ;;  %v544_v23 = vpop.f32.mrf.mxu1 }
  0xd9   : > { %v2755_v24 = vadd.f32 %v503_v22, %v2752_v21  ;;  %v2758_v26 = vadd.f32 %v544_v23, %v2752_v21 }
  0xda   : > { %v505_v27 = vpop.f32.mrf.mxu0  ;;  %v546_v28 = vpop.f32.mrf.mxu1 }
  0xdb   : > { %v1125_v29 = vmul.f32 %v2755_v24, %v2755_v24  ;;  %v1127_v25 = vmul.f32 %v2758_v26, %v2758_v26  ;;  %v2765_v30 = vadd.f32 %v505_v27, %v2752_v21  ;;  %v2768_v31 = vadd.f32 %v546_v28, %v2752_v21 }
  0xdc   : > { %v507_v32 = vpop.f32.mrf.mxu0  ;;  %v548_v33 = vpop.f32.mrf.mxu1 }
  0xdd   : > { %v1157_v34 = vmul.f32 %v1125_v29, %v2755_v24  ;;  %v1159_v35 = vmul.f32 %v1127_v25, %v2758_v26  ;;  %v1126_v36 = vmul.f32 %v2765_v30, %v2765_v30  ;;  %v1128_v37 = vmul.f32 %v2768_v31, %v2768_v31 }
  0xde   : > { %v508_v38 = vpop.f32.mrf.mxu0  ;;  %v549_v39 = vpop.f32.mrf.mxu1 }
  0xdf   : > { %v1189_v40 = vmul.f32 0.044715, %v1157_v34  ;;  %v1158_v41 = vmul.f32 %v1126_v36, %v2765_v30  ;;  %v1160_v42 = vmul.f32 %v1128_v37, %v2768_v31  ;;  %v1191_v46 = vmul.f32 0.044715, %v1159_v35 }
  0xe0   : > { %v585_v43 = vpop.f32.mrf.mxu0  ;;  %v626_v44 = vpop.f32.mrf.mxu1 }
  0xe1   : > { %v1221_v45 = vadd.f32 %v1189_v40, %v2755_v24  ;;  %v1190_v47 = vmul.f32 0.044715, %v1158_v41  ;;  %v1192_v48 = vmul.f32 0.044715, %v1160_v42  ;;  %v2780_v49 = vadd.f32 %v585_v43, %v2752_v21 }
  0xe2   : > { %v2783_v50 = vadd.f32 %v626_v44, %v2752_v21  ;;  %v587_v51 = vpop.f32.mrf.mxu0  ;;  %v628_v52 = vpop.f32.mrf.mxu1  ;;  %v1223_v62 = vadd.f32 %v1191_v46, %v2758_v26 }
  0xe3   : > { %v1253_v53 = vmul.f32 0.7978846, %v1221_v45  ;;  %v1222_v54 = vadd.f32 %v1190_v47, %v2765_v30  ;;  %v1224_v55 = vadd.f32 %v1192_v48, %v2768_v31  ;;  %v1129_v56 = vmul.f32 %v2780_v49, %v2780_v49 }
  0xe4   : > { %v1131_v57 = vmul.f32 %v2783_v50, %v2783_v50  ;;  %v2792_v58 = vadd.f32 %v587_v51, %v2752_v21  ;;  %v2795_v59 = vadd.f32 %v628_v52, %v2752_v21  ;;  %v589_v60 = vpop.f32.mrf.mxu0  ;;  %v630_v61 = vpop.f32.mrf.mxu1  ;;  %v1255_v16 = vmul.f32 0.7978846, %v1223_v62 }
  0xe5   : > { %v1254_v63 = vmul.f32 0.7978846, %v1222_v54  ;;  %v1256_v1 = vmul.f32 0.7978846, %v1224_v55  ;;  %2495 = vtanh.f32 %v1253_v53  ;;  %v1161_v2 = vmul.f32 %v1129_v56, %v2780_v49 }
  0xe6   : > { %v1163_v3 = vmul.f32 %v1131_v57, %v2783_v50  ;;  %v1130_v4 = vmul.f32 %v2792_v58, %v2792_v58  ;;  %v590_v5 = vpop.f32.mrf.mxu0  ;;  %v631_v6 = vpop.f32.mrf.mxu1  ;;  %v1132_v7 = vmul.f32 %v2795_v59, %v2795_v59 }
  0xe7   : > { %2497 = vtanh.f32 %v1254_v63  ;;  %v1193_v8 = vmul.f32 0.044715, %v1161_v2 }
  0xe8   : > { %2499 = vtanh.f32 %v1256_v1  ;;  %v1195_v9 = vmul.f32 0.044715, %v1163_v3  ;;  %v1162_v10 = vmul.f32 %v1130_v4, %v2792_v58  ;;  %v667_v11 = vpop.f32.mrf.mxu0  ;;  %v708_v12 = vpop.f32.mrf.mxu1  ;;  %v1164_v13 = vmul.f32 %v1132_v7, %v2795_v59 }
  0xe9   : > { %v2807_v14 = vadd.f32 %v667_v11, %v2752_v21  ;;  %v2810_v15 = vadd.f32 %v708_v12, %v2752_v21  ;;  %v1225_v17 = vadd.f32 %v1193_v8, %v2780_v49  ;;  %2501 = vtanh.f32 %v1255_v16 }
  0xea   : > { %v1227_v18 = vadd.f32 %v1195_v9, %v2783_v50  ;;  %v1194_v19 = vmul.f32 0.044715, %v1162_v10  ;;  %v669_v20 = vpop.f32.mrf.mxu0  ;;  %v710_v22 = vpop.f32.mrf.mxu1  ;;  %v1196_v23 = vmul.f32 0.044715, %v1164_v13 }
  0xeb   : > { %v1133_v27 = vmul.f32 %v2807_v14, %v2807_v14  ;;  %v1135_v28 = vmul.f32 %v2810_v15, %v2810_v15  ;;  %v2819_v29 = vadd.f32 %v669_v20, %v2752_v21  ;;  %v1257_v25 = vmul.f32 0.7978846, %v1225_v17 }
  0xec   : > { %v1259_v32 = vmul.f32 0.7978846, %v1227_v18  ;;  %v1226_v33 = vadd.f32 %v1194_v19, %v2792_v58  ;;  %v2823_v34 = vadd.f32 %v710_v22, %v2752_v21  ;;  %v671_v35 = vpop.f32.mrf.mxu0  ;;  %v712_v36 = vpop.f32.mrf.mxu1  ;;  %v1228_v37 = vadd.f32 %v1196_v23, %v2795_v59 }
  0xed   : > { %v1165_v38 = vmul.f32 %v1133_v27, %v2807_v14  ;;  %v1167_v39 = vmul.f32 %v1135_v28, %v2810_v15  ;;  %v1134_v40 = vmul.f32 %v2819_v29, %v2819_v29  ;;  %2503 = vtanh.f32 %v1257_v25 }
  0xee   : > { %v1258_v41 = vmul.f32 0.7978846, %v1226_v33  ;;  %v1136_v42 = vmul.f32 %v2823_v34, %v2823_v34  ;;  %v672_v43 = vpop.f32.mrf.mxu0  ;;  %v713_v44 = vpop.f32.mrf.mxu1  ;;  %v1260_v45 = vmul.f32 0.7978846, %v1228_v37  ;;  %2505 = vtanh.f32 %v1259_v32 }
  0xef   : > { %v1197_v46 = vmul.f32 0.044715, %v1165_v38  ;;  %v1199_v47 = vmul.f32 0.044715, %v1167_v39  ;;  %v1166_v48 = vmul.f32 %v1134_v40, %v2819_v29 }
  0xf0   : > { %v1168_v51 = vmul.f32 %v1136_v42, %v2823_v34  ;;  %v749_v52 = vpop.f32.mrf.mxu0  ;;  %v790_v53 = vpop.f32.mrf.mxu1  ;;  %2507 = vtanh.f32 %v1258_v41 }
  0xf1   : > { %v1229_v54 = vadd.f32 %v1197_v46, %v2807_v14  ;;  %v1231_v55 = vadd.f32 %v1199_v47, %v2810_v15  ;;  %v2837_v56 = vadd.f32 %v749_v52, %v2752_v21  ;;  %2509 = vtanh.f32 %v1260_v45 }
  0xf2   : > { %v1198_v57 = vmul.f32 0.044715, %v1166_v48  ;;  %v1200_v60 = vmul.f32 0.044715, %v1168_v51  ;;  %v2840_v61 = vadd.f32 %v790_v53, %v2752_v21  ;;  %v751_v62 = vpop.f32.mrf.mxu0  ;;  %v792_v63 = vpop.f32.mrf.mxu1 }
  0xf3   : > { %v2496_v1 = vpop.eup %2495  ;;  %v1261_v2 = vmul.f32 0.7978846, %v1229_v54  ;;  %v1263_v3 = vmul.f32 0.7978846, %v1231_v55  ;;  %v1137_v4 = vmul.f32 %v2837_v56, %v2837_v56  ;;  %v2845_v5 = vadd.f32 %v751_v62, %v2752_v21 }
  0xf4   : > { %v2498_v6 = vpop.eup %2497  ;;  %v1230_v7 = vadd.f32 %v1198_v57, %v2819_v29  ;;  %v1232_v8 = vadd.f32 %v1200_v60, %v2823_v34  ;;  %v1139_v9 = vmul.f32 %v2840_v61, %v2840_v61  ;;  %v2852_v10 = vadd.f32 %v792_v63, %v2752_v21  ;;  %v753_v11 = vpop.f32.mrf.mxu0 }
  0xf5   : > { %v794_v12 = vpop.f32.mrf.mxu1  ;;  %v2500_v13 = vpop.eup %2499  ;;  %2511 = vtanh.f32 %v1261_v2  ;;  %v1169_v16 = vmul.f32 %v1137_v4, %v2837_v56  ;;  %v1138_v17 = vmul.f32 %v2845_v5, %v2845_v5  ;;  %v1318_v18 = vadd.f32 1.0, %v2498_v6 }
  0xf6   : > { %2513 = vtanh.f32 %v1263_v3  ;;  %v1262_v19 = vmul.f32 0.7978846, %v1230_v7  ;;  %v1264_v20 = vmul.f32 0.7978846, %v1232_v8  ;;  %v1171_v22 = vmul.f32 %v1139_v9, %v2840_v61  ;;  %v754_v23 = vpop.f32.mrf.mxu0  ;;  %v2502_v51 = vpop.eup %2501 }
  0xf7   : > { %v795_v27 = vpop.f32.mrf.mxu1  ;;  %v1201_v28 = vmul.f32 0.044715, %v1169_v16  ;;  %v1170_v25 = vmul.f32 %v1138_v17, %v2845_v5  ;;  %v1140_v32 = vmul.f32 %v2852_v10, %v2852_v10  ;;  %v1350_v33 = vmul.f32 0.5, %v1318_v18 }
  0xf8   : > { %2515 = vtanh.f32 %v1262_v19  ;;  %v1203_v35 = vmul.f32 0.044715, %v1171_v22  ;;  %v831_v36 = vpop.f32.mrf.mxu0  ;;  %v1320_v38 = vadd.f32 1.0, %v2500_v13  ;;  %v1317_v39 = vadd.f32 1.0, %v2496_v1 }
  0xf9   : > { %v872_v37 = vpop.f32.mrf.mxu1  ;;  %2517 = vtanh.f32 %v1264_v20  ;;  %v1233_v40 = vadd.f32 %v1201_v28, %v2837_v56  ;;  %v1202_v41 = vmul.f32 0.044715, %v1170_v25  ;;  %v1172_v42 = vmul.f32 %v1140_v32, %v2852_v10 }
  0xfa   : > { %v1235_v43 = vadd.f32 %v1203_v35, %v2840_v61  ;;  %v2865_v44 = vadd.f32 %v831_v36, %v2752_v21  ;;  %v2868_v45 = vadd.f32 %v872_v37, %v2752_v21  ;;  %v833_v46 = vpop.f32.mrf.mxu0  ;;  %v1382_v48 = vmul.f32 %v1350_v33, %v2765_v30  ;;  %v2875_v57 = vpop.eup %2503 }
  0xfb   : > { %v874_v47 = vpop.f32.mrf.mxu1  ;;  %v1265_v52 = vmul.f32 0.7978846, %v1233_v40  ;;  %v1234_v53 = vadd.f32 %v1202_v41, %v2845_v5  ;;  %v1204_v54 = vmul.f32 0.044715, %v1172_v42  ;;  %v2873_v55 = vadd.f32 %v833_v46, %v2752_v21  ;;  %v2884_v3 = vpop.eup %2505 }
  0xfc   : > { %v1267_v60 = vmul.f32 0.7978846, %v1235_v43  ;;  %v1141_v62 = vmul.f32 %v2865_v44, %v2865_v44  ;;  %v1143_v63 = vmul.f32 %v2868_v45, %v2868_v45  ;;  %v2882_v1 = vadd.f32 %v874_v47, %v2752_v21  ;;  %v835_v30 = vpop.f32.mrf.mxu0 }
  0xfd   : > { %v876_v2 = vpop.f32.mrf.mxu1  ;;  %2519 = vtanh.f32 %v1265_v52  ;;  %v1266_v4 = vmul.f32 0.7978846, %v1234_v53  ;;  %v1236_v6 = vadd.f32 %v1204_v54, %v2852_v10  ;;  %v1142_v7 = vmul.f32 %v2873_v55, %v2873_v55  ;;  %v2889_v8 = vpop.eup %2507 }
  0xfe   : > { %2521 = vtanh.f32 %v1267_v60  ;;  %v1173_v9 = vmul.f32 %v1141_v62, %v2865_v44  ;;  %v1175_v11 = vmul.f32 %v1143_v63, %v2868_v45  ;;  %v1144_v12 = vmul.f32 %v2882_v1, %v2882_v1  ;;  %v836_v13 = vpop.f32.mrf.mxu0  ;;  %v2895_v17 = vpop.eup %2509 }
  0xff   : > { %v877_v16 = vpop.f32.mrf.mxu1  ;;  %2523 = vtanh.f32 %v1266_v4  ;;  %v1268_v18 = vmul.f32 0.7978846, %v1236_v6  ;;  %v1174_v19 = vmul.f32 %v1142_v7, %v2873_v55  ;;  %v1415_v20 = vpack.c.bf16 %v1382_v48, %v1382_v48 }
 0x100   : > { %v1205_v22 = vmul.f32 0.044715, %v1173_v9  ;;  %v1207_v23 = vmul.f32 0.044715, %v1175_v11  ;;  %v1176_v27 = vmul.f32 %v1144_v12, %v2882_v1  ;;  %v1352_v28 = vmul.f32 0.5, %v1320_v38  ;;  %v913_v25 = vpop.f32.mrf.mxu0 }
 0x101   : > { %v954_v32 = vpop.f32.mrf.mxu1  ;;  %2525 = vtanh.f32 %v1268_v18  ;;  %v1206_v33 = vmul.f32 0.044715, %v1174_v19  ;;  %2417 = vmatprep.subr.msk.bf16.mxu0 %vm1456_vm2, %v1415_v20  ;;  %v1349_v35 = vmul.f32 0.5, %v1317_v39  ;;  %v1319_v36 = vadd.f32 1.0, %v2502_v51 }
 0x102   : > { %v2900_v37 = vpop.eup %2511  ;;  %v1237_v40 = vadd.f32 %v1205_v22, %v2865_v44  ;;  %v1239_v41 = vadd.f32 %v1207_v23, %v2868_v45  ;;  %v1208_v42 = vmul.f32 0.044715, %v1176_v27  ;;  %v1384_v43 = vmul.f32 %v1352_v28, %v2768_v31  ;;  %v915_v46 = vpop.f32.mrf.mxu0  ;;  %v2934_v22 = vld [vmem:[%s3225_s3] sm:$0x3] }
 0x103   : > { %v956_v38 = vpop.f32.mrf.mxu1  ;;  %v2905_v47 = vpop.eup %2513  ;;  %v1238_v48 = vadd.f32 %v1206_v33, %v2873_v55  ;;  %v1381_v52 = vmul.f32 %v1349_v35, %v2755_v24  ;;  %v1351_v53 = vmul.f32 0.5, %v1319_v36  ;;  %v2910_v39 = vadd.f32 %v913_v25, %v2752_v21 }
 0x104   : > { %v1269_v51 = vmul.f32 0.7978846, %v1237_v40  ;;  %v1271_v54 = vmul.f32 0.7978846, %v1239_v41  ;;  %v1240_v60 = vadd.f32 %v1208_v42, %v2882_v1  ;;  %v1417_v62 = vpack.c.bf16 %v1384_v43, %v1384_v43  ;;  %v917_v63 = vpop.f32.mrf.mxu0 }
 0x105   : > { %v958_v30 = vpop.f32.mrf.mxu1  ;;  %v2913_v31 = vpop.eup %2515  ;;  %v1270_v2 = vmul.f32 0.7978846, %v1238_v48  ;;  %v1414_v4 = vpack.c.bf16 %v1381_v52, %v1381_v52  ;;  %v1383_v6 = vmul.f32 %v1351_v53, %v2758_v26  ;;  %v1145_v24 = vmul.f32 %v2910_v39, %v2910_v39 }
 0x106   : > { %v2918_v7 = vpop.eup %2517  ;;  %2527 = vtanh.f32 %v1269_v51  ;;  %v1272_v9 = vmul.f32 0.7978846, %v1240_v60  ;;  %2419 = vmatprep.subr.msk.bf16.mxu1 %vm1456_vm2, %v1417_v62  ;;  %v2922_v11 = vadd.f32 %v954_v32, %v2752_v21  ;;  %v2925_v12 = vadd.f32 %v915_v46, %v2752_v21  ;;  %v918_v13 = vpop.f32.mrf.mxu0 }
 0x107   : > { %v959_v16 = vpop.f32.mrf.mxu1  ;;  %2529 = vtanh.f32 %v1271_v54  ;;  %v1458_v26 = vsel %vm1456_vm2, %v1414_v4, 0  ;;  %v1416_v18 = vpack.c.bf16 %v1383_v6, %v1383_v6  ;;  %v1177_v19 = vmul.f32 %v1145_v24, %v2910_v39 }
 0x108   : > { %2531 = vtanh.f32 %v1270_v2  ;;  %1568 = vmatpush1.bf16.msra.mxu0 %v1458_v26  ;;  %v1147_v20 = vmul.f32 %v2922_v11, %v2922_v11  ;;  %v1146_v23 = vmul.f32 %v2925_v12, %v2925_v12  ;;  %v2939_v27 = vadd.f32 %v956_v38, %v2752_v21  ;;  %v995_v28 = vpop.f32.mrf.mxu0 }
 0x109   : > { %v1036_v25 = vpop.f32.mrf.mxu1  ;;  %2533 = vtanh.f32 %v1272_v9  ;;  %v1464_v32 = vsel %vm1456_vm2, %v1416_v18, 0  ;;  %v1209_v33 = vmul.f32 0.044715, %v1177_v19  ;;  %v1322_v35 = vadd.f32 1.0, %v2889_v8 }
 0x10a   : > { %v2943_v36 = vpop.eup %2519  ;;  %1609 = vmatpush1.bf16.msra.mxu1 %v1464_v32  ;;  %v1179_v40 = vmul.f32 %v1147_v20, %v2922_v11  ;;  %v1178_v41 = vmul.f32 %v1146_v23, %v2925_v12  ;;  %v1148_v42 = vmul.f32 %v2939_v27, %v2939_v27  ;;  %v1324_v43 = vadd.f32 1.0, %v2895_v17  ;;  %v997_v46 = vpop.f32.mrf.mxu0 }
 0x10b   : > { %v1038_v38 = vpop.f32.mrf.mxu1  ;;  %v2950_v48 = vpop.eup %2521  ;;  %v1241_v52 = vadd.f32 %v1209_v33, %v2910_v39  ;;  %2418 = vmatmul.mubr.msk.bf16.vlgmr.msra.gmra.mxu0 %vm1452_vm3, %v2934_v22  ;;  %v1354_v8 = vmul.f32 0.5, %v1322_v35  ;;  %v1321_v53 = vadd.f32 1.0, %v2875_v57  ;;  %v1323_v51 = vadd.f32 1.0, %v2884_v3 }
 0x10c   : > { %v2957_v54 = vpop.eup %2523  ;;  %v1211_v60 = vmul.f32 0.044715, %v1179_v40  ;;  %v1210_v62 = vmul.f32 0.044715, %v1178_v41  ;;  %v1180_v17 = vmul.f32 %v1148_v42, %v2939_v27  ;;  %v1356_v63 = vmul.f32 0.5, %v1324_v43  ;;  %1667 = vmatprep.mubr.bf16.mxu0 %v2583_v0  ;;  %v999_v30 = vpop.f32.mrf.mxu0 }
 0x10d   : > { %v1040_v2 = vpop.f32.mrf.mxu1  ;;  %v1273_v4 = vmul.f32 0.7978846, %v1241_v52  ;;  %2420 = vmatmul.mubr.msk.bf16.vlgmr.msra.gmra.mxu1 %vm1452_vm3, %v2934_v22  ;;  %v1386_v6 = vmul.f32 %v1354_v8, %v2792_v58  ;;  %v1353_v57 = vmul.f32 0.5, %v1321_v53  ;;  %v1355_v24 = vmul.f32 0.5, %v1323_v51 }
 0x10e   : > { %v2964_v3 = vpop.eup %2525  ;;  %v1243_v9 = vadd.f32 %v1211_v60, %v2922_v11  ;;  %v1242_v13 = vadd.f32 %v1210_v62, %v2925_v12  ;;  %v1212_v16 = vmul.f32 0.044715, %v1180_v17  ;;  %v1388_v26 = vmul.f32 %v1356_v63, %v2795_v59  ;;  %1708 = vmatprep.mubr.bf16.mxu1 %v2583_v0  ;;  %v1000_v18 = vpop.f32.mrf.mxu0 }
 0x10f   : > { %v1041_v19 = vpop.f32.mrf.mxu1  ;;  %2535 = vtanh.f32 %v1273_v4  ;;  %v1419_v20 = vpack.c.bf16 %v1386_v6, %v1386_v6  ;;  %v1385_v23 = vmul.f32 %v1353_v57, %v2780_v49  ;;  %v1387_v58 = vmul.f32 %v1355_v24, %v2783_v50 }
 0x110   : > { %v1275_v32 = vmul.f32 0.7978846, %v1243_v9  ;;  %v1274_v33 = vmul.f32 0.7978846, %v1242_v13  ;;  %v1244_v35 = vadd.f32 %v1212_v16, %v2939_v27  ;;  %v1421_v40 = vpack.c.bf16 %v1388_v26, %v1388_v26  ;;  %v1077_v41 = vpop.f32.mrf.mxu0 }
 0x111   : > { %v2973_v42 = vpop.f32.mrf.mxu1  ;;  %2421 = vmatprep.subr.msk.bf16.mxu0 %vm1456_vm2, %v1419_v20  ;;  %v1418_v59 = vpack.c.bf16 %v1385_v23, %v1385_v23  ;;  %v1420_v43 = vpack.c.bf16 %v1387_v58, %v1387_v58  ;;  %v2977_v52 = vadd.f32 %v995_v28, %v2752_v21  ;;  %v2980_v8 = vadd.f32 %v1036_v25, %v2752_v21 }
 0x112   : > { %2537 = vtanh.f32 %v1275_v32  ;;  %v1276_v49 = vmul.f32 0.7978846, %v1244_v35  ;;  %2423 = vmatprep.subr.msk.bf16.mxu1 %vm1456_vm2, %v1421_v40  ;;  %v2984_v50 = vadd.f32 %v997_v46, %v2752_v21  ;;  %v2987_v53 = vadd.f32 %v1038_v38, %v2752_v21  ;;  %v2989_v51 = vpop.f32.mrf.mxu0 }
 0x113   : > { %v2991_v60 = vpop.f32.mrf.mxu1  ;;  %v2993_v62 = vpop.eup %2527  ;;  %2539 = vtanh.f32 %v1274_v33  ;;  %v1470_v28 = vsel %vm1456_vm2, %v1418_v59, 0  ;;  %v1476_v25 = vsel %vm1456_vm2, %v1420_v43, 0  ;;  %v1149_v17 = vmul.f32 %v2977_v52, %v2977_v52 }
 0x114   : > { %v2999_v63 = vpop.eup %2529  ;;  %2541 = vtanh.f32 %v1276_v49  ;;  %1650 = vmatpush1.bf16.msra.mxu0 %v1470_v28  ;;  %1691 = vmatpush1.bf16.msra.mxu1 %v1476_v25  ;;  %v1151_v46 = vmul.f32 %v2980_v8, %v2980_v8  ;;  %v1150_v38 = vmul.f32 %v2984_v50, %v2984_v50  ;;  %v1152_v30 = vmul.f32 %v2987_v53, %v2987_v53  ;;  %v1081_v2 = vpop.f32.mrf.mxu0 }
 0x115   : > { %v1122_v4 = vpop.f32.mrf.mxu1  ;;  %v3007_v6 = vpop.eup %2531  ;;  %v1181_v57 = vmul.f32 %v1149_v17, %v2977_v52  ;;  %v1326_v24 = vadd.f32 1.0, %v2913_v31  ;;  %v1328_v9 = vadd.f32 1.0, %v2918_v7  ;;  %v1325_v13 = vadd.f32 1.0, %v2900_v37 }
 0x116   : > { %v3013_v16 = vpop.eup %2533  ;;  %v1183_v26 = vmul.f32 %v1151_v46, %v2980_v8  ;;  %v1182_v18 = vmul.f32 %v1150_v38, %v2984_v50  ;;  %v1184_v19 = vmul.f32 %v1152_v30, %v2987_v53  ;;  %v1327_v20 = vadd.f32 1.0, %v2905_v47  ;;  %v1082_v23 = vpop.f32.mrf.mxu0 }
 0x117   : > { %v1123_v58 = vpop.f32.mrf.mxu1  ;;  %v1213_v32 = vmul.f32 0.044715, %v1181_v57  ;;  %2422 = vmatmul.mubr.msk.bf16.vlgmr.msra.gmra.mxu0 %vm1452_vm3, %v2934_v22  ;;  %2424 = vmatmul.mubr.msk.bf16.vlgmr.msra.gmra.mxu1 %vm1452_vm3, %v2934_v22  ;;  %v1358_v37 = vmul.f32 0.5, %v1326_v24  ;;  %v1360_v31 = vmul.f32 0.5, %v1328_v9  ;;  %v1357_v7 = vmul.f32 0.5, %v1325_v13 }
 0x118   : > { %v1215_v33 = vmul.f32 0.044715, %v1183_v26  ;;  %v1214_v35 = vmul.f32 0.044715, %v1182_v18  ;;  %v1216_v40 = vmul.f32 0.044715, %v1184_v19  ;;  %v3024_v59 = vadd.f32 %v1077_v41, %v2752_v21  ;;  %1749 = vmatprep.mubr.bf16.mxu0 %v2583_v0  ;;  %1790 = vmatprep.mubr.bf16.mxu1 %v2583_v0 }
 0x119   : > { %v1245_v47 = vadd.f32 %v1213_v32, %v2977_v52  ;;  %v1390_v43 = vmul.f32 %v1358_v37, %v2819_v29  ;;  %v1392_v49 = vmul.f32 %v1360_v31, %v2823_v34  ;;  %v1389_v28 = vmul.f32 %v1357_v7, %v2807_v14 }
 0x11a   : > { %v1247_v25 = vadd.f32 %v1215_v33, %v2980_v8  ;;  %v1246_v17 = vadd.f32 %v1214_v35, %v2984_v50  ;;  %v1248_v46 = vadd.f32 %v1216_v40, %v2987_v53  ;;  %v1359_v41 = vmul.f32 0.5, %v1327_v20 }
 0x11b   : > { %v1277_v38 = vmul.f32 0.7978846, %v1245_v47  ;;  %v1423_v30 = vpack.c.bf16 %v1390_v43, %v1390_v43  ;;  %v1425_v2 = vpack.c.bf16 %v1392_v49, %v1392_v49  ;;  %v1422_v4 = vpack.c.bf16 %v1389_v28, %v1389_v28 }
 0x11c   : > { %v3035_v57 = vpop.eup %2535  ;;  %v1279_v24 = vmul.f32 0.7978846, %v1247_v25  ;;  %v1278_v9 = vmul.f32 0.7978846, %v1246_v17  ;;  %v1280_v29 = vmul.f32 0.7978846, %v1248_v46  ;;  %v1391_v34 = vmul.f32 %v1359_v41, %v2810_v15 }
 0x11d   : > { %2543 = vtanh.f32 %v1277_v38  ;;  %2425 = vmatprep.subr.msk.bf16.mxu0 %vm1456_vm2, %v1423_v30  ;;  %2427 = vmatprep.subr.msk.bf16.mxu1 %vm1456_vm2, %v1425_v2  ;;  %v1482_v14 = vsel %vm1456_vm2, %v1422_v4, 0  ;;  %v1153_v13 = vmul.f32 %v3024_v59, %v3024_v59  ;;  %v3045_v26 = vadd.f32 %v2973_v42, %v2752_v21 }
 0x11e   : > { %2545 = vtanh.f32 %v1279_v24  ;;  %1732 = vmatpush1.bf16.msra.mxu0 %v1482_v14  ;;  %v1424_v18 = vpack.c.bf16 %v1391_v34, %v1391_v34  ;;  %v3049_v15 = vadd.f32 %v2989_v51, %v2752_v21  ;;  %v3053_v19 = vadd.f32 %v2991_v60, %v2752_v21 }
 0x11f   : > { %v3055_v20 = vpop.eup %2537  ;;  %2547 = vtanh.f32 %v1278_v9  ;;  %v1185_v23 = vmul.f32 %v1153_v13, %v3024_v59  ;;  %v1155_v42 = vmul.f32 %v3045_v26, %v3045_v26  ;;  %v1330_v58 = vadd.f32 1.0, %v2957_v54 }
 0x120   : > { %v2540_v32 = vpop.eup %2539  ;;  %2549 = vtanh.f32 %v1280_v29  ;;  %v1488_v37 = vsel %vm1456_vm2, %v1424_v18, 0  ;;  %v1154_v51 = vmul.f32 %v3049_v15, %v3049_v15  ;;  %v1156_v21 = vmul.f32 %v3053_v19, %v3053_v19 }
 0x121   : > { %v2542_v60 = vpop.eup %2541  ;;  %1773 = vmatpush1.bf16.msra.mxu1 %v1488_v37  ;;  %v1217_v31 = vmul.f32 0.044715, %v1185_v23  ;;  %v1187_v7 = vmul.f32 %v1155_v42, %v3045_v26  ;;  %2426 = vmatmul.mubr.msk.bf16.vlgmr.msra.gmra.mxu0 %vm1452_vm3, %v2934_v22  ;;  %v1362_v33 = vmul.f32 0.5, %v1330_v58  ;;  %v1332_v54 = vadd.f32 1.0, %v2964_v3 }
 0x122   : > { %v1186_v35 = vmul.f32 %v1154_v51, %v3049_v15  ;;  %v1188_v40 = vmul.f32 %v1156_v21, %v3053_v19  ;;  %v1329_v47 = vadd.f32 1.0, %v2943_v36  ;;  %v1331_v43 = vadd.f32 1.0, %v2950_v48  ;;  %1831 = vmatprep.mubr.bf16.mxu0 %v2583_v0 }
 0x123   : > { %v1249_v49 = vadd.f32 %v1217_v31, %v3024_v59  ;;  %v1219_v28 = vmul.f32 0.044715, %v1187_v7  ;;  %v1394_v25 = vmul.f32 %v1362_v33, %v2845_v5  ;;  %v1364_v17 = vmul.f32 0.5, %v1332_v54 }
 0x124   : > { %2428 = vmatmul.mubr.msk.bf16.vlgmr.msra.gmra.mxu1 %vm1452_vm3, %v2934_v22  ;;  %v1218_v3 = vmul.f32 0.044715, %v1186_v35  ;;  %v1220_v46 = vmul.f32 0.044715, %v1188_v40  ;;  %v1361_v41 = vmul.f32 0.5, %v1329_v47  ;;  %v1363_v38 = vmul.f32 0.5, %v1331_v43 }
 0x125   : > { %v1281_v30 = vmul.f32 0.7978846, %v1249_v49  ;;  %v1251_v36 = vadd.f32 %v1219_v28, %v3045_v26  ;;  %v1427_v2 = vpack.c.bf16 %v1394_v25, %v1394_v25  ;;  %v1396_v48 = vmul.f32 %v1364_v17, %v2852_v10  ;;  %1872 = vmatprep.mubr.bf16.mxu1 %v2583_v0 }
 0x126   : > { %v1250_v4 = vadd.f32 %v1218_v3, %v3049_v15  ;;  %v1252_v5 = vadd.f32 %v1220_v46, %v3053_v19  ;;  %v1393_v24 = vmul.f32 %v1361_v41, %v2837_v56  ;;  %v1395_v9 = vmul.f32 %v1363_v38, %v2840_v61 }
 0x127   : > { %2551 = vtanh.f32 %v1281_v30  ;;  %v1283_v29 = vmul.f32 0.7978846, %v1251_v36  ;;  %2429 = vmatprep.subr.msk.bf16.mxu0 %vm1456_vm2, %v1427_v2  ;;  %v1429_v34 = vpack.c.bf16 %v1396_v48, %v1396_v48  ;;  %v1334_v14 = vadd.f32 1.0, %v3007_v6 }
 0x128   : > { %v1282_v13 = vmul.f32 0.7978846, %v1250_v4  ;;  %v1284_v18 = vmul.f32 0.7978846, %v1252_v5  ;;  %v1426_v10 = vpack.c.bf16 %v1393_v24, %v1393_v24  ;;  %v1428_v23 = vpack.c.bf16 %v1395_v9, %v1395_v9 }
 0x129   : > { %2553 = vtanh.f32 %v1283_v29  ;;  %2431 = vmatprep.subr.msk.bf16.mxu1 %vm1456_vm2, %v1429_v34  ;;  %v1366_v42 = vmul.f32 0.5, %v1334_v14  ;;  %v1336_v58 = vadd.f32 1.0, %v3013_v16  ;;  %v1333_v56 = vadd.f32 1.0, %v2993_v62 }
 0x12a   : > { %v2544_v61 = vpop.eup %2543  ;;  %2555 = vtanh.f32 %v1282_v13  ;;  %v1494_v37 = vsel %vm1456_vm2, %v1426_v10, 0  ;;  %v1500_v51 = vsel %vm1456_vm2, %v1428_v23, 0  ;;  %v1335_v6 = vadd.f32 1.0, %v2999_v63 }
 0x12b   : > { %v2546_v21 = vpop.eup %2545  ;;  %2557 = vtanh.f32 %v1284_v18  ;;  %1814 = vmatpush1.bf16.msra.mxu0 %v1494_v37  ;;  %1855 = vmatpush1.bf16.msra.mxu1 %v1500_v51  ;;  %v1398_v31 = vmul.f32 %v1366_v42, %v2873_v55  ;;  %v1368_v7 = vmul.f32 0.5, %v1336_v58  ;;  %v1365_v33 = vmul.f32 0.5, %v1333_v56 }
 0x12c   : > { %v2548_v54 = vpop.eup %2547  ;;  %v1367_v16 = vmul.f32 0.5, %v1335_v6  ;;  %v1338_v35 = vadd.f32 1.0, %v2540_v32  ;;  %v1340_v62 = vadd.f32 1.0, %v2542_v60  ;;  %v1337_v40 = vadd.f32 1.0, %v3035_v57 }
 0x12d   : > { %v2550_v47 = vpop.eup %2549  ;;  %v1431_v43 = vpack.c.bf16 %v1398_v31, %v1398_v31  ;;  %v1400_v49 = vmul.f32 %v1368_v7, %v2882_v1  ;;  %v1397_v63 = vmul.f32 %v1365_v33, %v2865_v44  ;;  %v1339_v28 = vadd.f32 1.0, %v3055_v20 }
 0x12e   : > { %2430 = vmatmul.mubr.msk.bf16.vlgmr.msra.gmra.mxu0 %vm1452_vm3, %v2934_v22  ;;  %2432 = vmatmul.mubr.msk.bf16.vlgmr.msra.gmra.mxu1 %vm1452_vm3, %v2934_v22  ;;  %v1399_v55 = vmul.f32 %v1367_v16, %v2868_v45  ;;  %v1370_v32 = vmul.f32 0.5, %v1338_v35  ;;  %v1372_v60 = vmul.f32 0.5, %v1340_v62  ;;  %v1369_v25 = vmul.f32 0.5, %v1337_v40 }
 0x12f   : > { %2433 = vmatprep.subr.msk.bf16.mxu0 %vm1456_vm2, %v1431_v43  ;;  %v1433_v57 = vpack.c.bf16 %v1400_v49, %v1400_v49  ;;  %v1430_v17 = vpack.c.bf16 %v1397_v63, %v1397_v63  ;;  %1913 = vmatprep.mubr.bf16.mxu0 %v2583_v0  ;;  %v1371_v44 = vmul.f32 0.5, %v1339_v28  ;;  %v1342_v1 = vadd.f32 1.0, %v2548_v54  ;;  %v3156_v28 = vpop.permute.xlu0 %1449 }
 0x130   : > { %v1432_v20 = vpack.c.bf16 %v1399_v55, %v1399_v55  ;;  %1954 = vmatprep.mubr.bf16.mxu1 %v2583_v0  ;;  %v1402_v3 = vmul.f32 %v1370_v32, %v2925_v12  ;;  %v1404_v46 = vmul.f32 %v1372_v60, %v2939_v27  ;;  %v1401_v45 = vmul.f32 %v1369_v25, %v2910_v39 }
 0x131   : > { %2435 = vmatprep.subr.msk.bf16.mxu1 %vm1456_vm2, %v1433_v57  ;;  %v1506_v41 = vsel %vm1456_vm2, %v1430_v17, 0  ;;  %v1403_v38 = vmul.f32 %v1371_v44, %v2922_v11  ;;  %v1374_v30 = vmul.f32 0.5, %v1342_v1  ;;  %v1344_v36 = vadd.f32 1.0, %v2550_v47 }
 0x132   : > { %1896 = vmatpush1.bf16.msra.mxu0 %v1506_v41  ;;  %v1512_v2 = vsel %vm1456_vm2, %v1432_v20, 0  ;;  %v1435_v48 = vpack.c.bf16 %v1402_v3, %v1402_v3  ;;  %v1437_v4 = vpack.c.bf16 %v1404_v46, %v1404_v46  ;;  %v1434_v5 = vpack.c.bf16 %v1401_v45, %v1401_v45 }
 0x133   : > { %1937 = vmatpush1.bf16.msra.mxu1 %v1512_v2  ;;  %v1436_v12 = vpack.c.bf16 %v1403_v38, %v1403_v38  ;;  %v1406_v27 = vmul.f32 %v1374_v30, %v2984_v50  ;;  %v1376_v24 = vmul.f32 0.5, %v1344_v36  ;;  %v1341_v39 = vadd.f32 1.0, %v2544_v61 }
 0x134   : > { %v2552_v9 = vpop.eup %2551  ;;  %2437 = vmatprep.subr.msk.bf16.mxu0 %vm1456_vm2, %v1435_v48  ;;  %2439 = vmatprep.subr.msk.bf16.mxu1 %vm1456_vm2, %v1437_v4  ;;  %v1343_v11 = vadd.f32 1.0, %v2546_v21  ;;  %v1518_v50 = vsel %vm1456_vm2, %v1434_v5, 0 }
 0x135   : > { %v1439_v29 = vpack.c.bf16 %v1406_v27, %v1406_v27  ;;  %v1408_v34 = vmul.f32 %v1376_v24, %v2987_v53  ;;  %v1373_v14 = vmul.f32 0.5, %v1341_v39  ;;  %v1524_v18 = vsel %vm1456_vm2, %v1436_v12, 0 }
 0x136   : > { %v2554_v13 = vpop.eup %2553  ;;  %2434 = vmatmul.mubr.msk.bf16.vlgmr.msra.gmra.mxu0 %vm1452_vm3, %v2934_v22  ;;  %2436 = vmatmul.mubr.msk.bf16.vlgmr.msra.gmra.mxu1 %vm1452_vm3, %v2934_v22  ;;  %v1375_v10 = vmul.f32 0.5, %v1343_v11  ;;  %v1345_v23 = vadd.f32 1.0, %v2552_v9 }
 0x137   : > { %v2556_v42 = vpop.eup %2555  ;;  %1978 = vmatpush1.bf16.msra.mxu0 %v1518_v50  ;;  %2019 = vmatpush1.bf16.msra.mxu1 %v1524_v18  ;;  %v1441_v58 = vpack.c.bf16 %v1408_v34, %v1408_v34  ;;  %v1405_v53 = vmul.f32 %v1373_v14, %v2977_v52  ;;  %v1347_v56 = vadd.f32 1.0, %v2554_v13 }
 0x138   : > { %v2558_v61 = vpop.eup %2557  ;;  %1995 = vmatprep.mubr.bf16.mxu0 %v2583_v0  ;;  %2036 = vmatprep.mubr.bf16.mxu1 %v2583_v0  ;;  %v1407_v37 = vmul.f32 %v1375_v10, %v2980_v8  ;;  %v1346_v51 = vadd.f32 1.0, %v2556_v42  ;;  %v1377_v21 = vmul.f32 0.5, %v1345_v23 }
 0x139   : > { %2441 = vmatprep.subr.msk.bf16.mxu0 %vm1456_vm2, %v1439_v29  ;;  %2443 = vmatprep.subr.msk.bf16.mxu1 %vm1456_vm2, %v1441_v58  ;;  %v1348_v6 = vadd.f32 1.0, %v2558_v61  ;;  %v1438_v31 = vpack.c.bf16 %v1405_v53, %v1405_v53  ;;  %v1379_v54 = vmul.f32 0.5, %v1347_v56 }
 0x13a   : > { %v1440_v7 = vpack.c.bf16 %v1407_v37, %v1407_v37  ;;  %v1378_v33 = vmul.f32 0.5, %v1346_v51  ;;  %v1409_v62 = vmul.f32 %v1377_v21, %v3024_v59 }
 0x13b   : > { %v1380_v52 = vmul.f32 0.5, %v1348_v6  ;;  %v1530_v8 = vsel %vm1456_vm2, %v1438_v31, 0  ;;  %v1411_v43 = vmul.f32 %v1379_v54, %v3045_v26 }
 0x13c   : > { %v1410_v16 = vmul.f32 %v1378_v33, %v3049_v15  ;;  %v1536_v40 = vsel %vm1456_vm2, %v1440_v7, 0  ;;  %v1442_v59 = vpack.c.bf16 %v1409_v62, %v1409_v62 }
 0x13d   : > { %v1412_v35 = vmul.f32 %v1380_v52, %v3053_v19  ;;  %v1444_v19 = vpack.c.bf16 %v1411_v43, %v1411_v43 }
 0x13e   : > { %2438 = vmatmul.mubr.msk.bf16.vlgmr.msra.gmra.mxu0 %vm1452_vm3, %v2934_v22  ;;  %2440 = vmatmul.mubr.msk.bf16.vlgmr.msra.gmra.mxu1 %vm1452_vm3, %v2934_v22  ;;  %v1443_v47 = vpack.c.bf16 %v1410_v16, %v1410_v16  ;;  %v1542_v26 = vsel %vm1456_vm2, %v1442_v59, 0 }
 0x13f   : > { %2060 = vmatpush1.bf16.msra.mxu0 %v1530_v8  ;;  %2101 = vmatpush1.bf16.msra.mxu1 %v1536_v40  ;;  %v1445_v15 = vpack.c.bf16 %v1412_v35, %v1412_v35  ;;  %v1548_v49 = vsel %vm1456_vm2, %v1444_v19, 0 }
 0x140   : > { %2077 = vmatprep.mubr.bf16.mxu0 %v2583_v0  ;;  %2118 = vmatprep.mubr.bf16.mxu1 %v2583_v0 }
 0x141   : > { %2445 = vmatprep.subr.msk.bf16.mxu0 %vm1456_vm2, %v1443_v47  ;;  %2447 = vmatprep.subr.msk.bf16.mxu1 %vm1456_vm2, %v1445_v15 }
 0x146   : > { %2442 = vmatmul.mubr.msk.bf16.vlgmr.msra.gmra.mxu0 %vm1452_vm3, %v2934_v22  ;;  %2444 = vmatmul.mubr.msk.bf16.vlgmr.msra.gmra.mxu1 %vm1452_vm3, %v2934_v22 }
 0x147   : > { %2142 = vmatpush1.bf16.msra.mxu0 %v1542_v26  ;;  %2183 = vmatpush1.bf16.msra.mxu1 %v1548_v49 }
 0x148   : > { %2159 = vmatprep.mubr.bf16.mxu0 %v2583_v0  ;;  %2200 = vmatprep.mubr.bf16.mxu1 %v2583_v0 }
 0x14e   : > { %2446 = vmatmul.mubr.msk.bf16.vlgmr.msra.gmra.mxu0 %vm1452_vm3, %v2934_v22  ;;  %2448 = vmatmul.mubr.msk.bf16.vlgmr.msra.gmra.mxu1 %vm1452_vm3, %v2934_v22 }
 0x1cb   : > { %v1587_v63 = vpop.f32.mrf.mxu0 }
 0x1cc   : > { %v1588_v60 = vadd.f32 %v1587_v63, %v3156_v28 }
 0x1cd   : > { %v1628_v55 = vpop.f32.mrf.mxu1  ;;  %v1589_v32 = vpop.f32.mrf.mxu0 }
 0x1ce   : > { %v1590_v25 = vadd.f32 %v1589_v32, %v3156_v28  ;;  %v1629_v22 = vadd.f32 %v1628_v55, %v3156_v28 }
 0x1cf   : > { %v1630_v0 = vpop.f32.mrf.mxu1  ;;  %v1591_v57 = vpop.f32.mrf.mxu0 }
 0x1d0   : > { %v2241_v17 = vcombine.low %v1588_v60, %v1590_v25  ;;  %v1631_v44 = vadd.f32 %v1630_v0, %v3156_v28 }
 0x1d1   : > { %v1632_v1 = vpop.f32.mrf.mxu1  ;;  %v1592_v20 = vpop.f32.mrf.mxu0 }
 0x1d2   : > { %2273 = vst [vmem:[%s3165_s11] sm:$0x77] %v2241_v17  ;;  %v2242_v3 = vcombine.low %v1629_v22, %v1631_v44 }
 0x1d3   : > { %v1633_v46 = vpop.f32.mrf.mxu1 }
 0x1d4   : > { %2274 = vst [vmem:[%s3165_s11 + $0x8] sm:$0x77] %v2242_v3 }
 0x1d7   : > { %v1669_v45 = vpop.f32.mrf.mxu0  ;;  %v1710_v41 = vpop.f32.mrf.mxu1 }
 0x1d8   : > { %v1670_v36 = vadd.f32 %v1669_v45, %v3156_v28  ;;  %v1711_v2 = vadd.f32 %v1710_v41, %v3156_v28 }
 0x1d9   : > { %v1671_v38 = vpop.f32.mrf.mxu0  ;;  %v1712_v30 = vpop.f32.mrf.mxu1 }
 0x1da   : > { %v1672_v48 = vadd.f32 %v1671_v38, %v3156_v28  ;;  %v1713_v4 = vadd.f32 %v1712_v30, %v3156_v28 }
 0x1db   : > { %v1673_v5 = vpop.f32.mrf.mxu0  ;;  %v1714_v12 = vpop.f32.mrf.mxu1 }
 0x1dc   : > { %v2243_v27 = vcombine.low %v1670_v36, %v1672_v48  ;;  %v2244_v24 = vcombine.low %v1711_v2, %v1713_v4 }
 0x1dd   : > { %v1674_v39 = vpop.f32.mrf.mxu0  ;;  %v1715_v9 = vpop.f32.mrf.mxu1 }
 0x1de   : > { %2275 = vst [vmem:[%s3165_s11 + $0x10] sm:$0x77] %v2243_v27  ;;  %2276 = vst [vmem:[%s3165_s11 + $0x18] sm:$0x77] %v2244_v24 }
 0x1e1   : > { %v1751_v11 = vpop.f32.mrf.mxu0 }
 0x1e2   : > { %v1752_v34 = vadd.f32 %v1751_v11, %v3156_v28 }
 0x1e3   : > { %v1753_v29 = vpop.f32.mrf.mxu0 }
 0x1e4   : > { %v1792_v14 = vpop.f32.mrf.mxu1  ;;  %v1754_v13 = vadd.f32 %v1753_v29, %v3156_v28 }
 0x1e5   : > { %v1755_v50 = vpop.f32.mrf.mxu0  ;;  %v1793_v23 = vadd.f32 %v1792_v14, %v3156_v28 }
 0x1e6   : > { %v2245_v18 = vcombine.low %v1752_v34, %v1754_v13  ;;  %v1794_v10 = vpop.f32.mrf.mxu1 }
 0x1e7   : > { %v1795_v42 = vadd.f32 %v1794_v10, %v3156_v28  ;;  %v1756_v58 = vpop.f32.mrf.mxu0 }
 0x1e8   : > { %2277 = vst [vmem:[%s3165_s11 + $0x20] sm:$0x77] %v2245_v18  ;;  %v1796_v53 = vpop.f32.mrf.mxu1 }
 0x1e9   : > { %v2246_v56 = vcombine.low %v1793_v23, %v1795_v42 }
 0x1ea   : > { %v1797_v61 = vpop.f32.mrf.mxu1 }
 0x1eb   : > { %2278 = vst [vmem:[%s3165_s11 + $0x28] sm:$0x77] %v2246_v56 }
 0x1ee   : > { %v1833_v37 = vpop.f32.mrf.mxu0  ;;  %v1874_v51 = vpop.f32.mrf.mxu1 }
 0x1ef   : > { %v1834_v31 = vadd.f32 %v1833_v37, %v3156_v28  ;;  %v1875_v7 = vadd.f32 %v1874_v51, %v3156_v28 }
 0x1f0   : > { %v1835_v6 = vpop.f32.mrf.mxu0  ;;  %v1876_v21 = vpop.f32.mrf.mxu1 }
 0x1f1   : > { %v1836_v33 = vadd.f32 %v1835_v6, %v3156_v28  ;;  %v1877_v54 = vadd.f32 %v1876_v21, %v3156_v28 }
 0x1f2   : > { %v1837_v52 = vpop.f32.mrf.mxu0  ;;  %v1878_v16 = vpop.f32.mrf.mxu1 }
 0x1f3   : > { %v2247_v35 = vcombine.low %v1834_v31, %v1836_v33  ;;  %v2248_v62 = vcombine.low %v1875_v7, %v1877_v54 }
 0x1f4   : > { %v1838_v8 = vpop.f32.mrf.mxu0  ;;  %v1879_v40 = vpop.f32.mrf.mxu1 }
 0x1f5   : > { %2279 = vst [vmem:[%s3165_s11 + $0x30] sm:$0x77] %v2247_v35  ;;  %2280 = vst [vmem:[%s3165_s11 + $0x38] sm:$0x77] %v2248_v62 }
 0x1f6   : > { %v1915_v47 = vpop.f32.mrf.mxu0  ;;  %v1956_v43 = vpop.f32.mrf.mxu1 }
 0x1f7   : > { %v1916_v19 = vadd.f32 %v1915_v47, %v3156_v28  ;;  %v1957_v26 = vadd.f32 %v1956_v43, %v3156_v28 }
 0x1f8   : > { %v1917_v15 = vpop.f32.mrf.mxu0  ;;  %v1958_v59 = vpop.f32.mrf.mxu1 }
 0x1f9   : > { %v1918_v49 = vadd.f32 %v1917_v15, %v3156_v28  ;;  %v1959_v63 = vadd.f32 %v1958_v59, %v3156_v28 }
 0x1fa   : > { %v1919_v55 = vpop.f32.mrf.mxu0  ;;  %v1960_v32 = vpop.f32.mrf.mxu1 }
 0x1fb   : > { %v2249_v60 = vcombine.low %v1916_v19, %v1918_v49  ;;  %v2250_v25 = vcombine.low %v1957_v26, %v1959_v63 }
 0x1fc   : > { %v1920_v0 = vpop.f32.mrf.mxu0  ;;  %v1961_v57 = vpop.f32.mrf.mxu1 }
 0x1fd   : > { %2281 = vst [vmem:[%s3165_s11 + $0x40] sm:$0x77] %v2249_v60  ;;  %2282 = vst [vmem:[%s3165_s11 + $0x48] sm:$0x77] %v2250_v25 }
 0x1fe   : > { %v1997_v22 = vpop.f32.mrf.mxu0  ;;  %v2038_v17 = vpop.f32.mrf.mxu1 }
 0x1ff   : > { %v1998_v20 = vadd.f32 %v1997_v22, %v3156_v28  ;;  %v2039_v3 = vadd.f32 %v2038_v17, %v3156_v28 }
 0x200   : > { %v1999_v44 = vpop.f32.mrf.mxu0  ;;  %v2040_v1 = vpop.f32.mrf.mxu1 }
 0x201   : > { %v2000_v46 = vadd.f32 %v1999_v44, %v3156_v28  ;;  %v2041_v45 = vadd.f32 %v2040_v1, %v3156_v28 }
 0x202   : > { %v2001_v41 = vpop.f32.mrf.mxu0  ;;  %v2042_v38 = vpop.f32.mrf.mxu1 }
 0x203   : > { %v2251_v30 = vcombine.low %v1998_v20, %v2000_v46  ;;  %v2252_v36 = vcombine.low %v2039_v3, %v2041_v45 }
 0x204   : > { %v2002_v2 = vpop.f32.mrf.mxu0  ;;  %v2043_v48 = vpop.f32.mrf.mxu1 }
 0x205   : > { %2283 = vst [vmem:[%s3165_s11 + $0x50] sm:$0x77] %v2251_v30  ;;  %2284 = vst [vmem:[%s3165_s11 + $0x58] sm:$0x77] %v2252_v36 }
 0x206   : > { %v2079_v4 = vpop.f32.mrf.mxu0  ;;  %v2120_v5 = vpop.f32.mrf.mxu1 }
 0x207   : > { %v2080_v24 = vadd.f32 %v2079_v4, %v3156_v28  ;;  %v2121_v39 = vadd.f32 %v2120_v5, %v3156_v28 }
 0x208   : > { %v2081_v12 = vpop.f32.mrf.mxu0  ;;  %v2122_v27 = vpop.f32.mrf.mxu1 }
 0x209   : > { %v2082_v9 = vadd.f32 %v2081_v12, %v3156_v28  ;;  %v2123_v11 = vadd.f32 %v2122_v27, %v3156_v28 }
 0x20a   : > { %v2083_v29 = vpop.f32.mrf.mxu0  ;;  %v2124_v34 = vpop.f32.mrf.mxu1 }
 0x20b   : > { %v2253_v14 = vcombine.low %v2080_v24, %v2082_v9  ;;  %v2254_v13 = vcombine.low %v2121_v39, %v2123_v11 }
 0x20c   : > { %v2084_v50 = vpop.f32.mrf.mxu0  ;;  %v2125_v18 = vpop.f32.mrf.mxu1 }
 0x20d   : > { %2285 = vst [vmem:[%s3165_s11 + $0x60] sm:$0x77] %v2253_v14  ;;  %2286 = vst [vmem:[%s3165_s11 + $0x68] sm:$0x77] %v2254_v13 }
 0x20e   : > { %v2161_v10 = vpop.f32.mrf.mxu0  ;;  %v2202_v23 = vpop.f32.mrf.mxu1 }
 0x20f   : > { %v2162_v53 = vadd.f32 %v2161_v10, %v3156_v28  ;;  %v2203_v56 = vadd.f32 %v2202_v23, %v3156_v28 }
 0x210   : > { %v2163_v42 = vpop.f32.mrf.mxu0  ;;  %v2204_v58 = vpop.f32.mrf.mxu1 }
 0x211   : > { %v2164_v61 = vadd.f32 %v2163_v42, %v3156_v28  ;;  %v2205_v37 = vadd.f32 %v2204_v58, %v3156_v28 }
 0x212   : > { %v2165_v51 = vpop.f32.mrf.mxu0  ;;  %v2206_v6 = vpop.f32.mrf.mxu1 }
 0x213   : > { %v2255_v21 = vcombine.low %v2162_v53, %v2164_v61  ;;  %v2256_v31 = vcombine.low %v2203_v56, %v2205_v37 }
 0x214   : > { %v2166_v7 = vpop.f32.mrf.mxu0  ;;  %v2207_v33 = vpop.f32.mrf.mxu1 }
 0x215   : > { %2287 = vst [vmem:[%s3165_s11 + $0x70] sm:$0x77] %v2255_v21  ;;  %2288 = vst [vmem:[%s3165_s11 + $0x78] sm:$0x77] %v2256_v31 }
 0x216 PF: > { %s15_s20 = sadd.s32 1, %s2581_s20   ;;  %s3228_s18 = smov %s2577_s19 }
 0x217   : > { %p12_p5 = scmp.ge.s32.totalorder %s15_s20, 4   ;;  %s3229_s19 = smov %s3231_s21 }
 0x219   :  { %14 = sbr.rel (!%p12_p5) target bundleno = 2 (0x2), region = 70 }

</bundles_post_ra>
